<compile_context>
chip_gen: v6e
topology: v6e:2x2x1
jax: 0.10.0
libtpu: 0.0.40
codegen_flags: <defaults>
</compile_context>

<pallas_src>
import math

import jax
import jax.numpy as jnp
from jax import lax
from jax.experimental import pallas as pl
from jax.experimental.pallas import tpu as pltpu

L = 24             # input sequence length (fc1 expects 24 * 6 -> L // 4 == 6)
C_IN = 531         # conv1 in_channels
C1 = 64            # conv1 out_channels
C2 = 128           # conv2 out_channels
HEADS = 8
HID = 24           # attention all_head_size
HEAD_DIM = HID // HEADS        # 3
L2 = L // 2                    # 12
SEQ = L // 4                   # 6  (tokens seen by attention / fc1)
FC1_IN = HID * SEQ             # 144
FC1_OUT = 256
FC2_OUT = 2
OUT_PAD = 128                  # lane-padded fc2 width (unmasked store)
K1 = 3 * C_IN                  # 1593 im2col contraction for conv1
K2 = 3 * C1                    # 192 fused-tap contraction for conv2


def _div_iota(shape, dim, div):
    """broadcasted_iota(dim) // div via f32 multiply + truncating cast (exact here)."""
    i = lax.broadcasted_iota(jnp.int32, shape, dim)
    return (i.astype(jnp.float32) * (1.0 / div)).astype(jnp.int32)


def _mod_iota(shape, dim, div):
    """broadcasted_iota(dim) % div (non-negative, small ranges -> exact)."""
    i = lax.broadcasted_iota(jnp.int32, shape, dim)
    return i - div * _div_iota(shape, dim, div)


def net2_kernel(xc_ref, w1_ref, b1_ref, w2_ref, b2_ref, wqkv_ref, bqkv_ref,
                wfc1_ref, bfc1_ref, wfc2_ref, bfc2_ref, out_ref):
    sb = out_ref.shape[1]          # samples in this batch block
    s_rows = sb * SEQ              # attention rows per block
    half = sb * L2                 # pool1 output rows per block

    # ---- conv1: single im2col matmul + bias + ReLU -------------------------------
    h1 = jnp.dot(xc_ref[...], w1_ref[...], preferred_element_type=jnp.float32)
    h1 = jnp.maximum(h1 + b1_ref[...], 0.0)                    # (sb*L, 64)

    # ---- maxpool1: im2col rows pre-ordered so partners sit in two aligned halves --
    p1 = jnp.maximum(h1[0:half, :], h1[half:2 * half, :])      # (sb*L2, 64)
    # p1 rows: [0, s_rows)    -> (sample b, t2 = 2s)   "even half"
    #          [s_rows, half) -> (sample b, t2 = 2s+1) "odd half"
    a_half = p1[0:s_rows, :]
    b_half = p1[s_rows:half, :]

    # ---- conv2 taps: off-by-one row slices + boundary select (no zero-row concats)
    pos = _mod_iota((s_rows, C1), 0, SEQ)                      # s index of each row
    left_a = jnp.where(pos == 0, 0.0, p1[s_rows - 1:half - 1, :])    # p1[t2-1], even rows
    right_b = jnp.where(pos == SEQ - 1, 0.0, p1[1:s_rows + 1, :])    # p1[t2+1], odd rows
    left = jnp.concatenate([left_a, a_half], axis=0)           # p1[t2-1] for every row
    right = jnp.concatenate([b_half, right_b], axis=0)         # p1[t2+1] for every row

    # ---- conv2: one fused-tap matmul (K = 192) + bias + ReLU ----------------------
    lhs2 = jnp.concatenate([left, p1, right], axis=1)          # (sb*L2, 192)
    h2 = jnp.dot(lhs2, w2_ref[...], preferred_element_type=jnp.float32)
    h2 = jnp.maximum(h2 + b2_ref[...], 0.0)                    # (sb*L2, 128)

    # ---- maxpool2: again two contiguous aligned halves ----------------------------
    xa = jnp.maximum(h2[0:s_rows, :], h2[s_rows:half, :])      # (sb*SEQ, 128), rows (b, s)

    # ---- fused Q|K|V projection (1/sqrt(head_dim) already folded into Wq) ---------
    qkv = jnp.dot(xa, wqkv_ref[...], preferred_element_type=jnp.float32) + bqkv_ref[...]
    q = qkv[:, 0:HID]
    k = qkv[:, HID:2 * HID]
    v = qkv[:, 2 * HID:3 * HID]

    # ---- all 8 heads batched along sublanes: stacked rows R = h * s_rows + r ------
    hs = HEADS * s_rows
    head_mask = (_div_iota((hs, HID), 0, s_rows) ==            # head of stacked row
                 _div_iota((hs, HID), 1, HEAD_DIM))            # head owning column
    q_bd = jnp.where(head_mask, jnp.concatenate([q] * HEADS, axis=0), 0.0)   # (hs, 24)

    scores = lax.dot_general(q_bd, k, (((1,), (1,)), ((), ())),
                             preferred_element_type=jnp.float32)             # (hs, s_rows)
    samp_row = (_div_iota((hs, s_rows), 0, SEQ)
                - sb * _div_iota((hs, s_rows), 0, s_rows))     # sample of query row
    samp_col = _div_iota((hs, s_rows), 1, SEQ)                 # sample of key column
    scores = scores + jnp.where(samp_row == samp_col, 0.0, -1e30)

    m = jnp.max(scores, axis=-1, keepdims=True)
    e = jnp.exp(scores - m)
    p = e * pl.reciprocal(jnp.sum(e, axis=-1, keepdims=True), approx=True)

    ctx_all = jnp.where(head_mask,
                        jnp.dot(p, v, preferred_element_type=jnp.float32), 0.0)  # (hs, 24)
    ctx = ctx_all[0:s_rows, :]
    for h in range(1, HEADS):                                  # merge heads (head-major cols)
        ctx = ctx + ctx_all[h * s_rows:(h + 1) * s_rows, :]    # (s_rows, 24)

    # ---- fc1: per-sample flatten via tile + mask + 0/1-selection matmul -----------
    flat_mask = (_div_iota((s_rows, FC1_IN), 1, HID) ==
                 _mod_iota((s_rows, FC1_IN), 0, SEQ))
    ctx_m = jnp.where(flat_mask, jnp.concatenate([ctx] * SEQ, axis=1), 0.0)   # (s_rows, 144)
    sel = (_div_iota((sb, s_rows), 1, SEQ) ==
           lax.broadcasted_iota(jnp.int32, (sb, s_rows), 0)).astype(jnp.float32)
    flat = jnp.dot(sel, ctx_m, preferred_element_type=jnp.float32)            # (sb, 144)

    hfc1 = jnp.dot(flat, wfc1_ref[...], preferred_element_type=jnp.float32) + bfc1_ref[...]
    hfc1 = jnp.maximum(hfc1, 0.0)                                             # (sb, 256)

    # ---- fc2 (lane-padded to 128) + single full-width store -----------------------
    out = jnp.dot(hfc1, wfc2_ref[...], preferred_element_type=jnp.float32) + bfc2_ref[...]
    out_ref[...] = out.reshape(1, sb, OUT_PAD)


def init_params(key):
    """Deterministic PyTorch-default-style (uniform +-1/sqrt(fan_in)) init."""
    ks = jax.random.split(key, 14)

    def u(k, shape, fan_in):
        bound = 1.0 / math.sqrt(fan_in)
        return jax.random.uniform(k, shape, jnp.float32, -bound, bound)

    return {
        "w1": u(ks[0], (C1, C_IN, 3), C_IN * 3), "b1": u(ks[1], (C1,), C_IN * 3),
        "w2": u(ks[2], (C2, C1, 3), C1 * 3), "b2": u(ks[3], (C2,), C1 * 3),
        "wk": u(ks[4], (HID, C2), C2), "bk": u(ks[5], (HID,), C2),
        "wq": u(ks[6], (HID, C2), C2), "bq": u(ks[7], (HID,), C2),
        "wv": u(ks[8], (HID, C2), C2), "bv": u(ks[9], (HID,), C2),
        "wfc1": u(ks[10], (FC1_OUT, FC1_IN), FC1_IN), "bfc1": u(ks[11], (FC1_OUT,), FC1_IN),
        "wfc2": u(ks[12], (FC2_OUT, FC1_OUT), FC1_OUT), "bfc2": u(ks[13], (FC2_OUT,), FC1_OUT),
    }


def pack_params(params):
    """One-time repack of torch-layout weights into the kernel's matmul layouts."""
    scale = 1.0 / math.sqrt(HEAD_DIM)
    w1 = jnp.transpose(params["w1"], (2, 1, 0)).reshape(K1, C1)   # row = k*C_IN + cin
    w2 = jnp.transpose(params["w2"], (2, 1, 0)).reshape(K2, C2)   # row = k*C1 + cin
    wqkv = jnp.concatenate(
        [params["wq"].T * scale, params["wk"].T, params["wv"].T], axis=1)      # (128, 72)
    bqkv = jnp.concatenate(
        [params["bq"] * scale, params["bk"], params["bv"]]).reshape(1, 3 * HID)
    wfc2 = jnp.zeros((FC1_OUT, OUT_PAD), jnp.float32).at[:, :FC2_OUT].set(params["wfc2"].T)
    bfc2 = jnp.zeros((1, OUT_PAD), jnp.float32).at[:, :FC2_OUT].set(
        params["bfc2"].reshape(1, FC2_OUT))
    return {
        "w1": w1, "b1": params["b1"].reshape(1, C1),
        "w2": w2, "b2": params["b2"].reshape(1, C2),
        "wqkv": wqkv, "bqkv": bqkv,
        "wfc1": params["wfc1"].T, "bfc1": params["bfc1"].reshape(1, FC1_OUT),
        "wfc2": wfc2, "bfc2": bfc2,
    }


def net2_forward(x, packed):
    # x: (B, L, C_IN) float32 -- the tensor PyTorch receives before permute(0,2,1)
    b_total, seq_len, c_in = x.shape
    assert seq_len == L and c_in == C_IN
    sb = 4 if b_total % 4 == 0 else (2 if b_total % 2 == 0 else 1)   # samples per block
    nb = b_total // sb

    # im2col for conv1 with per-block rows grouped as [t=4s | t=4s+2 | t=4s+1 | t=4s+3]
    # (b-major, s-minor inside each group) so both maxpools in the kernel reduce to a
    # max() of two contiguous aligned halves.
    xp = jnp.pad(x, ((0, 0), (1, 1), (0, 0))).reshape(nb, sb, L + 2, C_IN)

    def group(g):
        taps = [xp[:, :, g + k:g + k + 4 * (SEQ - 1) + 1:4, :] for k in range(3)]
        return jnp.concatenate(taps, axis=-1)                   # (nb, sb, SEQ, 3*C_IN)

    xc = jnp.stack([group(0), group(2), group(1), group(3)], axis=1)
    xc = xc.reshape(b_total * L, K1)                            # (B*L, 1593)

    def wspec(arr):
        return pl.BlockSpec(arr.shape, lambda i: (0, 0))        # fetched once per core

    flops = 2 * b_total * (L * K1 * C1 + L2 * K2 * C2 + SEQ * C2 * 3 * HID
                           + 2 * HEADS * SEQ * SEQ * HEAD_DIM
                           + FC1_IN * FC1_OUT + FC1_OUT * OUT_PAD)
    cost = pl.CostEstimate(
        flops=flops,
        transcendentals=b_total * HEADS * SEQ * SEQ,
        bytes_accessed=4 * (xc.size + sum(v.size for v in packed.values())
                            + b_total * OUT_PAD))

    out = pl.pallas_call(
        net2_kernel,
        out_shape=jax.ShapeDtypeStruct((nb, sb, OUT_PAD), jnp.float32),
        grid=(nb,),
        in_specs=[
            pl.BlockSpec((sb * L, K1), lambda i: (i, 0)),       # per-block im2col rows
            wspec(packed["w1"]), wspec(packed["b1"]),
            wspec(packed["w2"]), wspec(packed["b2"]),
            wspec(packed["wqkv"]), wspec(packed["bqkv"]),
            wspec(packed["wfc1"]), wspec(packed["bfc1"]),
            wspec(packed["wfc2"]), wspec(packed["bfc2"]),
        ],
        out_specs=pl.BlockSpec((1, sb, OUT_PAD), lambda i: (i, 0, 0)),
        compiler_params=pltpu.CompilerParams(dimension_semantics=("parallel",)),
        cost_estimate=cost,
    )(xc, packed["w1"], packed["b1"], packed["w2"], packed["b2"],
      packed["wqkv"], packed["bqkv"], packed["wfc1"], packed["bfc1"],
      packed["wfc2"], packed["bfc2"])

    return out.reshape(b_total, OUT_PAD)[:, :FC2_OUT]


if __name__ == "__main__":
    B = 8   # folded into the fused M axis; grid of B//4 "parallel" blocks feeds both
            # TensorCores on v7x and amortizes the one-time weight DMA.
    key = jax.random.PRNGKey(0)
    kx, kp = jax.random.split(key)
    x = jax.random.normal(kx, (B, L, C_IN), jnp.float32)
    params = init_params(kp)
    packed = pack_params(params)            # one-time weight repack (outside the jit)

    fwd = jax.jit(net2_forward)
    out = jax.block_until_ready(fwd(x, packed))
    assert out.shape == (B, FC2_OUT) and out.dtype == jnp.float32
    assert bool(jnp.all(jnp.isfinite(out)))
    print("KERNEL_OK")
</pallas_src>

<mosaic_0001>
module attributes {stable_mosaic.version = 11 : i64} {
  func.func @net2_kernel(%arg0: i32, %arg1: memref<96x1593xf32, #tpu.memory_space<vmem>>, %arg2: memref<1593x64xf32, #tpu.memory_space<vmem>>, %arg3: memref<1x64xf32, #tpu.memory_space<vmem>>, %arg4: memref<192x128xf32, #tpu.memory_space<vmem>>, %arg5: memref<1x128xf32, #tpu.memory_space<vmem>>, %arg6: memref<128x72xf32, #tpu.memory_space<vmem>>, %arg7: memref<1x72xf32, #tpu.memory_space<vmem>>, %arg8: memref<144x256xf32, #tpu.memory_space<vmem>>, %arg9: memref<1x256xf32, #tpu.memory_space<vmem>>, %arg10: memref<256x128xf32, #tpu.memory_space<vmem>>, %arg11: memref<1x128xf32, #tpu.memory_space<vmem>>, %arg12: memref<1x4x128xf32, #tpu.memory_space<vmem>>) attributes {dimension_semantics = [#tpu.dimension_semantics<parallel>], iteration_bounds = array<i64: 2>, scalar_prefetch = 0 : i64, scratch_operands = 0 : i64, tpu.core_type = #tpu.core_type<tc>, window_params = [{transform_indices = @transform_0, window_bounds = array<i64: 96, 1593>}, {pipeline_mode = #tpu.pipeline_mode<synchronous>, transform_indices = @transform_1, window_bounds = array<i64: 1593, 64>}, {pipeline_mode = #tpu.pipeline_mode<synchronous>, transform_indices = @transform_2, window_bounds = array<i64: 1, 64>}, {pipeline_mode = #tpu.pipeline_mode<synchronous>, transform_indices = @transform_3, window_bounds = array<i64: 192, 128>}, {pipeline_mode = #tpu.pipeline_mode<synchronous>, transform_indices = @transform_4, window_bounds = array<i64: 1, 128>}, {pipeline_mode = #tpu.pipeline_mode<synchronous>, transform_indices = @transform_5, window_bounds = array<i64: 128, 72>}, {pipeline_mode = #tpu.pipeline_mode<synchronous>, transform_indices = @transform_6, window_bounds = array<i64: 1, 72>}, {pipeline_mode = #tpu.pipeline_mode<synchronous>, transform_indices = @transform_7, window_bounds = array<i64: 144, 256>}, {pipeline_mode = #tpu.pipeline_mode<synchronous>, transform_indices = @transform_8, window_bounds = array<i64: 1, 256>}, {pipeline_mode = #tpu.pipeline_mode<synchronous>, transform_indices = @transform_9, window_bounds = array<i64: 256, 128>}, {pipeline_mode = #tpu.pipeline_mode<synchronous>, transform_indices = @transform_10, window_bounds = array<i64: 1, 128>}, {transform_indices = @transform_11, window_bounds = array<i64: 1, 4, 128>}]} {
    %c0 = arith.constant 0 : index
    %c0_0 = arith.constant 0 : index
    %0 = vector.load %arg1[%c0, %c0_0] : memref<96x1593xf32, #tpu.memory_space<vmem>>, vector<96x1593xf32>
    %c0_1 = arith.constant 0 : index
    %c0_2 = arith.constant 0 : index
    %1 = vector.load %arg2[%c0_1, %c0_2] : memref<1593x64xf32, #tpu.memory_space<vmem>>, vector<1593x64xf32>
    %cst = arith.constant dense<0.000000e+00> : vector<96x64xf32>
    %2 = tpu.matmul %0, %1, %cst {dimension_numbers = #tpu.dot_dimension_numbers<[1], [0], [0], [1], [0, 0, 1, 1], [], []>} : vector<96x1593xf32>, vector<1593x64xf32>, vector<96x64xf32> -> vector<96x64xf32>
    %c0_3 = arith.constant 0 : index
    %c0_4 = arith.constant 0 : index
    %3 = vector.load %arg3[%c0_3, %c0_4] : memref<1x64xf32, #tpu.memory_space<vmem>>, vector<1x64xf32>
    %4 = vector.broadcast %3 : vector<1x64xf32> to vector<96x64xf32>
    %5 = arith.addf %2, %4 : vector<96x64xf32>
    %cst_5 = arith.constant 0.000000e+00 : f32
    %6 = vector.broadcast %cst_5 : f32 to vector<96x64xf32>
    %7 = arith.maximumf %5, %6 : vector<96x64xf32>
    %8 = vector.extract_strided_slice %7 {offsets = [0, 0], sizes = [48, 64], strides = [1, 1]} : vector<96x64xf32> to vector<48x64xf32>
    %9 = vector.extract_strided_slice %7 {offsets = [48, 0], sizes = [48, 64], strides = [1, 1]} : vector<96x64xf32> to vector<48x64xf32>
    %10 = arith.maximumf %8, %9 : vector<48x64xf32>
    %11 = vector.extract_strided_slice %10 {offsets = [0, 0], sizes = [24, 64], strides = [1, 1]} : vector<48x64xf32> to vector<24x64xf32>
    %12 = vector.extract_strided_slice %10 {offsets = [24, 0], sizes = [24, 64], strides = [1, 1]} : vector<48x64xf32> to vector<24x64xf32>
    %13 = tpu.iota {dimensions = array<i32: 0>} : vector<24x64xi32>
    %14 = tpu.iota {dimensions = array<i32: 0>} : vector<24x64xi32>
    %15 = arith.sitofp %14 : vector<24x64xi32> to vector<24x64xf32>
    %cst_6 = arith.constant 0.166666672 : f32
    %16 = vector.broadcast %cst_6 : f32 to vector<24x64xf32>
    %17 = arith.mulf %15, %16 : vector<24x64xf32>
    %18 = arith.fptosi %17 : vector<24x64xf32> to vector<24x64xi32>
    %c6_i32 = arith.constant 6 : i32
    %19 = vector.broadcast %c6_i32 : i32 to vector<24x64xi32>
    %20 = arith.muli %19, %18 : vector<24x64xi32>
    %21 = arith.subi %13, %20 : vector<24x64xi32>
    %c0_i32 = arith.constant 0 : i32
    %22 = vector.broadcast %c0_i32 : i32 to vector<24x64xi32>
    %23 = arith.cmpi eq, %21, %22 : vector<24x64xi32>
    %24 = vector.extract_strided_slice %10 {offsets = [23, 0], sizes = [24, 64], strides = [1, 1]} : vector<48x64xf32> to vector<24x64xf32>
    %cst_7 = arith.constant 0.000000e+00 : f32
    %25 = vector.broadcast %cst_7 : f32 to vector<24x64xf32>
    %26 = arith.select %23, %25, %24 : vector<24x64xi1>, vector<24x64xf32>
    %c5_i32 = arith.constant 5 : i32
    %27 = vector.broadcast %c5_i32 : i32 to vector<24x64xi32>
    %28 = arith.cmpi eq, %21, %27 : vector<24x64xi32>
    %29 = vector.extract_strided_slice %10 {offsets = [1, 0], sizes = [24, 64], strides = [1, 1]} : vector<48x64xf32> to vector<24x64xf32>
    %cst_8 = arith.constant 0.000000e+00 : f32
    %30 = vector.broadcast %cst_8 : f32 to vector<24x64xf32>
    %31 = arith.select %28, %30, %29 : vector<24x64xi1>, vector<24x64xf32>
    %32 = tpu.concatenate %26, %11 in 0 : vector<24x64xf32>, vector<24x64xf32> -> vector<48x64xf32>
    %33 = tpu.concatenate %12, %31 in 0 : vector<24x64xf32>, vector<24x64xf32> -> vector<48x64xf32>
    %34 = tpu.concatenate %32, %10, %33 in 1 : vector<48x64xf32>, vector<48x64xf32>, vector<48x64xf32> -> vector<48x192xf32>
    %c0_9 = arith.constant 0 : index
    %c0_10 = arith.constant 0 : index
    %35 = vector.load %arg4[%c0_9, %c0_10] : memref<192x128xf32, #tpu.memory_space<vmem>>, vector<192x128xf32>
    %cst_11 = arith.constant dense<0.000000e+00> : vector<48x128xf32>
    %36 = tpu.matmul %34, %35, %cst_11 {dimension_numbers = #tpu.dot_dimension_numbers<[1], [0], [0], [1], [0, 0, 1, 1], [], []>} : vector<48x192xf32>, vector<192x128xf32>, vector<48x128xf32> -> vector<48x128xf32>
    %c0_12 = arith.constant 0 : index
    %c0_13 = arith.constant 0 : index
    %37 = vector.load %arg5[%c0_12, %c0_13] : memref<1x128xf32, #tpu.memory_space<vmem>>, vector<1x128xf32>
    %38 = vector.broadcast %37 : vector<1x128xf32> to vector<48x128xf32>
    %39 = arith.addf %36, %38 : vector<48x128xf32>
    %cst_14 = arith.constant 0.000000e+00 : f32
    %40 = vector.broadcast %cst_14 : f32 to vector<48x128xf32>
    %41 = arith.maximumf %39, %40 : vector<48x128xf32>
    %42 = vector.extract_strided_slice %41 {offsets = [0, 0], sizes = [24, 128], strides = [1, 1]} : vector<48x128xf32> to vector<24x128xf32>
    %43 = vector.extract_strided_slice %41 {offsets = [24, 0], sizes = [24, 128], strides = [1, 1]} : vector<48x128xf32> to vector<24x128xf32>
    %44 = arith.maximumf %42, %43 : vector<24x128xf32>
    %c0_15 = arith.constant 0 : index
    %c0_16 = arith.constant 0 : index
    %45 = vector.load %arg6[%c0_15, %c0_16] : memref<128x72xf32, #tpu.memory_space<vmem>>, vector<128x72xf32>
    %cst_17 = arith.constant dense<0.000000e+00> : vector<24x72xf32>
    %46 = tpu.matmul %44, %45, %cst_17 {dimension_numbers = #tpu.dot_dimension_numbers<[1], [0], [0], [1], [0, 0, 1, 1], [], []>} : vector<24x128xf32>, vector<128x72xf32>, vector<24x72xf32> -> vector<24x72xf32>
    %c0_18 = arith.constant 0 : index
    %c0_19 = arith.constant 0 : index
    %47 = vector.load %arg7[%c0_18, %c0_19] : memref<1x72xf32, #tpu.memory_space<vmem>>, vector<1x72xf32>
    %48 = vector.broadcast %47 : vector<1x72xf32> to vector<24x72xf32>
    %49 = arith.addf %46, %48 : vector<24x72xf32>
    %50 = vector.extract_strided_slice %49 {offsets = [0, 0], sizes = [24, 24], strides = [1, 1]} : vector<24x72xf32> to vector<24x24xf32>
    %51 = vector.extract_strided_slice %49 {offsets = [0, 24], sizes = [24, 24], strides = [1, 1]} : vector<24x72xf32> to vector<24x24xf32>
    %52 = vector.extract_strided_slice %49 {offsets = [0, 48], sizes = [24, 24], strides = [1, 1]} : vector<24x72xf32> to vector<24x24xf32>
    %53 = tpu.iota {dimensions = array<i32: 0>} : vector<192x24xi32>
    %54 = arith.sitofp %53 : vector<192x24xi32> to vector<192x24xf32>
    %cst_20 = arith.constant 0.0416666679 : f32
    %55 = vector.broadcast %cst_20 : f32 to vector<192x24xf32>
    %56 = arith.mulf %54, %55 : vector<192x24xf32>
    %57 = arith.fptosi %56 : vector<192x24xf32> to vector<192x24xi32>
    %58 = tpu.iota {dimensions = array<i32: 1>} : vector<192x24xi32>
    %59 = arith.sitofp %58 : vector<192x24xi32> to vector<192x24xf32>
    %cst_21 = arith.constant 0.333333343 : f32
    %60 = vector.broadcast %cst_21 : f32 to vector<192x24xf32>
    %61 = arith.mulf %59, %60 : vector<192x24xf32>
    %62 = arith.fptosi %61 : vector<192x24xf32> to vector<192x24xi32>
    %63 = arith.cmpi eq, %57, %62 : vector<192x24xi32>
    %64 = tpu.concatenate %50, %50, %50, %50, %50, %50, %50, %50 in 0 : vector<24x24xf32>, vector<24x24xf32>, vector<24x24xf32>, vector<24x24xf32>, vector<24x24xf32>, vector<24x24xf32>, vector<24x24xf32>, vector<24x24xf32> -> vector<192x24xf32>
    %cst_22 = arith.constant 0.000000e+00 : f32
    %65 = vector.broadcast %cst_22 : f32 to vector<192x24xf32>
    %66 = arith.select %63, %64, %65 : vector<192x24xi1>, vector<192x24xf32>
    %cst_23 = arith.constant dense<0.000000e+00> : vector<192x24xf32>
    %67 = tpu.matmul %66, %51, %cst_23 {dimension_numbers = #tpu.dot_dimension_numbers<[1], [1], [0], [0], [0, 0, 1, 0], [], []>} : vector<192x24xf32>, vector<24x24xf32>, vector<192x24xf32> -> vector<192x24xf32>
    %68 = tpu.iota {dimensions = array<i32: 0>} : vector<192x24xi32>
    %69 = arith.sitofp %68 : vector<192x24xi32> to vector<192x24xf32>
    %cst_24 = arith.constant 0.166666672 : f32
    %70 = vector.broadcast %cst_24 : f32 to vector<192x24xf32>
    %71 = arith.mulf %69, %70 : vector<192x24xf32>
    %72 = arith.fptosi %71 : vector<192x24xf32> to vector<192x24xi32>
    %73 = tpu.iota {dimensions = array<i32: 0>} : vector<192x24xi32>
    %74 = arith.sitofp %73 : vector<192x24xi32> to vector<192x24xf32>
    %cst_25 = arith.constant 0.0416666679 : f32
    %75 = vector.broadcast %cst_25 : f32 to vector<192x24xf32>
    %76 = arith.mulf %74, %75 : vector<192x24xf32>
    %77 = arith.fptosi %76 : vector<192x24xf32> to vector<192x24xi32>
    %c4_i32 = arith.constant 4 : i32
    %78 = vector.broadcast %c4_i32 : i32 to vector<192x24xi32>
    %79 = arith.muli %78, %77 : vector<192x24xi32>
    %80 = arith.subi %72, %79 : vector<192x24xi32>
    %81 = tpu.iota {dimensions = array<i32: 1>} : vector<192x24xi32>
    %82 = arith.sitofp %81 : vector<192x24xi32> to vector<192x24xf32>
    %cst_26 = arith.constant 0.166666672 : f32
    %83 = vector.broadcast %cst_26 : f32 to vector<192x24xf32>
    %84 = arith.mulf %82, %83 : vector<192x24xf32>
    %85 = arith.fptosi %84 : vector<192x24xf32> to vector<192x24xi32>
    %86 = arith.cmpi eq, %80, %85 : vector<192x24xi32>
    %cst_27 = arith.constant 0.000000e+00 : f32
    %cst_28 = arith.constant -1.000000e+30 : f32
    %87 = vector.broadcast %cst_27 : f32 to vector<192x24xf32>
    %88 = vector.broadcast %cst_28 : f32 to vector<192x24xf32>
    %89 = arith.select %86, %87, %88 : vector<192x24xi1>, vector<192x24xf32>
    %90 = arith.addf %67, %89 : vector<192x24xf32>
    %cst_29 = arith.constant dense<0xFF800000> : vector<192xf32>
    %91 = vector.multi_reduction <maximumf>, %90, %cst_29 [1] : vector<192x24xf32> to vector<192xf32>
    %92 = vector.shape_cast %91 : vector<192xf32> to vector<192x1xf32>
    %93 = vector.broadcast %92 : vector<192x1xf32> to vector<192x24xf32>
    %94 = arith.subf %90, %93 : vector<192x24xf32>
    %95 = math.exp %94 : vector<192x24xf32>
    %cst_30 = arith.constant dense<0.000000e+00> : vector<192xf32>
    %96 = vector.multi_reduction <add>, %95, %cst_30 [1] : vector<192x24xf32> to vector<192xf32>
    %97 = vector.shape_cast %96 : vector<192xf32> to vector<192x1xf32>
    %98 = tpu.reciprocal %97 {approx = true} : vector<192x1xf32> -> vector<192x1xf32>
    %99 = vector.broadcast %98 : vector<192x1xf32> to vector<192x24xf32>
    %100 = arith.mulf %95, %99 : vector<192x24xf32>
    %cst_31 = arith.constant dense<0.000000e+00> : vector<192x24xf32>
    %101 = tpu.matmul %100, %52, %cst_31 {dimension_numbers = #tpu.dot_dimension_numbers<[1], [0], [0], [1], [0, 0, 1, 1], [], []>} : vector<192x24xf32>, vector<24x24xf32>, vector<192x24xf32> -> vector<192x24xf32>
    %cst_32 = arith.constant 0.000000e+00 : f32
    %102 = vector.broadcast %cst_32 : f32 to vector<192x24xf32>
    %103 = arith.select %63, %101, %102 : vector<192x24xi1>, vector<192x24xf32>
    %104 = vector.extract_strided_slice %103 {offsets = [0, 0], sizes = [24, 24], strides = [1, 1]} : vector<192x24xf32> to vector<24x24xf32>
    %105 = vector.extract_strided_slice %103 {offsets = [24, 0], sizes = [24, 24], strides = [1, 1]} : vector<192x24xf32> to vector<24x24xf32>
    %106 = arith.addf %104, %105 : vector<24x24xf32>
    %107 = vector.extract_strided_slice %103 {offsets = [48, 0], sizes = [24, 24], strides = [1, 1]} : vector<192x24xf32> to vector<24x24xf32>
    %108 = arith.addf %106, %107 : vector<24x24xf32>
    %109 = vector.extract_strided_slice %103 {offsets = [72, 0], sizes = [24, 24], strides = [1, 1]} : vector<192x24xf32> to vector<24x24xf32>
    %110 = arith.addf %108, %109 : vector<24x24xf32>
    %111 = vector.extract_strided_slice %103 {offsets = [96, 0], sizes = [24, 24], strides = [1, 1]} : vector<192x24xf32> to vector<24x24xf32>
    %112 = arith.addf %110, %111 : vector<24x24xf32>
    %113 = vector.extract_strided_slice %103 {offsets = [120, 0], sizes = [24, 24], strides = [1, 1]} : vector<192x24xf32> to vector<24x24xf32>
    %114 = arith.addf %112, %113 : vector<24x24xf32>
    %115 = vector.extract_strided_slice %103 {offsets = [144, 0], sizes = [24, 24], strides = [1, 1]} : vector<192x24xf32> to vector<24x24xf32>
    %116 = arith.addf %114, %115 : vector<24x24xf32>
    %117 = vector.extract_strided_slice %103 {offsets = [168, 0], sizes = [24, 24], strides = [1, 1]} : vector<192x24xf32> to vector<24x24xf32>
    %118 = arith.addf %116, %117 : vector<24x24xf32>
    %119 = tpu.iota {dimensions = array<i32: 1>} : vector<24x144xi32>
    %120 = arith.sitofp %119 : vector<24x144xi32> to vector<24x144xf32>
    %cst_33 = arith.constant 0.0416666679 : f32
    %121 = vector.broadcast %cst_33 : f32 to vector<24x144xf32>
    %122 = arith.mulf %120, %121 : vector<24x144xf32>
    %123 = arith.fptosi %122 : vector<24x144xf32> to vector<24x144xi32>
    %124 = tpu.iota {dimensions = array<i32: 0>} : vector<24x144xi32>
    %125 = tpu.iota {dimensions = array<i32: 0>} : vector<24x144xi32>
    %126 = arith.sitofp %125 : vector<24x144xi32> to vector<24x144xf32>
    %cst_34 = arith.constant 0.166666672 : f32
    %127 = vector.broadcast %cst_34 : f32 to vector<24x144xf32>
    %128 = arith.mulf %126, %127 : vector<24x144xf32>
    %129 = arith.fptosi %128 : vector<24x144xf32> to vector<24x144xi32>
    %c6_i32_35 = arith.constant 6 : i32
    %130 = vector.broadcast %c6_i32_35 : i32 to vector<24x144xi32>
    %131 = arith.muli %130, %129 : vector<24x144xi32>
    %132 = arith.subi %124, %131 : vector<24x144xi32>
    %133 = arith.cmpi eq, %123, %132 : vector<24x144xi32>
    %134 = tpu.concatenate %118, %118, %118, %118, %118, %118 in 1 : vector<24x24xf32>, vector<24x24xf32>, vector<24x24xf32>, vector<24x24xf32>, vector<24x24xf32>, vector<24x24xf32> -> vector<24x144xf32>
    %cst_36 = arith.constant 0.000000e+00 : f32
    %135 = vector.broadcast %cst_36 : f32 to vector<24x144xf32>
    %136 = arith.select %133, %134, %135 : vector<24x144xi1>, vector<24x144xf32>
    %137 = tpu.iota {dimensions = array<i32: 1>} : vector<4x24xi32>
    %138 = arith.sitofp %137 : vector<4x24xi32> to vector<4x24xf32>
    %cst_37 = arith.constant 0.166666672 : f32
    %139 = vector.broadcast %cst_37 : f32 to vector<4x24xf32>
    %140 = arith.mulf %138, %139 : vector<4x24xf32>
    %141 = arith.fptosi %140 : vector<4x24xf32> to vector<4x24xi32>
    %142 = tpu.iota {dimensions = array<i32: 0>} : vector<4x24xi32>
    %143 = arith.cmpi eq, %141, %142 : vector<4x24xi32>
    %144 = arith.extui %143 : vector<4x24xi1> to vector<4x24xi32>
    %145 = arith.sitofp %144 : vector<4x24xi32> to vector<4x24xf32>
    %cst_38 = arith.constant dense<0.000000e+00> : vector<4x144xf32>
    %146 = tpu.matmul %145, %136, %cst_38 {dimension_numbers = #tpu.dot_dimension_numbers<[1], [0], [0], [1], [0, 0, 1, 1], [], []>} : vector<4x24xf32>, vector<24x144xf32>, vector<4x144xf32> -> vector<4x144xf32>
    %c0_39 = arith.constant 0 : index
    %c0_40 = arith.constant 0 : index
    %147 = vector.load %arg8[%c0_39, %c0_40] : memref<144x256xf32, #tpu.memory_space<vmem>>, vector<144x256xf32>
    %cst_41 = arith.constant dense<0.000000e+00> : vector<4x256xf32>
    %148 = tpu.matmul %146, %147, %cst_41 {dimension_numbers = #tpu.dot_dimension_numbers<[1], [0], [0], [1], [0, 0, 1, 1], [], []>} : vector<4x144xf32>, vector<144x256xf32>, vector<4x256xf32> -> vector<4x256xf32>
    %c0_42 = arith.constant 0 : index
    %c0_43 = arith.constant 0 : index
    %149 = vector.load %arg9[%c0_42, %c0_43] : memref<1x256xf32, #tpu.memory_space<vmem>>, vector<1x256xf32>
    %150 = vector.broadcast %149 : vector<1x256xf32> to vector<4x256xf32>
    %151 = arith.addf %148, %150 : vector<4x256xf32>
    %cst_44 = arith.constant 0.000000e+00 : f32
    %152 = vector.broadcast %cst_44 : f32 to vector<4x256xf32>
    %153 = arith.maximumf %151, %152 : vector<4x256xf32>
    %c0_45 = arith.constant 0 : index
    %c0_46 = arith.constant 0 : index
    %154 = vector.load %arg10[%c0_45, %c0_46] : memref<256x128xf32, #tpu.memory_space<vmem>>, vector<256x128xf32>
    %cst_47 = arith.constant dense<0.000000e+00> : vector<4x128xf32>
    %155 = tpu.matmul %153, %154, %cst_47 {dimension_numbers = #tpu.dot_dimension_numbers<[1], [0], [0], [1], [0, 0, 1, 1], [], []>} : vector<4x256xf32>, vector<256x128xf32>, vector<4x128xf32> -> vector<4x128xf32>
    %c0_48 = arith.constant 0 : index
    %c0_49 = arith.constant 0 : index
    %156 = vector.load %arg11[%c0_48, %c0_49] : memref<1x128xf32, #tpu.memory_space<vmem>>, vector<1x128xf32>
    %157 = vector.broadcast %156 : vector<1x128xf32> to vector<4x128xf32>
    %158 = arith.addf %155, %157 : vector<4x128xf32>
    %159 = vector.shape_cast %158 : vector<4x128xf32> to vector<1x4x128xf32>
    %c0_50 = arith.constant 0 : index
    %c0_51 = arith.constant 0 : index
    %c0_52 = arith.constant 0 : index
    %160 = vector.load %arg12[%c0_50, %c0_51, %c0_52] : memref<1x4x128xf32, #tpu.memory_space<vmem>>, vector<1x4x128xf32>
    tpu.vector_store %arg12[%c0_50, %c0_51, %c0_52], %159 {strides = array<i32>} : memref<1x4x128xf32, #tpu.memory_space<vmem>>, vector<1x4x128xf32>,
    return
  }
  func.func @transform_0(%arg0: i32) -> (i32, i32) {
    %c0_i32 = arith.constant 0 : i32
    %c0_i32_0 = arith.constant 0 : i32
    return %arg0, %c0_i32 : i32, i32
  }
  func.func @transform_1(%arg0: i32) -> (i32, i32) {
    %c0_i32 = arith.constant 0 : i32
    %c0_i32_0 = arith.constant 0 : i32
    %c0_i32_1 = arith.constant 0 : i32
    return %c0_i32, %c0_i32_0 : i32, i32
  }
  func.func @transform_2(%arg0: i32) -> (i32, i32) {
    %c0_i32 = arith.constant 0 : i32
    %c0_i32_0 = arith.constant 0 : i32
    %c0_i32_1 = arith.constant 0 : i32
    return %c0_i32, %c0_i32_0 : i32, i32
  }
  func.func @transform_3(%arg0: i32) -> (i32, i32) {
    %c0_i32 = arith.constant 0 : i32
    %c0_i32_0 = arith.constant 0 : i32
    %c0_i32_1 = arith.constant 0 : i32
    return %c0_i32, %c0_i32_0 : i32, i32
  }
  func.func @transform_4(%arg0: i32) -> (i32, i32) {
    %c0_i32 = arith.constant 0 : i32
    %c0_i32_0 = arith.constant 0 : i32
    %c0_i32_1 = arith.constant 0 : i32
    return %c0_i32, %c0_i32_0 : i32, i32
  }
  func.func @transform_5(%arg0: i32) -> (i32, i32) {
    %c0_i32 = arith.constant 0 : i32
    %c0_i32_0 = arith.constant 0 : i32
    %c0_i32_1 = arith.constant 0 : i32
    return %c0_i32, %c0_i32_0 : i32, i32
  }
  func.func @transform_6(%arg0: i32) -> (i32, i32) {
    %c0_i32 = arith.constant 0 : i32
    %c0_i32_0 = arith.constant 0 : i32
    %c0_i32_1 = arith.constant 0 : i32
    return %c0_i32, %c0_i32_0 : i32, i32
  }
  func.func @transform_7(%arg0: i32) -> (i32, i32) {
    %c0_i32 = arith.constant 0 : i32
    %c0_i32_0 = arith.constant 0 : i32
    %c0_i32_1 = arith.constant 0 : i32
    return %c0_i32, %c0_i32_0 : i32, i32
  }
  func.func @transform_8(%arg0: i32) -> (i32, i32) {
    %c0_i32 = arith.constant 0 : i32
    %c0_i32_0 = arith.constant 0 : i32
    %c0_i32_1 = arith.constant 0 : i32
    return %c0_i32, %c0_i32_0 : i32, i32
  }
  func.func @transform_9(%arg0: i32) -> (i32, i32) {
    %c0_i32 = arith.constant 0 : i32
    %c0_i32_0 = arith.constant 0 : i32
    %c0_i32_1 = arith.constant 0 : i32
    return %c0_i32, %c0_i32_0 : i32, i32
  }
  func.func @transform_10(%arg0: i32) -> (i32, i32) {
    %c0_i32 = arith.constant 0 : i32
    %c0_i32_0 = arith.constant 0 : i32
    %c0_i32_1 = arith.constant 0 : i32
    return %c0_i32, %c0_i32_0 : i32, i32
  }
  func.func @transform_11(%arg0: i32) -> (i32, i32, i32) {
    %c0_i32 = arith.constant 0 : i32
    %c0_i32_0 = arith.constant 0 : i32
    %c0_i32_1 = arith.constant 0 : i32
    return %arg0, %c0_i32, %c0_i32_0 : i32, i32, i32
  }
}

</mosaic_0001>

<bundles_post_ra>
// kernel: net2_forward.1
= control target key start
LH: loop header
LB: loop body
LE: loop exit
PB: predicated region body
PF: predicated region fallthrough
CT: control target
= control target key end

     0   :  { %s4696_s17 = smov 0   ;;  %s7051_s0 = inlined_call_operand.vmem [shape: f32[192,1593], index: 0, kind: input, shape index: {}]   ;;  %s7052_s1 = inlined_call_operand.vmem [shape: f32[1593,64], index: 1, kind: input, shape index: {}]   ;;  %s7053_s2 = inlined_call_operand.vmem [shape: f32[1,64], index: 2, kind: input, shape index: {}]   ;;  %s7054_s3 = inlined_call_operand.vmem [shape: f32[192,128], index: 3, kind: input, shape index: {}]   ;;  %s7055_s4 = inlined_call_operand.vmem [shape: f32[1,128], index: 4, kind: input, shape index: {}]   ;;  %s7056_s5 = inlined_call_operand.vmem [shape: f32[128,72], index: 5, kind: input, shape index: {}]   ;;  %s7057_s6 = inlined_call_operand.vmem [shape: f32[1,72], index: 6, kind: input, shape index: {}]   ;;  %s7058_s7 = inlined_call_operand.vmem [shape: f32[144,256], index: 7, kind: input, shape index: {}]   ;;  %s7059_s8 = inlined_call_operand.vmem [shape: f32[1,256], index: 8, kind: input, shape index: {}]   ;;  %s7060_s9 = inlined_call_operand.vmem [shape: f32[256,128], index: 9, kind: input, shape index: {}]   ;;  %s7061_s10 = inlined_call_operand.vmem [shape: f32[1,128], index: 10, kind: input, shape index: {}]   ;;  %s7062_s11 = inlined_call_operand.vmem [shape: f32[2,4,128], index: 11, kind: output, shape index: {}]  }
   0x1 LB: > { %s4702_s18 = sadd.s32 4294967295, %s4623_s17   ;;  %p3608_p0 = scmp.ge.s32.totalorder %s4623_s17, 1  ;;  %s4623_s17 = sphi %s4696_s17, %s21_s17  }
   0x2   : > { %p339_p1 = scmp.lt.s32.totalorder %s4623_s17, 3 }
   0x4   : > { %p340_p2 = pnand %p3608_p0, %p339_p1 }
   0x6   : > { %343 = sbr.rel (%p340_p2) target bundleno = 2614 (0xa36), region = 64 }
   0xb   : > { %v577_v0 = vld [vmem:[%s7052_s1 + $0xf8] sm:$0xff]  ;;  %v576_v2 = vld [vmem:[%s7052_s1 + $0xf0] sm:$0xff]  ;;  %v575_v6 = vld [vmem:[%s7052_s1 + $0xe8] sm:$0xff]  ;;  %s379_s12 = smul.u32 12, %s4702_s18  ;;  %vm790_vm0 = vcmask 1040384   ;;  %vm753_vm1 = vcmask 465920  }
   0xc   : > { %v561_v1 = vld [vmem:[%s7052_s1 + $0x78] sm:$0xff]  ;;  %3696 = vmatprep.subr.mxu0 %v577_v0  ;;  %v560_v4 = vld [vmem:[%s7052_s1 + $0x70] sm:$0xff]  ;;  %v559_v8 = vld [vmem:[%s7052_s1 + $0x68] sm:$0xff]  ;;  %vm1763_vm2 = vcmask 523264   ;;  %s4626_s22 = smov 64   ;;  %vm1731_vm5 = vcmask 1046528  }
   0xd   : > { %v609_v3 = vld [vmem:[%s7052_s1 + $0x1f8] sm:$0xff]  ;;  %3697 = vmatpush3.msra.mxu0 %v561_v1  ;;  %v608_v7 = vld [vmem:[%s7052_s1 + $0x1f0] sm:$0xff]  ;;  %v607_v10 = vld [vmem:[%s7052_s1 + $0x1e8] sm:$0xff]  ;;  %p4802_p3 = scmp.lt.s32.totalorder %s379_s12, 23  ;;  %vm4627_vm10 = vmmov 0   ;;  %vm2315_vm12 = vcmask 195584  }
   0xe   : > { %v593_v5 = vld [vmem:[%s7052_s1 + $0x178] sm:$0xff]  ;;  %3764 = vmatprep.subr.mxu1 %v609_v3  ;;  %3698 = vmatprep.subr.mxu0 %v576_v2  ;;  %v592_v9 = vld [vmem:[%s7052_s1 + $0x170] sm:$0xff]  ;;  %v574_v11 = vld [vmem:[%s7052_s1 + $0xe0] sm:$0xff]  ;;  %s4629_s24 = smov 80   ;;  %s4633_s25 = smov 72  }
   0xf   : > { %3765 = vmatpush3.msra.mxu1 %v593_v5  ;;  %3699 = vmatpush3.msra.mxu0 %v560_v4  ;;  %v591_v12 = vld [vmem:[%s7052_s1 + $0x168] sm:$0xff]  ;;  %v558_v13 = vld [vmem:[%s7052_s1 + $0x60] sm:$0xff]  ;;  %v573_v15 = vld [vmem:[%s7052_s1 + $0xd8] sm:$0xff]  ;;  %s7221_s12 = smov (!%p4802_p3, %s379_s12), 23  ;;  %s4634_s26 = smov 120  }
  0x10   : > { %3766 = vmatprep.subr.mxu1 %v608_v7  ;;  %3700 = vmatprep.subr.mxu0 %v575_v6  ;;  %v606_v14 = vld [vmem:[%s7052_s1 + $0x1e0] sm:$0xff]  ;;  %v557_v17 = vld [vmem:[%s7052_s1 + $0x58] sm:$0xff]  ;;  %v572_v19 = vld [vmem:[%s7052_s1 + $0xd0] sm:$0xff]  ;;  %s4397_s15 = smul.u32 104, %s7221_s12  ;;  %s4631_s12 = smov 48  }
  0x11   : > { %3767 = vmatpush3.msra.mxu1 %v592_v9  ;;  %3701 = vmatpush3.msra.mxu0 %v559_v8  ;;  %v590_v16 = vld [vmem:[%s7052_s1 + $0x160] sm:$0xff]  ;;  %v605_v18 = vld [vmem:[%s7052_s1 + $0x1d8] sm:$0xff]  ;;  %v556_v21 = vld [vmem:[%s7052_s1 + $0x50] sm:$0xff]  ;;  %s4635_s27 = smov 96   ;;  %p386_p4 = scmp.lt.s32.totalorder %s4702_s18, 1 }
  0x12   : > { %3768 = vmatprep.subr.mxu1 %v607_v10  ;;  %3702 = vmatprep.subr.mxu0 %v574_v11  ;;  %v589_v20 = vld [vmem:[%s7052_s1 + $0x158] sm:$0xff]  ;;  %v604_v22 = vld [vmem:[%s7052_s1 + $0x1d0] sm:$0xff]  ;;  %v571_v23 = vld [vmem:[%s7052_s1 + $0xc8] sm:$0xff]  ;;  %s4888_s20 = scalar_lea.vmem %s7051_s0, %s4397_s15  ;;  %s4632_s15 = smov 24  }
  0x13   : > { %3769 = vmatpush3.msra.mxu1 %v591_v12  ;;  %3703 = vmatpush3.msra.mxu0 %v558_v13  ;;  %v588_v24 = vld [vmem:[%s7052_s1 + $0x150] sm:$0xff]  ;;  %v555_v25 = vld [vmem:[%s7052_s1 + $0x48] sm:$0xff]  ;;  %v570_v27 = vld [vmem:[%s7052_s1 + $0xc0] sm:$0xff]  ;;  %s7223_s18 = smov (!%p386_p4, %s4702_s18), 1 }
  0x14   : > { %3770 = vmatprep.subr.mxu1 %v606_v14  ;;  %3704 = vmatprep.subr.mxu0 %v573_v15  ;;  %v603_v26 = vld [vmem:[%s7052_s1 + $0x1c8] sm:$0xff]  ;;  %v554_v29 = vld [vmem:[%s7052_s1 + $0x40] sm:$0xff]  ;;  %v569_v31 = vld [vmem:[%s7052_s1 + $0xb8] sm:$0xff]  ;;  %s3610_s19 = sshll.u32 %s7223_s18, 2 }
  0x15   : > { %3771 = vmatpush3.msra.mxu1 %v590_v16  ;;  %3705 = vmatpush3.msra.mxu0 %v557_v17  ;;  %v587_v28 = vld [vmem:[%s7052_s1 + $0x148] sm:$0xff]  ;;  %v602_v30 = vld [vmem:[%s7052_s1 + $0x1c0] sm:$0xff]  ;;  %v553_v33 = vld [vmem:[%s7052_s1 + $0x38] sm:$0xff]  ;;  %s389_s13 = scalar_lea.vmem %s7062_s11, %s3610_s19 }
  0x16   : > { %3772 = vmatprep.subr.mxu1 %v605_v18  ;;  %3706 = vmatprep.subr.mxu0 %v572_v19  ;;  %v586_v32 = vld [vmem:[%s7052_s1 + $0x140] sm:$0xff]  ;;  %v601_v34 = vld [vmem:[%s7052_s1 + $0x1b8] sm:$0xff]  ;;  %v568_v35 = vld [vmem:[%s7052_s1 + $0xb0] sm:$0xff] }
  0x17   : > { %3773 = vmatpush3.msra.mxu1 %v589_v20  ;;  %3707 = vmatpush3.msra.mxu0 %v556_v21  ;;  %v585_v36 = vld [vmem:[%s7052_s1 + $0x138] sm:$0xff]  ;;  %v552_v37 = vld [vmem:[%s7052_s1 + $0x30] sm:$0xff]  ;;  %v567_v39 = vld [vmem:[%s7052_s1 + $0xa8] sm:$0xff] }
  0x18   : > { %3774 = vmatprep.subr.mxu1 %v604_v22  ;;  %3708 = vmatprep.subr.mxu0 %v571_v23  ;;  %v600_v38 = vld [vmem:[%s7052_s1 + $0x1b0] sm:$0xff]  ;;  %v551_v41 = vld [vmem:[%s7052_s1 + $0x28] sm:$0xff]  ;;  %v566_v43 = vld [vmem:[%s7052_s1 + $0xa0] sm:$0xff] }
  0x19   : > { %3775 = vmatpush3.msra.mxu1 %v588_v24  ;;  %3709 = vmatpush3.msra.mxu0 %v555_v25  ;;  %v584_v40 = vld [vmem:[%s7052_s1 + $0x130] sm:$0xff]  ;;  %v599_v42 = vld [vmem:[%s7052_s1 + $0x1a8] sm:$0xff]  ;;  %v550_v45 = vld [vmem:[%s7052_s1 + $0x20] sm:$0xff] }
  0x1a   : > { %3776 = vmatprep.subr.mxu1 %v603_v26  ;;  %3710 = vmatprep.subr.mxu0 %v570_v27  ;;  %v583_v44 = vld [vmem:[%s7052_s1 + $0x128] sm:$0xff]  ;;  %v598_v46 = vld [vmem:[%s7052_s1 + $0x1a0] sm:$0xff]  ;;  %v565_v47 = vld [vmem:[%s7052_s1 + $0x98] sm:$0xff] }
  0x1b   : > { %3777 = vmatpush3.msra.mxu1 %v587_v28  ;;  %3711 = vmatpush3.msra.mxu0 %v554_v29  ;;  %v582_v48 = vld [vmem:[%s7052_s1 + $0x120] sm:$0xff]  ;;  %v549_v49 = vld [vmem:[%s7052_s1 + $0x18] sm:$0xff]  ;;  %v564_v51 = vld [vmem:[%s7052_s1 + $0x90] sm:$0xff] }
  0x1c   : > { %3778 = vmatprep.subr.mxu1 %v602_v30  ;;  %3712 = vmatprep.subr.mxu0 %v569_v31  ;;  %v597_v50 = vld [vmem:[%s7052_s1 + $0x198] sm:$0xff]  ;;  %v548_v53 = vld [vmem:[%s7052_s1 + $0x10] sm:$0xff]  ;;  %v563_v55 = vld [vmem:[%s7052_s1 + $0x88] sm:$0xff] }
  0x1d   : > { %3779 = vmatpush3.msra.mxu1 %v586_v32  ;;  %3713 = vmatpush3.msra.mxu0 %v553_v33  ;;  %v581_v52 = vld [vmem:[%s7052_s1 + $0x118] sm:$0xff]  ;;  %v596_v54 = vld [vmem:[%s7052_s1 + $0x190] sm:$0xff]  ;;  %v547_v57 = vld [vmem:[%s7052_s1 + $0x8] sm:$0xff] }
  0x1e   : > { %3780 = vmatprep.subr.mxu1 %v601_v34  ;;  %3714 = vmatprep.subr.mxu0 %v568_v35  ;;  %v580_v56 = vld [vmem:[%s7052_s1 + $0x110] sm:$0xff]  ;;  %v595_v58 = vld [vmem:[%s7052_s1 + $0x188] sm:$0xff]  ;;  %v562_v59 = vld [vmem:[%s7052_s1 + $0x80] sm:$0xff] }
  0x1f   : > { %3781 = vmatpush3.msra.mxu1 %v585_v36  ;;  %3715 = vmatpush3.msra.mxu0 %v552_v37  ;;  %v391_v60 = vld [vmem:[%s4888_s20 + $0x8] sm:$0xff]  ;;  %v546_v61 = vld [vmem:[%s7052_s1] sm:$0xff]  ;;  %v393_v2 = vld [vmem:[%s4888_s20 + $0x18] sm:$0xff] }
  0x20   : > { %3782 = vmatprep.subr.mxu1 %v600_v38  ;;  %3716 = vmatprep.subr.mxu0 %v567_v39  ;;  %v579_v62 = vld [vmem:[%s7052_s1 + $0x108] sm:$0xff]  ;;  %v390_v63 = vld [vmem:[%s4888_s20] sm:$0xff]  ;;  %v392_v3 = vld [vmem:[%s4888_s20 + $0x10] sm:$0xff] }
  0x21   : > { %3783 = vmatpush3.msra.mxu1 %v584_v40  ;;  %3717 = vmatpush3.msra.mxu0 %v551_v41  ;;  %v594_v0 = vld [vmem:[%s7052_s1 + $0x180] sm:$0xff]  ;;  %v404_v4 = vld [vmem:[%s4888_s20 + $0x70] sm:$0xff]  ;;  %v641_v6 = vld [vmem:[%s7052_s1 + $0x2f8] sm:$0xff] }
  0x22   : > { %3784 = vmatprep.subr.mxu1 %v599_v42  ;;  %3718 = vmatprep.subr.mxu0 %v566_v43  ;;  %v578_v1 = vld [vmem:[%s7052_s1 + $0x100] sm:$0xff]  ;;  %v403_v7 = vld [vmem:[%s4888_s20 + $0x68] sm:$0xff]  ;;  %v673_v8 = vld [vmem:[%s7052_s1 + $0x3f8] sm:$0xff] }
  0x23   : > { %3785 = vmatpush3.msra.mxu1 %v583_v44  ;;  %3719 = vmatpush3.msra.mxu0 %v550_v45  ;;  %v406_v5 = vld [vmem:[%s4888_s20 + $0x80] sm:$0xff]  ;;  %v417_v9 = vld [vmem:[%s4888_s20 + $0xd8] sm:$0xff]  ;;  %v640_v12 = vld [vmem:[%s7052_s1 + $0x2f0] sm:$0xff] }
  0x24   : > { %3786 = vmatprep.subr.mxu1 %v598_v46  ;;  %3720 = vmatprep.subr.mxu0 %v565_v47  ;;  %v625_v10 = vld [vmem:[%s7052_s1 + $0x278] sm:$0xff]  ;;  %v419_v13 = vld [vmem:[%s4888_s20 + $0xe8] sm:$0xff]  ;;  %v624_v14 = vld [vmem:[%s7052_s1 + $0x270] sm:$0xff] }
  0x25   : > { %3787 = vmatpush3.msra.mxu1 %v582_v48  ;;  %3721 = vmatpush3.msra.mxu0 %v549_v49  ;;  %v405_v11 = vld [vmem:[%s4888_s20 + $0x78] sm:$0xff]  ;;  %v416_v15 = vld [vmem:[%s4888_s20 + $0xd0] sm:$0xff]  ;;  %v430_v17 = vld [vmem:[%s4888_s20 + $0x140] sm:$0xff] }
  0x26   : > { %3788 = vmatprep.subr.mxu1 %v597_v50  ;;  %3722 = vmatprep.subr.mxu0 %v564_v51  ;;  %v657_v16 = vld [vmem:[%s7052_s1 + $0x378] sm:$0xff]  ;;  %v639_v18 = vld [vmem:[%s7052_s1 + $0x2e8] sm:$0xff]  ;;  %v418_v19 = vld [vmem:[%s4888_s20 + $0xe0] sm:$0xff] }
  0x27   : > { %3789 = vmatpush3.msra.mxu1 %v581_v52  ;;  %3723 = vmatpush3.msra.mxu0 %v548_v53  ;;  %v672_v20 = vld [vmem:[%s7052_s1 + $0x3f0] sm:$0xff]  ;;  %v623_v22 = vld [vmem:[%s7052_s1 + $0x268] sm:$0xff]  ;;  %v429_v23 = vld [vmem:[%s4888_s20 + $0x138] sm:$0xff] }
  0x28   : > { %3790 = vmatprep.subr.mxu1 %v596_v54  ;;  %3724 = vmatprep.subr.mxu0 %v563_v55  ;;  %v432_v21 = vld [vmem:[%s4888_s20 + $0x150] sm:$0xff]  ;;  %v443_v25 = vld [vmem:[%s4888_s20 + $0x1a8] sm:$0xff]  ;;  %v638_v26 = vld [vmem:[%s7052_s1 + $0x2e0] sm:$0xff] }
  0x29   : > { %3791 = vmatpush3.msra.mxu1 %v580_v56  ;;  %3725 = vmatpush3.msra.mxu0 %v547_v57  ;;  %v656_v24 = vld [vmem:[%s7052_s1 + $0x370] sm:$0xff]  ;;  %v431_v27 = vld [vmem:[%s4888_s20 + $0x148] sm:$0xff]  ;;  %v445_v29 = vld [vmem:[%s4888_s20 + $0x1b8] sm:$0xff] }
  0x2a   : > { %3792 = vmatprep.subr.mxu1 %v595_v58  ;;  %3726 = vmatprep.subr.mxu0 %v562_v59  ;;  %v671_v28 = vld [vmem:[%s7052_s1 + $0x3e8] sm:$0xff]  ;;  %v622_v30 = vld [vmem:[%s7052_s1 + $0x260] sm:$0xff]  ;;  %v456_v33 = vld [vmem:[%s4888_s20 + $0x210] sm:$0xff] }
  0x2b   : > { %858 = vmatprep.mubr.f32.mxu0 %v391_v60  ;;  %3727 = vmatpush3.msra.mxu0 %v546_v61  ;;  %v442_v31 = vld [vmem:[%s4888_s20 + $0x1a0] sm:$0xff]  ;;  %v655_v32 = vld [vmem:[%s7052_s1 + $0x368] sm:$0xff]  ;;  %v637_v34 = vld [vmem:[%s7052_s1 + $0x2d8] sm:$0xff] }
  0x2c   : > { %3793 = vmatpush3.msra.mxu1 %v579_v62  ;;  %859 = vmatmul.mubr.f32.vlgmr.msra.gmra.mxu0 %v390_v63  ;;  %v444_v35 = vld [vmem:[%s4888_s20 + $0x1b0] sm:$0xff]  ;;  %v670_v36 = vld [vmem:[%s7052_s1 + $0x3e0] sm:$0xff]  ;;  %v621_v38 = vld [vmem:[%s7052_s1 + $0x258] sm:$0xff] }
  0x2d   : > { %3794 = vmatprep.subr.mxu1 %v594_v0  ;;  %983 = vmatprep.mubr.f32.mxu1 %v393_v2  ;;  %v458_v37 = vld [vmem:[%s4888_s20 + $0x220] sm:$0xff]  ;;  %v455_v39 = vld [vmem:[%s4888_s20 + $0x208] sm:$0xff]  ;;  %v469_v41 = vld [vmem:[%s4888_s20 + $0x278] sm:$0xff] }
  0x2e   : > { %3795 = vmatpush3.msra.mxu1 %v578_v1  ;;  %863 = vmatprep.mubr.f32.mxu0 %v404_v4  ;;  %v654_v40 = vld [vmem:[%s7052_s1 + $0x360] sm:$0xff]  ;;  %v636_v42 = vld [vmem:[%s7052_s1 + $0x2d0] sm:$0xff]  ;;  %v457_v43 = vld [vmem:[%s4888_s20 + $0x218] sm:$0xff] }
  0x2f   : > { %984 = vmatmul.mubr.f32.vlgmr.msra.gmra.mxu1 %v392_v3  ;;  %3832 = vmatprep.subr.mxu0 %v641_v6  ;;  %v669_v44 = vld [vmem:[%s7052_s1 + $0x3d8] sm:$0xff]  ;;  %v471_v45 = vld [vmem:[%s4888_s20 + $0x288] sm:$0xff]  ;;  %v620_v46 = vld [vmem:[%s7052_s1 + $0x250] sm:$0xff] }
  0x30   : > { %988 = vmatprep.mubr.f32.mxu1 %v406_v5  ;;  %864 = vmatmul.mubr.f32.gmra.mxu0 %v403_v7  ;;  %v468_v47 = vld [vmem:[%s4888_s20 + $0x270] sm:$0xff]  ;;  %v653_v48 = vld [vmem:[%s7052_s1 + $0x358] sm:$0xff]  ;;  %v482_v49 = vld [vmem:[%s4888_s20 + $0x2e0] sm:$0xff] }
  0x31   : > { %3900 = vmatprep.subr.mxu1 %v673_v8  ;;  %868 = vmatprep.mubr.f32.mxu0 %v417_v9  ;;  %v635_v50 = vld [vmem:[%s7052_s1 + $0x2c8] sm:$0xff]  ;;  %v470_v51 = vld [vmem:[%s4888_s20 + $0x280] sm:$0xff]  ;;  %v668_v52 = vld [vmem:[%s7052_s1 + $0x3d0] sm:$0xff] }
  0x32   : > { %3833 = vmatpush3.msra.mxu0 %v625_v10  ;;  %3901 = vmatpush3.msra.mxu1 %v657_v16  ;;  %v484_v53 = vld [vmem:[%s4888_s20 + $0x2f0] sm:$0xff]  ;;  %v619_v54 = vld [vmem:[%s7052_s1 + $0x248] sm:$0xff]  ;;  %v481_v55 = vld [vmem:[%s4888_s20 + $0x2d8] sm:$0xff] }
  0x33   : > { %989 = vmatmul.mubr.f32.gmra.mxu1 %v405_v11  ;;  %3834 = vmatprep.subr.mxu0 %v640_v12  ;;  %v652_v56 = vld [vmem:[%s7052_s1 + $0x350] sm:$0xff]  ;;  %v634_v57 = vld [vmem:[%s7052_s1 + $0x2c0] sm:$0xff]  ;;  %v667_v58 = vld [vmem:[%s7052_s1 + $0x3c8] sm:$0xff] }
  0x34   : > { %993 = vmatprep.mubr.f32.mxu1 %v419_v13  ;;  %3835 = vmatpush3.msra.mxu0 %v624_v14  ;;  %v483_v59 = vld [vmem:[%s4888_s20 + $0x2e8] sm:$0xff]  ;;  %v618_v61 = vld [vmem:[%s7052_s1 + $0x240] sm:$0xff]  ;;  %v633_v0 = vld [vmem:[%s7052_s1 + $0x2b8] sm:$0xff] }
  0x35   : > { %869 = vmatmul.mubr.f32.gmra.mxu0 %v416_v15  ;;  %3836 = vmatprep.subr.mxu0 %v639_v18  ;;  %v495_v60 = vld [vmem:[%s4888_s20 + $0x348] sm:$0xff]  ;;  %v494_v63 = vld [vmem:[%s4888_s20 + $0x340] sm:$0xff]  ;;  %v497_v2 = vld [vmem:[%s4888_s20 + $0x358] sm:$0xff] }
  0x36   : > { %873 = vmatprep.mubr.f32.mxu0 %v430_v17  ;;  %3902 = vmatprep.subr.mxu1 %v672_v20  ;;  %v651_v62 = vld [vmem:[%s7052_s1 + $0x348] sm:$0xff]  ;;  %v666_v1 = vld [vmem:[%s7052_s1 + $0x3c0] sm:$0xff]  ;;  %v617_v3 = vld [vmem:[%s7052_s1 + $0x238] sm:$0xff] }
  0x37   : > { %994 = vmatmul.mubr.f32.gmra.mxu1 %v418_v19  ;;  %3837 = vmatpush3.msra.mxu0 %v623_v22  ;;  %v650_v4 = vld [vmem:[%s7052_s1 + $0x340] sm:$0xff]  ;;  %v496_v5 = vld [vmem:[%s4888_s20 + $0x350] sm:$0xff]  ;;  %v665_v7 = vld [vmem:[%s7052_s1 + $0x3b8] sm:$0xff] }
  0x38   : > { %998 = vmatprep.mubr.f32.mxu1 %v432_v21  ;;  %3903 = vmatpush3.msra.mxu1 %v656_v24  ;;  %v632_v6 = vld [vmem:[%s7052_s1 + $0x2b0] sm:$0xff]  ;;  %v649_v10 = vld [vmem:[%s7052_s1 + $0x338] sm:$0xff]  ;;  %v507_v11 = vld [vmem:[%s4888_s20 + $0x3a8] sm:$0xff] }
  0x39   : > { %874 = vmatmul.mubr.f32.gmra.mxu0 %v429_v23  ;;  %3838 = vmatprep.subr.mxu0 %v638_v26  ;;  %v508_v8 = vld [vmem:[%s4888_s20 + $0x3b0] sm:$0xff]  ;;  %v631_v12 = vld [vmem:[%s7052_s1 + $0x2a8] sm:$0xff]  ;;  %v510_v14 = vld [vmem:[%s4888_s20 + $0x3c0] sm:$0xff] }
  0x3a   : > { %878 = vmatprep.mubr.f32.mxu0 %v443_v25  ;;  %3904 = vmatprep.subr.mxu1 %v671_v28  ;;  %v616_v9 = vld [vmem:[%s7052_s1 + $0x230] sm:$0xff]  ;;  %v615_v15 = vld [vmem:[%s7052_s1 + $0x228] sm:$0xff]  ;;  %v509_v17 = vld [vmem:[%s4888_s20 + $0x3b8] sm:$0xff] }
  0x3b   : > { %999 = vmatmul.mubr.f32.gmra.mxu1 %v431_v27  ;;  %3839 = vmatpush3.msra.mxu0 %v622_v30  ;;  %v664_v13 = vld [vmem:[%s7052_s1 + $0x3b0] sm:$0xff]  ;;  %v630_v18 = vld [vmem:[%s7052_s1 + $0x2a0] sm:$0xff]  ;;  %v663_v19 = vld [vmem:[%s7052_s1 + $0x3a8] sm:$0xff] }
  0x3c   : > { %1003 = vmatprep.mubr.f32.mxu1 %v445_v29  ;;  %3905 = vmatpush3.msra.mxu1 %v655_v32  ;;  %v648_v16 = vld [vmem:[%s7052_s1 + $0x330] sm:$0xff]  ;;  %v521_v20 = vld [vmem:[%s4888_s20 + $0x418] sm:$0xff]  ;;  %v614_v21 = vld [vmem:[%s7052_s1 + $0x220] sm:$0xff] }
  0x3d   : > { %879 = vmatmul.mubr.f32.gmra.mxu0 %v442_v31  ;;  %3840 = vmatprep.subr.mxu0 %v637_v34  ;;  %v647_v22 = vld [vmem:[%s7052_s1 + $0x328] sm:$0xff]  ;;  %v520_v23 = vld [vmem:[%s4888_s20 + $0x410] sm:$0xff]  ;;  %v629_v24 = vld [vmem:[%s7052_s1 + $0x298] sm:$0xff] }
  0x3e   : > { %883 = vmatprep.mubr.f32.mxu0 %v456_v33  ;;  %3906 = vmatprep.subr.mxu1 %v670_v36  ;;  %v662_v25 = vld [vmem:[%s7052_s1 + $0x3a0] sm:$0xff]  ;;  %v523_v26 = vld [vmem:[%s4888_s20 + $0x428] sm:$0xff]  ;;  %v613_v27 = vld [vmem:[%s7052_s1 + $0x218] sm:$0xff] }
  0x3f   : > { %1004 = vmatmul.mubr.f32.gmra.mxu1 %v444_v35  ;;  %3841 = vmatpush3.msra.mxu0 %v621_v38  ;;  %v646_v28 = vld [vmem:[%s7052_s1 + $0x320] sm:$0xff]  ;;  %v628_v30 = vld [vmem:[%s7052_s1 + $0x290] sm:$0xff]  ;;  %v661_v31 = vld [vmem:[%s7052_s1 + $0x398] sm:$0xff] }
  0x40   : > { %1008 = vmatprep.mubr.f32.mxu1 %v458_v37  ;;  %3907 = vmatpush3.msra.mxu1 %v654_v40  ;;  %v522_v29 = vld [vmem:[%s4888_s20 + $0x420] sm:$0xff]  ;;  %v612_v33 = vld [vmem:[%s7052_s1 + $0x210] sm:$0xff]  ;;  %v645_v34 = vld [vmem:[%s7052_s1 + $0x318] sm:$0xff] }
  0x41   : > { %884 = vmatmul.mubr.f32.gmra.mxu0 %v455_v39  ;;  %3842 = vmatprep.subr.mxu0 %v636_v42  ;;  %v534_v32 = vld [vmem:[%s4888_s20 + $0x480] sm:$0xff]  ;;  %v533_v35 = vld [vmem:[%s4888_s20 + $0x478] sm:$0xff]  ;;  %v627_v36 = vld [vmem:[%s7052_s1 + $0x288] sm:$0xff] }
  0x42   : > { %888 = vmatprep.mubr.f32.mxu0 %v469_v41  ;;  %3908 = vmatprep.subr.mxu1 %v669_v44  ;;  %v660_v37 = vld [vmem:[%s7052_s1 + $0x390] sm:$0xff]  ;;  %v611_v39 = vld [vmem:[%s7052_s1 + $0x208] sm:$0xff]  ;;  %v626_v42 = vld [vmem:[%s7052_s1 + $0x280] sm:$0xff] }
  0x43   : > { %1009 = vmatmul.mubr.f32.gmra.mxu1 %v457_v43  ;;  %3843 = vmatpush3.msra.mxu0 %v620_v46  ;;  %v536_v38 = vld [vmem:[%s4888_s20 + $0x490] sm:$0xff]  ;;  %v535_v41 = vld [vmem:[%s4888_s20 + $0x488] sm:$0xff]  ;;  %v610_v44 = vld [vmem:[%s7052_s1 + $0x200] sm:$0xff] }
  0x44   : > { %1013 = vmatprep.mubr.f32.mxu1 %v471_v45  ;;  %3909 = vmatpush3.msra.mxu1 %v653_v48  ;;  %v644_v40 = vld [vmem:[%s7052_s1 + $0x310] sm:$0xff]  ;;  %v659_v43 = vld [vmem:[%s7052_s1 + $0x388] sm:$0xff]  ;;  %v658_v48 = vld [vmem:[%s7052_s1 + $0x380] sm:$0xff] }
  0x45   : > { %889 = vmatmul.mubr.f32.gmra.mxu0 %v468_v47  ;;  %3844 = vmatprep.subr.mxu0 %v635_v50  ;;  %v395_v45 = vld [vmem:[%s4888_s20 + $0x28] sm:$0xff]  ;;  %v394_v47 = vld [vmem:[%s4888_s20 + $0x20] sm:$0xff]  ;;  %v397_v50 = vld [vmem:[%s4888_s20 + $0x38] sm:$0xff] }
  0x46   : > { %893 = vmatprep.mubr.f32.mxu0 %v482_v49  ;;  %3910 = vmatprep.subr.mxu1 %v668_v52  ;;  %v643_v46 = vld [vmem:[%s7052_s1 + $0x308] sm:$0xff]  ;;  %v642_v49 = vld [vmem:[%s7052_s1 + $0x300] sm:$0xff]  ;;  %v408_v52 = vld [vmem:[%s4888_s20 + $0x90] sm:$0xff] }
  0x47   : > { %1014 = vmatmul.mubr.f32.gmra.mxu1 %v470_v51  ;;  %3845 = vmatpush3.msra.mxu0 %v619_v54  ;;  %v396_v51 = vld [vmem:[%s4888_s20 + $0x30] sm:$0xff]  ;;  %v705_v54 = vld [vmem:[%s7052_s1 + $0x4f8] sm:$0xff] }
  0x48   : > { %1018 = vmatprep.mubr.f32.mxu1 %v484_v53  ;;  %3911 = vmatpush3.msra.mxu1 %v652_v56  ;;  %v410_v53 = vld [vmem:[%s4888_s20 + $0xa0] sm:$0xff]  ;;  %v737_v56 = vld [vmem:[%s7052_s1 + $0x5f8] sm:$0xff] }
  0x49   : > { %894 = vmatmul.mubr.f32.gmra.mxu0 %v481_v55  ;;  %3846 = vmatprep.subr.mxu0 %v634_v57  ;;  %v407_v55 = vld [vmem:[%s4888_s20 + $0x88] sm:$0xff]  ;;  %v421_v57 = vld [vmem:[%s4888_s20 + $0xf8] sm:$0xff] }
  0x4a   : > { %3912 = vmatprep.subr.mxu1 %v667_v58  ;;  %898 = vmatprep.mubr.f32.mxu0 %v495_v60  ;;  %v689_v58 = vld [vmem:[%s7052_s1 + $0x478] sm:$0xff]  ;;  %v704_v60 = vld [vmem:[%s7052_s1 + $0x4f0] sm:$0xff] }
  0x4b   : > { %1019 = vmatmul.mubr.f32.gmra.mxu1 %v483_v59  ;;  %3847 = vmatpush3.msra.mxu0 %v618_v61  ;;  %v409_v59 = vld [vmem:[%s4888_s20 + $0x98] sm:$0xff]  ;;  %v423_v61 = vld [vmem:[%s4888_s20 + $0x108] sm:$0xff] }
  0x4c   : > { %3913 = vmatpush3.msra.mxu1 %v651_v62  ;;  %3848 = vmatprep.subr.mxu0 %v633_v0  ;;  %v688_v62 = vld [vmem:[%s7052_s1 + $0x470] sm:$0xff]  ;;  %v721_v0 = vld [vmem:[%s7052_s1 + $0x578] sm:$0xff] }
  0x4d   : > { %899 = vmatmul.mubr.f32.gmra.mxu0 %v494_v63  ;;  %3914 = vmatprep.subr.mxu1 %v666_v1  ;;  %v420_v63 = vld [vmem:[%s4888_s20 + $0xf0] sm:$0xff]  ;;  %v434_v1 = vld [vmem:[%s4888_s20 + $0x160] sm:$0xff] }
  0x4e   : > { %1023 = vmatprep.mubr.f32.mxu1 %v497_v2  ;;  %3849 = vmatpush3.msra.mxu0 %v617_v3  ;;  %v703_v2 = vld [vmem:[%s7052_s1 + $0x4e8] sm:$0xff]  ;;  %v422_v3 = vld [vmem:[%s4888_s20 + $0x100] sm:$0xff] }
  0x4f   : > { %3915 = vmatpush3.msra.mxu1 %v650_v4  ;;  %3850 = vmatprep.subr.mxu0 %v632_v6  ;;  %v736_v4 = vld [vmem:[%s7052_s1 + $0x5f0] sm:$0xff]  ;;  %v687_v6 = vld [vmem:[%s7052_s1 + $0x468] sm:$0xff] }
  0x50   : > { %1024 = vmatmul.mubr.f32.gmra.mxu1 %v496_v5  ;;  %3916 = vmatprep.subr.mxu1 %v665_v7  ;;  %v436_v5 = vld [vmem:[%s4888_s20 + $0x170] sm:$0xff]  ;;  %v433_v7 = vld [vmem:[%s4888_s20 + $0x158] sm:$0xff] }
  0x51   : > { %903 = vmatprep.mubr.f32.mxu0 %v508_v8  ;;  %3851 = vmatpush3.msra.mxu0 %v616_v9  ;;  %v720_v8 = vld [vmem:[%s7052_s1 + $0x570] sm:$0xff]  ;;  %v447_v9 = vld [vmem:[%s4888_s20 + $0x1c8] sm:$0xff] }
  0x52   : > { %3917 = vmatpush3.msra.mxu1 %v649_v10  ;;  %904 = vmatmul.mubr.f32.gmra.mxu0 %v507_v11  ;;  %v702_v10 = vld [vmem:[%s7052_s1 + $0x4e0] sm:$0xff]  ;;  %v435_v11 = vld [vmem:[%s4888_s20 + $0x168] sm:$0xff] }
  0x53   : > { %3852 = vmatprep.subr.mxu0 %v631_v12  ;;  %3918 = vmatprep.subr.mxu1 %v664_v13  ;;  %v735_v12 = vld [vmem:[%s7052_s1 + $0x5e8] sm:$0xff]  ;;  %v449_v13 = vld [vmem:[%s4888_s20 + $0x1d8] sm:$0xff] }
  0x54   : > { %1028 = vmatprep.mubr.f32.mxu1 %v510_v14  ;;  %3853 = vmatpush3.msra.mxu0 %v615_v15  ;;  %v686_v14 = vld [vmem:[%s7052_s1 + $0x460] sm:$0xff] }
  0x55   : > { %3919 = vmatpush3.msra.mxu1 %v648_v16  ;;  %3854 = vmatprep.subr.mxu0 %v630_v18  ;;  %v446_v15 = vld [vmem:[%s4888_s20 + $0x1c0] sm:$0xff]  ;;  %v719_v16 = vld [vmem:[%s7052_s1 + $0x568] sm:$0xff]  ;;  %v701_v18 = vld [vmem:[%s7052_s1 + $0x4d8] sm:$0xff] }
  0x56   : > { %1029 = vmatmul.mubr.f32.gmra.mxu1 %v509_v17  ;;  %3920 = vmatprep.subr.mxu1 %v663_v19  ;;  %v460_v17 = vld [vmem:[%s4888_s20 + $0x230] sm:$0xff] }
  0x57   : > { %908 = vmatprep.mubr.f32.mxu0 %v521_v20  ;;  %3855 = vmatpush3.msra.mxu0 %v614_v21  ;;  %v448_v19 = vld [vmem:[%s4888_s20 + $0x1d0] sm:$0xff]  ;;  %v734_v20 = vld [vmem:[%s7052_s1 + $0x5e0] sm:$0xff] }
  0x58   : > { %3921 = vmatpush3.msra.mxu1 %v647_v22  ;;  %909 = vmatmul.mubr.f32.gmra.mxu0 %v520_v23  ;;  %v462_v21 = vld [vmem:[%s4888_s20 + $0x240] sm:$0xff]  ;;  %v685_v22 = vld [vmem:[%s7052_s1 + $0x458] sm:$0xff]  ;;  %v459_v23 = vld [vmem:[%s4888_s20 + $0x228] sm:$0xff] }
  0x59   : > { %3856 = vmatprep.subr.mxu0 %v629_v24  ;;  %3922 = vmatprep.subr.mxu1 %v662_v25  ;;  %v718_v24 = vld [vmem:[%s7052_s1 + $0x560] sm:$0xff]  ;;  %v473_v25 = vld [vmem:[%s4888_s20 + $0x298] sm:$0xff] }
  0x5a   : > { %1033 = vmatprep.mubr.f32.mxu1 %v523_v26  ;;  %3857 = vmatpush3.msra.mxu0 %v613_v27  ;;  %v700_v26 = vld [vmem:[%s7052_s1 + $0x4d0] sm:$0xff]  ;;  %v461_v27 = vld [vmem:[%s4888_s20 + $0x238] sm:$0xff] }
  0x5b   : > { %3923 = vmatpush3.msra.mxu1 %v646_v28  ;;  %3858 = vmatprep.subr.mxu0 %v628_v30  ;;  %v733_v28 = vld [vmem:[%s7052_s1 + $0x5d8] sm:$0xff]  ;;  %v684_v30 = vld [vmem:[%s7052_s1 + $0x450] sm:$0xff] }
  0x5c   : > { %1034 = vmatmul.mubr.f32.gmra.mxu1 %v522_v29  ;;  %3924 = vmatprep.subr.mxu1 %v661_v31  ;;  %v475_v29 = vld [vmem:[%s4888_s20 + $0x2a8] sm:$0xff]  ;;  %v472_v31 = vld [vmem:[%s4888_s20 + $0x290] sm:$0xff] }
  0x5d   : > { %913 = vmatprep.mubr.f32.mxu0 %v534_v32  ;;  %3859 = vmatpush3.msra.mxu0 %v612_v33  ;;  %v717_v32 = vld [vmem:[%s7052_s1 + $0x558] sm:$0xff]  ;;  %v486_v33 = vld [vmem:[%s4888_s20 + $0x300] sm:$0xff] }
  0x5e   : > { %3925 = vmatpush3.msra.mxu1 %v645_v34  ;;  %914 = vmatmul.mubr.f32.gmra.mxu0 %v533_v35  ;;  %v699_v34 = vld [vmem:[%s7052_s1 + $0x4c8] sm:$0xff]  ;;  %v474_v35 = vld [vmem:[%s4888_s20 + $0x2a0] sm:$0xff] }
  0x5f   : > { %3860 = vmatprep.subr.mxu0 %v627_v36  ;;  %3926 = vmatprep.subr.mxu1 %v660_v37  ;;  %v732_v36 = vld [vmem:[%s7052_s1 + $0x5d0] sm:$0xff] }
  0x60   : > { %1038 = vmatprep.mubr.f32.mxu1 %v536_v38  ;;  %3861 = vmatpush3.msra.mxu0 %v611_v39  ;;  %v488_v37 = vld [vmem:[%s4888_s20 + $0x310] sm:$0xff]  ;;  %v683_v38 = vld [vmem:[%s7052_s1 + $0x448] sm:$0xff]  ;;  %v485_v39 = vld [vmem:[%s4888_s20 + $0x2f8] sm:$0xff] }
  0x61   : > { %3927 = vmatpush3.msra.mxu1 %v644_v40  ;;  %3862 = vmatprep.subr.mxu0 %v626_v42  ;;  %v716_v40 = vld [vmem:[%s7052_s1 + $0x550] sm:$0xff]  ;;  %v731_v42 = vld [vmem:[%s7052_s1 + $0x5c8] sm:$0xff] }
  0x62   : > { %1039 = vmatmul.mubr.f32.gmra.mxu1 %v535_v41  ;;  %3928 = vmatprep.subr.mxu1 %v659_v43  ;;  %v698_v41 = vld [vmem:[%s7052_s1 + $0x4c0] sm:$0xff]  ;;  %v487_v43 = vld [vmem:[%s4888_s20 + $0x308] sm:$0xff] }
  0x63   : > { %3863 = vmatpush3.msra.mxu0 %v610_v44  ;;  %1108 = vmatprep.mubr.f32.mxu0 %v395_v45  ;;  %v499_v44 = vld [vmem:[%s4888_s20 + $0x368] sm:$0xff]  ;;  %v682_v45 = vld [vmem:[%s7052_s1 + $0x440] sm:$0xff] }
  0x64   : > { %3929 = vmatpush3.msra.mxu1 %v643_v46  ;;  %1109 = vmatmul.mubr.f32.vlgmr.msra.gmra.mxu0 %v394_v47  ;;  %v715_v46 = vld [vmem:[%s7052_s1 + $0x548] sm:$0xff]  ;;  %v498_v47 = vld [vmem:[%s4888_s20 + $0x360] sm:$0xff] }
  0x65   : > { %3930 = vmatprep.subr.mxu1 %v658_v48  ;;  %1233 = vmatprep.mubr.f32.mxu1 %v397_v50  ;;  %v697_v48 = vld [vmem:[%s7052_s1 + $0x4b8] sm:$0xff] }
  0x66   : > { %3931 = vmatpush3.msra.mxu1 %v642_v49  ;;  %1113 = vmatprep.mubr.f32.mxu0 %v408_v52  ;;  %v730_v49 = vld [vmem:[%s7052_s1 + $0x5c0] sm:$0xff]  ;;  %v501_v50 = vld [vmem:[%s4888_s20 + $0x378] sm:$0xff] }
  0x67   : > { %1234 = vmatmul.mubr.f32.vlgmr.msra.gmra.mxu1 %v396_v51  ;;  %3968 = vmatprep.subr.mxu0 %v705_v54  ;;  %v681_v51 = vld [vmem:[%s7052_s1 + $0x438] sm:$0xff]  ;;  %v714_v52 = vld [vmem:[%s7052_s1 + $0x540] sm:$0xff]  ;;  %v696_v54 = vld [vmem:[%s7052_s1 + $0x4b0] sm:$0xff] }
  0x68   : > { %1238 = vmatprep.mubr.f32.mxu1 %v410_v53  ;;  %1114 = vmatmul.mubr.f32.gmra.mxu0 %v407_v55  ;;  %v500_v53 = vld [vmem:[%s4888_s20 + $0x370] sm:$0xff]  ;;  %v729_v55 = vld [vmem:[%s7052_s1 + $0x5b8] sm:$0xff] }
  0x69   : > { %4036 = vmatprep.subr.mxu1 %v737_v56  ;;  %1118 = vmatprep.mubr.f32.mxu0 %v421_v57  ;;  %v512_v56 = vld [vmem:[%s4888_s20 + $0x3d0] sm:$0xff] }
  0x6a   : > { %3969 = vmatpush3.msra.mxu0 %v689_v58  ;;  %4037 = vmatpush3.msra.mxu1 %v721_v0  ;;  %v680_v57 = vld [vmem:[%s7052_s1 + $0x430] sm:$0xff]  ;;  %v713_v58 = vld [vmem:[%s7052_s1 + $0x538] sm:$0xff] }
  0x6b   : > { %1239 = vmatmul.mubr.f32.gmra.mxu1 %v409_v59  ;;  %3970 = vmatprep.subr.mxu0 %v704_v60  ;;  %v511_v59 = vld [vmem:[%s4888_s20 + $0x3c8] sm:$0xff]  ;;  %v712_v0 = vld [vmem:[%s7052_s1 + $0x530] sm:$0xff] }
  0x6c   : > { %1243 = vmatprep.mubr.f32.mxu1 %v423_v61  ;;  %3971 = vmatpush3.msra.mxu0 %v688_v62  ;;  %v695_v60 = vld [vmem:[%s7052_s1 + $0x4a8] sm:$0xff]  ;;  %v728_v61 = vld [vmem:[%s7052_s1 + $0x5b0] sm:$0xff]  ;;  %v514_v62 = vld [vmem:[%s4888_s20 + $0x3e0] sm:$0xff] }
  0x6d   : > { %1119 = vmatmul.mubr.f32.gmra.mxu0 %v420_v63  ;;  %3972 = vmatprep.subr.mxu0 %v703_v2  ;;  %v679_v63 = vld [vmem:[%s7052_s1 + $0x428] sm:$0xff]  ;;  %v694_v2 = vld [vmem:[%s7052_s1 + $0x4a0] sm:$0xff] }
  0x6e   : > { %1123 = vmatprep.mubr.f32.mxu0 %v434_v1  ;;  %4038 = vmatprep.subr.mxu1 %v736_v4  ;;  %v513_v1 = vld [vmem:[%s4888_s20 + $0x3d8] sm:$0xff] }
  0x6f   : > { %1244 = vmatmul.mubr.f32.gmra.mxu1 %v422_v3  ;;  %3973 = vmatpush3.msra.mxu0 %v687_v6  ;;  %v727_v3 = vld [vmem:[%s7052_s1 + $0x5a8] sm:$0xff]  ;;  %v525_v4 = vld [vmem:[%s4888_s20 + $0x438] sm:$0xff] }
  0x70   : > { %1248 = vmatprep.mubr.f32.mxu1 %v436_v5  ;;  %4039 = vmatpush3.msra.mxu1 %v720_v8  ;;  %v678_v5 = vld [vmem:[%s7052_s1 + $0x420] sm:$0xff]  ;;  %v711_v6 = vld [vmem:[%s7052_s1 + $0x528] sm:$0xff]  ;;  %v693_v8 = vld [vmem:[%s7052_s1 + $0x498] sm:$0xff] }
  0x71   : > { %1124 = vmatmul.mubr.f32.gmra.mxu0 %v433_v7  ;;  %3974 = vmatprep.subr.mxu0 %v702_v10  ;;  %v524_v7 = vld [vmem:[%s4888_s20 + $0x430] sm:$0xff]  ;;  %v527_v10 = vld [vmem:[%s4888_s20 + $0x448] sm:$0xff] }
  0x72   : > { %1128 = vmatprep.mubr.f32.mxu0 %v447_v9  ;;  %4040 = vmatprep.subr.mxu1 %v735_v12  ;;  %v726_v9 = vld [vmem:[%s7052_s1 + $0x5a0] sm:$0xff] }
  0x73   : > { %1249 = vmatmul.mubr.f32.gmra.mxu1 %v435_v11  ;;  %3975 = vmatpush3.msra.mxu0 %v686_v14  ;;  %v677_v11 = vld [vmem:[%s7052_s1 + $0x418] sm:$0xff]  ;;  %v710_v12 = vld [vmem:[%s7052_s1 + $0x520] sm:$0xff]  ;;  %v692_v14 = vld [vmem:[%s7052_s1 + $0x490] sm:$0xff] }
  0x74   : > { %1253 = vmatprep.mubr.f32.mxu1 %v449_v13  ;;  %4041 = vmatpush3.msra.mxu1 %v719_v16  ;;  %v526_v13 = vld [vmem:[%s4888_s20 + $0x440] sm:$0xff] }
  0x75   : > { %1129 = vmatmul.mubr.f32.gmra.mxu0 %v446_v15  ;;  %3976 = vmatprep.subr.mxu0 %v701_v18  ;;  %v725_v15 = vld [vmem:[%s7052_s1 + $0x598] sm:$0xff]  ;;  %v538_v16 = vld [vmem:[%s4888_s20 + $0x4a0] sm:$0xff] }
  0x76   : > { %1133 = vmatprep.mubr.f32.mxu0 %v460_v17  ;;  %4042 = vmatprep.subr.mxu1 %v734_v20  ;;  %v676_v17 = vld [vmem:[%s7052_s1 + $0x410] sm:$0xff]  ;;  %v709_v18 = vld [vmem:[%s7052_s1 + $0x518] sm:$0xff]  ;;  %v691_v20 = vld [vmem:[%s7052_s1 + $0x488] sm:$0xff] }
  0x77   : > { %1254 = vmatmul.mubr.f32.gmra.mxu1 %v448_v19  ;;  %3977 = vmatpush3.msra.mxu0 %v685_v22  ;;  %v537_v19 = vld [vmem:[%s4888_s20 + $0x498] sm:$0xff]  ;;  %v540_v22 = vld [vmem:[%s4888_s20 + $0x4b0] sm:$0xff] }
  0x78   : > { %1258 = vmatprep.mubr.f32.mxu1 %v462_v21  ;;  %4043 = vmatpush3.msra.mxu1 %v718_v24  ;;  %v724_v21 = vld [vmem:[%s7052_s1 + $0x590] sm:$0xff] }
  0x79   : > { %1134 = vmatmul.mubr.f32.gmra.mxu0 %v459_v23  ;;  %3978 = vmatprep.subr.mxu0 %v700_v26  ;;  %v675_v23 = vld [vmem:[%s7052_s1 + $0x408] sm:$0xff]  ;;  %v708_v24 = vld [vmem:[%s7052_s1 + $0x510] sm:$0xff]  ;;  %v690_v26 = vld [vmem:[%s7052_s1 + $0x480] sm:$0xff] }
  0x7a   : > { %1138 = vmatprep.mubr.f32.mxu0 %v473_v25  ;;  %4044 = vmatprep.subr.mxu1 %v733_v28  ;;  %v539_v25 = vld [vmem:[%s4888_s20 + $0x4a8] sm:$0xff]  ;;  %v674_v28 = vld [vmem:[%s7052_s1 + $0x400] sm:$0xff] }
  0x7b   : > { %1259 = vmatmul.mubr.f32.gmra.mxu1 %v461_v27  ;;  %3979 = vmatpush3.msra.mxu0 %v684_v30  ;;  %v723_v27 = vld [vmem:[%s7052_s1 + $0x588] sm:$0xff] }
  0x7c   : > { %1263 = vmatprep.mubr.f32.mxu1 %v475_v29  ;;  %4045 = vmatpush3.msra.mxu1 %v717_v32  ;;  %v399_v29 = vld [vmem:[%s4888_s20 + $0x48] sm:$0xff]  ;;  %v722_v32 = vld [vmem:[%s7052_s1 + $0x580] sm:$0xff] }
  0x7d   : > { %1139 = vmatmul.mubr.f32.gmra.mxu0 %v472_v31  ;;  %3980 = vmatprep.subr.mxu0 %v699_v34  ;;  %v707_v30 = vld [vmem:[%s7052_s1 + $0x508] sm:$0xff]  ;;  %v398_v31 = vld [vmem:[%s4888_s20 + $0x40] sm:$0xff]  ;;  %v401_v34 = vld [vmem:[%s4888_s20 + $0x58] sm:$0xff] }
  0x7e   : > { %1143 = vmatprep.mubr.f32.mxu0 %v486_v33  ;;  %4046 = vmatprep.subr.mxu1 %v732_v36  ;;  %v706_v33 = vld [vmem:[%s7052_s1 + $0x500] sm:$0xff]  ;;  %v412_v36 = vld [vmem:[%s4888_s20 + $0xb0] sm:$0xff] }
  0x7f   : > { %1264 = vmatmul.mubr.f32.gmra.mxu1 %v474_v35  ;;  %3981 = vmatpush3.msra.mxu0 %v683_v38  ;;  %v400_v35 = vld [vmem:[%s4888_s20 + $0x50] sm:$0xff]  ;;  %v745_v38 = vld [vmem:[%s7052_s1 + $0x638] sm:$0x1] }
  0x80   : > { %1268 = vmatprep.mubr.f32.mxu1 %v488_v37  ;;  %4047 = vmatpush3.msra.mxu1 %v716_v40  ;;  %v414_v37 = vld [vmem:[%s4888_s20 + $0xc0] sm:$0xff]  ;;  %v425_v40 = vld [vmem:[%s4888_s20 + $0x118] sm:$0xff] }
  0x81   : > { %1144 = vmatmul.mubr.f32.gmra.mxu0 %v485_v39  ;;  %3982 = vmatprep.subr.mxu0 %v698_v41  ;;  %v411_v39 = vld [vmem:[%s4888_s20 + $0xa8] sm:$0xff]  ;;  %v413_v41 = vld [vmem:[%s4888_s20 + $0xb8] sm:$0xff] }
  0x82   : > { %4048 = vmatprep.subr.mxu1 %v731_v42  ;;  %1148 = vmatprep.mubr.f32.mxu0 %v499_v44  ;;  %v744_v42 = vld [vmem:[%s7052_s1 + $0x630] sm:$0xff] }
  0x83   : > { %1269 = vmatmul.mubr.f32.gmra.mxu1 %v487_v43  ;;  %3983 = vmatpush3.msra.mxu0 %v682_v45  ;;  %v427_v43 = vld [vmem:[%s4888_s20 + $0x128] sm:$0xff]  ;;  %v424_v44 = vld [vmem:[%s4888_s20 + $0x110] sm:$0xff] }
  0x84   : > { %4049 = vmatpush3.msra.mxu1 %v715_v46  ;;  %3984 = vmatprep.subr.mxu0 %v697_v48  ;;  %v743_v45 = vld [vmem:[%s7052_s1 + $0x628] sm:$0xff]  ;;  %v438_v46 = vld [vmem:[%s4888_s20 + $0x180] sm:$0xff] }
  0x85   : > { %1149 = vmatmul.mubr.f32.gmra.mxu0 %v498_v47  ;;  %4050 = vmatprep.subr.mxu1 %v730_v49  ;;  %v426_v47 = vld [vmem:[%s4888_s20 + $0x120] sm:$0xff]  ;;  %v440_v49 = vld [vmem:[%s4888_s20 + $0x190] sm:$0xff] }
  0x86   : > { %1273 = vmatprep.mubr.f32.mxu1 %v501_v50  ;;  %3985 = vmatpush3.msra.mxu0 %v681_v51  ;;  %v742_v48 = vld [vmem:[%s7052_s1 + $0x620] sm:$0xff]  ;;  %v437_v50 = vld [vmem:[%s4888_s20 + $0x178] sm:$0xff] }
  0x87   : > { %4051 = vmatpush3.msra.mxu1 %v714_v52  ;;  %3986 = vmatprep.subr.mxu0 %v696_v54  ;;  %v741_v51 = vld [vmem:[%s7052_s1 + $0x618] sm:$0xff]  ;;  %v451_v52 = vld [vmem:[%s4888_s20 + $0x1e8] sm:$0xff]  ;;  %v740_v54 = vld [vmem:[%s7052_s1 + $0x610] sm:$0xff] }
  0x88   : > { %1274 = vmatmul.mubr.f32.gmra.mxu1 %v500_v53  ;;  %4052 = vmatprep.subr.mxu1 %v729_v55  ;;  %v439_v53 = vld [vmem:[%s4888_s20 + $0x188] sm:$0xff]  ;;  %v453_v55 = vld [vmem:[%s4888_s20 + $0x1f8] sm:$0xff] }
  0x89   : > { %1153 = vmatprep.mubr.f32.mxu0 %v512_v56  ;;  %3987 = vmatpush3.msra.mxu0 %v680_v57  ;;  %v450_v56 = vld [vmem:[%s4888_s20 + $0x1e0] sm:$0xff]  ;;  %v739_v57 = vld [vmem:[%s7052_s1 + $0x608] sm:$0xff] }
  0x8a   : > { %4053 = vmatpush3.msra.mxu1 %v713_v58  ;;  %1154 = vmatmul.mubr.f32.gmra.mxu0 %v511_v59  ;;  %v464_v58 = vld [vmem:[%s4888_s20 + $0x250] sm:$0xff] }
  0x8b   : > { %3988 = vmatprep.subr.mxu0 %v695_v60  ;;  %4054 = vmatprep.subr.mxu1 %v728_v61  ;;  %v452_v59 = vld [vmem:[%s4888_s20 + $0x1f0] sm:$0xff]  ;;  %v738_v60 = vld [vmem:[%s7052_s1 + $0x600] sm:$0xff] }
  0x8c   : > { %1278 = vmatprep.mubr.f32.mxu1 %v514_v62  ;;  %3989 = vmatpush3.msra.mxu0 %v679_v63  ;;  %v466_v61 = vld [vmem:[%s4888_s20 + $0x260] sm:$0xff]  ;;  %v463_v62 = vld [vmem:[%s4888_s20 + $0x248] sm:$0xff]  ;;  %v477_v63 = vld [vmem:[%s4888_s20 + $0x2b8] sm:$0xff] }
  0x8d   : > { %4055 = vmatpush3.msra.mxu1 %v712_v0  ;;  %3990 = vmatprep.subr.mxu0 %v694_v2  ;;  %v465_v0 = vld [vmem:[%s4888_s20 + $0x258] sm:$0xff]  ;;  %v476_v2 = vld [vmem:[%s4888_s20 + $0x2b0] sm:$0xff] }
  0x8e   : > { %1279 = vmatmul.mubr.f32.gmra.mxu1 %v513_v1  ;;  %4056 = vmatprep.subr.mxu1 %v727_v3  ;;  %v479_v1 = vld [vmem:[%s4888_s20 + $0x2c8] sm:$0xff]  ;;  %v490_v3 = vld [vmem:[%s4888_s20 + $0x320] sm:$0xff] }
  0x8f   : > { %1158 = vmatprep.mubr.f32.mxu0 %v525_v4  ;;  %3991 = vmatpush3.msra.mxu0 %v678_v5  ;;  %v478_v4 = vld [vmem:[%s4888_s20 + $0x2c0] sm:$0xff]  ;;  %v492_v5 = vld [vmem:[%s4888_s20 + $0x330] sm:$0xff] }
  0x90   : > { %4057 = vmatpush3.msra.mxu1 %v711_v6  ;;  %1159 = vmatmul.mubr.f32.gmra.mxu0 %v524_v7  ;;  %v489_v6 = vld [vmem:[%s4888_s20 + $0x318] sm:$0xff]  ;;  %v503_v7 = vld [vmem:[%s4888_s20 + $0x388] sm:$0xff] }
  0x91   : > { %3992 = vmatprep.subr.mxu0 %v693_v8  ;;  %4058 = vmatprep.subr.mxu1 %v726_v9  ;;  %v491_v8 = vld [vmem:[%s4888_s20 + $0x328] sm:$0xff]  ;;  %v505_v9 = vld [vmem:[%s4888_s20 + $0x398] sm:$0xff] }
  0x92   : > { %1283 = vmatprep.mubr.f32.mxu1 %v527_v10  ;;  %3993 = vmatpush3.msra.mxu0 %v677_v11  ;;  %v502_v10 = vld [vmem:[%s4888_s20 + $0x380] sm:$0xff]  ;;  %v516_v11 = vld [vmem:[%s4888_s20 + $0x3f0] sm:$0xff] }
  0x93   : > { %4059 = vmatpush3.msra.mxu1 %v710_v12  ;;  %3994 = vmatprep.subr.mxu0 %v692_v14  ;;  %v504_v12 = vld [vmem:[%s4888_s20 + $0x390] sm:$0xff]  ;;  %v515_v14 = vld [vmem:[%s4888_s20 + $0x3e8] sm:$0xff] }
  0x94   : > { %1284 = vmatmul.mubr.f32.gmra.mxu1 %v526_v13  ;;  %4060 = vmatprep.subr.mxu1 %v725_v15  ;;  %v518_v13 = vld [vmem:[%s4888_s20 + $0x400] sm:$0xff]  ;;  %v529_v15 = vld [vmem:[%s4888_s20 + $0x458] sm:$0xff] }
  0x95   : > { %1163 = vmatprep.mubr.f32.mxu0 %v538_v16  ;;  %3995 = vmatpush3.msra.mxu0 %v676_v17  ;;  %v517_v16 = vld [vmem:[%s4888_s20 + $0x3f8] sm:$0xff]  ;;  %v531_v17 = vld [vmem:[%s4888_s20 + $0x468] sm:$0xff] }
  0x96   : > { %4061 = vmatpush3.msra.mxu1 %v709_v18  ;;  %1164 = vmatmul.mubr.f32.gmra.mxu0 %v537_v19  ;;  %v528_v18 = vld [vmem:[%s4888_s20 + $0x450] sm:$0xff]  ;;  %v542_v19 = vld [vmem:[%s4888_s20 + $0x4c0] sm:$0xff] }
  0x97   : > { %3996 = vmatprep.subr.mxu0 %v691_v20  ;;  %4062 = vmatprep.subr.mxu1 %v724_v21  ;;  %v530_v20 = vld [vmem:[%s4888_s20 + $0x460] sm:$0xff]  ;;  %v544_v21 = vld [vmem:[%s4888_s20 + $0x4d0] sm:$0xff] }
  0x98   : > { %1288 = vmatprep.mubr.f32.mxu1 %v540_v22  ;;  %3997 = vmatpush3.msra.mxu0 %v675_v23  ;;  %v541_v22 = vld [vmem:[%s4888_s20 + $0x4b8] sm:$0xff]  ;;  %v402_v23 = vld [vmem:[%s4888_s20 + $0x60] sm:$0xff] }
  0x99   : > { %4063 = vmatpush3.msra.mxu1 %v708_v24  ;;  %3998 = vmatprep.subr.mxu0 %v690_v26  ;;  %v543_v24 = vld [vmem:[%s4888_s20 + $0x4c8] sm:$0xff]  ;;  %v428_v26 = vld [vmem:[%s4888_s20 + $0x130] sm:$0xff] }
  0x9a   : > { %1289 = vmatmul.mubr.f32.gmra.mxu1 %v539_v25  ;;  %4064 = vmatprep.subr.mxu1 %v723_v27  ;;  %v415_v25 = vld [vmem:[%s4888_s20 + $0xc8] sm:$0xff]  ;;  %v441_v27 = vld [vmem:[%s4888_s20 + $0x198] sm:$0xff] }
  0x9b   : > { %3999 = vmatpush3.msra.mxu0 %v674_v28  ;;  %1358 = vmatprep.mubr.f32.mxu0 %v399_v29  ;;  %v454_v28 = vld [vmem:[%s4888_s20 + $0x200] sm:$0xff]  ;;  %v467_v29 = vld [vmem:[%s4888_s20 + $0x268] sm:$0xff] }
  0x9c   : > { %4065 = vmatpush3.msra.mxu1 %v707_v30  ;;  %1359 = vmatmul.mubr.f32.vlgmr.msra.gmra.mxu0 %v398_v31  ;;  %v480_v30 = vld [vmem:[%s4888_s20 + $0x2d0] sm:$0xff]  ;;  %v493_v31 = vld [vmem:[%s4888_s20 + $0x338] sm:$0xff] }
  0x9d   : > { %4066 = vmatprep.subr.mxu1 %v722_v32  ;;  %1483 = vmatprep.mubr.f32.mxu1 %v401_v34  ;;  %v506_v32 = vld [vmem:[%s4888_s20 + $0x3a0] sm:$0xff]  ;;  %v532_v34 = vld [vmem:[%s4888_s20 + $0x470] sm:$0xff] }
  0x9e   : > { %4067 = vmatpush3.msra.mxu1 %v706_v33  ;;  %1363 = vmatprep.mubr.f32.mxu0 %v412_v36  ;;  %v519_v33 = vld [vmem:[%s4888_s20 + $0x408] sm:$0xff] }
  0x9f   : > { %1484 = vmatmul.mubr.f32.vlgmr.msra.gmra.mxu1 %v400_v35  ;;  %4232 = vmatprep.subr.msk.mxu0 %vm790_vm0, %v745_v38  ;;  %v545_v35 = vld [vmem:[%s4888_s20 + $0x4d8] sm:$0xff]  ;;  %s4628_s20 = smov 104  }
  0xa0   : > { %1488 = vmatprep.mubr.f32.mxu1 %v414_v37  ;;  %1364 = vmatmul.mubr.f32.gmra.mxu0 %v411_v39  ;;  %v5498_v37 = vld [vmem:[%s7053_s2] ss:$0 sm:$0xff] }
  0xa1   : > { %1368 = vmatprep.mubr.f32.mxu0 %v425_v40  ;;  %4233 = vmatpush3.msk.msra.mxu0 %vm790_vm0, %v745_v38 }
  0xa2   : > { %4234 = vmatprep.subr.mxu0 %v744_v42 }
  0xa3   : > { %1489 = vmatmul.mubr.f32.gmra.mxu1 %v413_v41  ;;  %4235 = vmatpush3.msra.mxu0 %v744_v42 }
  0xa4   : > { %1493 = vmatprep.mubr.f32.mxu1 %v427_v43  ;;  %1369 = vmatmul.mubr.f32.gmra.mxu0 %v424_v44 }
  0xa5   : > { %4236 = vmatprep.subr.mxu0 %v743_v45  ;;  %1373 = vmatprep.mubr.f32.mxu0 %v438_v46 }
  0xa6   : > { %4237 = vmatpush3.msra.mxu0 %v743_v45 }
  0xa7   : > { %1494 = vmatmul.mubr.f32.gmra.mxu1 %v426_v47  ;;  %4238 = vmatprep.subr.mxu0 %v742_v48 }
  0xa8   : > { %1498 = vmatprep.mubr.f32.mxu1 %v440_v49  ;;  %4239 = vmatpush3.msra.mxu0 %v742_v48 }
  0xa9   : > { %1374 = vmatmul.mubr.f32.gmra.mxu0 %v437_v50  ;;  %4240 = vmatprep.subr.mxu0 %v741_v51 }
  0xaa   : > { %1378 = vmatprep.mubr.f32.mxu0 %v451_v52  ;;  %4241 = vmatpush3.msra.mxu0 %v741_v51 }
  0xab   : > { %1499 = vmatmul.mubr.f32.gmra.mxu1 %v439_v53  ;;  %4242 = vmatprep.subr.mxu0 %v740_v54 }
  0xac   : > { %1503 = vmatprep.mubr.f32.mxu1 %v453_v55  ;;  %4243 = vmatpush3.msra.mxu0 %v740_v54 }
  0xad   : > { %1379 = vmatmul.mubr.f32.gmra.mxu0 %v450_v56  ;;  %4244 = vmatprep.subr.mxu0 %v739_v57 }
  0xae   : > { %1383 = vmatprep.mubr.f32.mxu0 %v464_v58  ;;  %4245 = vmatpush3.msra.mxu0 %v739_v57 }
  0xaf   : > { %1504 = vmatmul.mubr.f32.gmra.mxu1 %v452_v59  ;;  %4246 = vmatprep.subr.mxu0 %v738_v60 }
  0xb0   : > { %1508 = vmatprep.mubr.f32.mxu1 %v466_v61  ;;  %4247 = vmatpush3.msra.mxu0 %v738_v60 }
  0xb1   : > { %1384 = vmatmul.mubr.f32.gmra.mxu0 %v463_v62 }
  0xb2   : > { %1388 = vmatprep.mubr.f32.mxu0 %v477_v63 }
  0xb3   : > { %1509 = vmatmul.mubr.f32.gmra.mxu1 %v465_v0 }
  0xb4   : > { %1513 = vmatprep.mubr.f32.mxu1 %v479_v1 }
  0xb5   : > { %1389 = vmatmul.mubr.f32.gmra.mxu0 %v476_v2 }
  0xb6   : > { %1393 = vmatprep.mubr.f32.mxu0 %v490_v3 }
  0xb7   : > { %1514 = vmatmul.mubr.f32.gmra.mxu1 %v478_v4 }
  0xb8   : > { %1518 = vmatprep.mubr.f32.mxu1 %v492_v5 }
  0xb9   : > { %1394 = vmatmul.mubr.f32.gmra.mxu0 %v489_v6 }
  0xba   : > { %1398 = vmatprep.mubr.f32.mxu0 %v503_v7 }
  0xbb   : > { %1519 = vmatmul.mubr.f32.gmra.mxu1 %v491_v8 }
  0xbc   : > { %1523 = vmatprep.mubr.f32.mxu1 %v505_v9 }
  0xbd   : > { %1399 = vmatmul.mubr.f32.gmra.mxu0 %v502_v10 }
  0xbe   : > { %1403 = vmatprep.mubr.f32.mxu0 %v516_v11 }
  0xbf   : > { %1524 = vmatmul.mubr.f32.gmra.mxu1 %v504_v12 }
  0xc0   : > { %1528 = vmatprep.mubr.f32.mxu1 %v518_v13 }
  0xc1   : > { %1404 = vmatmul.mubr.f32.gmra.mxu0 %v515_v14 }
  0xc2   : > { %1408 = vmatprep.mubr.f32.mxu0 %v529_v15 }
  0xc3   : > { %1529 = vmatmul.mubr.f32.gmra.mxu1 %v517_v16 }
  0xc4   : > { %1533 = vmatprep.mubr.f32.mxu1 %v531_v17 }
  0xc5   : > { %1409 = vmatmul.mubr.f32.gmra.mxu0 %v528_v18 }
  0xc6   : > { %1413 = vmatprep.mubr.f32.mxu0 %v542_v19 }
  0xc7   : > { %1534 = vmatmul.mubr.f32.gmra.mxu1 %v530_v20 }
  0xc8   : > { %1538 = vmatprep.mubr.f32.mxu1 %v544_v21 }
  0xc9   : > { %1414 = vmatmul.mubr.f32.gmra.mxu0 %v541_v22 }
  0xca   : > { %4248 = vmatprep.mubr.msk.f32.mxu0 %vm753_vm1, %v402_v23 }
  0xcb   : > { %1539 = vmatmul.mubr.f32.gmra.mxu1 %v543_v24 }
  0xcd   : > { %4249 = vmatmul.mubr.msk.f32.vlgmr.msra.gmra.mxu0 %vm753_vm1, %v415_v25 }
  0xce   : > { %4251 = vmatprep.mubr.msk.f32.mxu0 %vm753_vm1, %v428_v26 }
  0xd1   : > { %4252 = vmatmul.mubr.msk.f32.gmra.mxu0 %vm753_vm1, %v441_v27 }
  0xd2   : > { %4254 = vmatprep.mubr.msk.f32.mxu0 %vm753_vm1, %v454_v28 }
  0xd5   : > { %4255 = vmatmul.mubr.msk.f32.gmra.mxu0 %vm753_vm1, %v467_v29 }
  0xd6   : > { %4257 = vmatprep.mubr.msk.f32.mxu0 %vm753_vm1, %v480_v30 }
  0xd9   : > { %4258 = vmatmul.mubr.msk.f32.gmra.mxu0 %vm753_vm1, %v493_v31 }
  0xda   : > { %4260 = vmatprep.mubr.msk.f32.mxu0 %vm753_vm1, %v506_v32 }
  0xdd   : > { %4261 = vmatmul.mubr.msk.f32.gmra.mxu0 %vm753_vm1, %v519_v33 }
  0xde   : > { %4263 = vmatprep.mubr.msk.f32.mxu0 %vm753_vm1, %v532_v34 }
  0xe1   : > { %4264 = vmatmul.mubr.msk.f32.gmra.mxu0 %vm753_vm1, %v545_v35 }
  0xec   : > { %v3728_v36 = vpop.f32.mrf.mxu0 }
  0xee   : > { %v3729_v38 = vpop.f32.mrf.mxu0 }
  0xef   : > { %v3796_v39 = vpop.f32.mrf.mxu1  ;;  %v3730_v40 = vadd.f32 %v3729_v38, %v3728_v36 }
  0xf0   : > { %v3731_v41 = vpop.f32.mrf.mxu0 }
  0xf1   : > { %v3797_v42 = vpop.f32.mrf.mxu1  ;;  %v861_v43 = vadd.f32 %v3730_v40, %v5498_v37 }
  0xf2   : > { %v3798_v44 = vadd.f32 %v3797_v42, %v3796_v39  ;;  %v3732_v45 = vpop.f32.mrf.mxu0 }
  0xf3   : > { %v3799_v46 = vpop.f32.mrf.mxu1  ;;  %v3733_v48 = vadd.f32 %v3732_v45, %v3731_v41 }
  0xf4   : > { %v5501_v47 = vadd.f32 %v3798_v44, %v861_v43 }
  0xf5   : > { %v3734_v49 = vpop.f32.mrf.mxu0  ;;  %v3800_v50 = vpop.f32.mrf.mxu1  ;;  %v866_v51 = vadd.f32 %v3733_v48, %v5498_v37 }
  0xf6   : > { %v3801_v52 = vadd.f32 %v3800_v50, %v3799_v46 }
  0xf7   : > { %v3735_v53 = vpop.f32.mrf.mxu0  ;;  %v3802_v54 = vpop.f32.mrf.mxu1 }
  0xf8   : > { %v5504_v55 = vadd.f32 %v3801_v52, %v866_v51  ;;  %v3736_v56 = vadd.f32 %v3735_v53, %v3734_v49 }
  0xf9   : > { %v3737_v57 = vpop.f32.mrf.mxu0  ;;  %v3803_v58 = vpop.f32.mrf.mxu1 }
  0xfa   : > { %v871_v59 = vadd.f32 %v3736_v56, %v5498_v37  ;;  %v3804_v60 = vadd.f32 %v3803_v58, %v3802_v54 }
  0xfb   : > { %v3738_v61 = vpop.f32.mrf.mxu0  ;;  %v3805_v62 = vpop.f32.mrf.mxu1 }
  0xfc   : > { %v5507_v63 = vadd.f32 %v3804_v60, %v871_v59  ;;  %v3739_v0 = vadd.f32 %v3738_v61, %v3737_v57 }
  0xfd   : > { %v3740_v1 = vpop.f32.mrf.mxu0  ;;  %v3806_v2 = vpop.f32.mrf.mxu1 }
  0xfe   : > { %v876_v3 = vadd.f32 %v3739_v0, %v5498_v37  ;;  %v3807_v4 = vadd.f32 %v3806_v2, %v3805_v62 }
  0xff   : > { %v3741_v5 = vpop.f32.mrf.mxu0  ;;  %v3808_v6 = vpop.f32.mrf.mxu1 }
 0x100   : > { %v5510_v7 = vadd.f32 %v3807_v4, %v876_v3  ;;  %v3742_v8 = vadd.f32 %v3741_v5, %v3740_v1 }
 0x101   : > { %v3743_v9 = vpop.f32.mrf.mxu0  ;;  %v3809_v10 = vpop.f32.mrf.mxu1 }
 0x102   : > { %v881_v11 = vadd.f32 %v3742_v8, %v5498_v37  ;;  %v3810_v12 = vadd.f32 %v3809_v10, %v3808_v6 }
 0x103   : > { %v3744_v13 = vpop.f32.mrf.mxu0  ;;  %v3811_v14 = vpop.f32.mrf.mxu1 }
 0x104   : > { %v5513_v15 = vadd.f32 %v3810_v12, %v881_v11  ;;  %v3745_v16 = vadd.f32 %v3744_v13, %v3743_v9 }
 0x105   : > { %v3746_v17 = vpop.f32.mrf.mxu0  ;;  %v3812_v18 = vpop.f32.mrf.mxu1 }
 0x106   : > { %v886_v19 = vadd.f32 %v3745_v16, %v5498_v37  ;;  %v3813_v20 = vadd.f32 %v3812_v18, %v3811_v14 }
 0x107   : > { %v3747_v21 = vpop.f32.mrf.mxu0  ;;  %v3814_v22 = vpop.f32.mrf.mxu1 }
 0x108   : > { %v5516_v23 = vadd.f32 %v3813_v20, %v886_v19  ;;  %v3748_v24 = vadd.f32 %v3747_v21, %v3746_v17 }
 0x109   : > { %v3749_v25 = vpop.f32.mrf.mxu0  ;;  %v3815_v26 = vpop.f32.mrf.mxu1 }
 0x10a   : > { %v891_v27 = vadd.f32 %v3748_v24, %v5498_v37  ;;  %v3816_v28 = vadd.f32 %v3815_v26, %v3814_v22 }
 0x10b   : > { %v3750_v29 = vpop.f32.mrf.mxu0  ;;  %v3817_v30 = vpop.f32.mrf.mxu1 }
 0x10c   : > { %v5519_v31 = vadd.f32 %v3816_v28, %v891_v27  ;;  %v3751_v32 = vadd.f32 %v3750_v29, %v3749_v25  ;;  %v1785_v27 = vld [vmem:[%s7054_s3 + $0x78] sm:$0xff] }
 0x10d   : > { %v3752_v33 = vpop.f32.mrf.mxu0  ;;  %v3818_v34 = vpop.f32.mrf.mxu1 }
 0x10e   : > { %v896_v35 = vadd.f32 %v3751_v32, %v5498_v37  ;;  %v3819_v36 = vadd.f32 %v3818_v34, %v3817_v30  ;;  %v7063_v30 = vmov 0.0  }
 0x10f   : > { %v3753_v38 = vpop.f32.mrf.mxu0  ;;  %1816 = vmatprep.subr.mxu1 %v7063_v30  ;;  %4266 = vmatprep.subr.mxu0 %v7063_v30 }
 0x110   : > { %v5522_v39 = vadd.f32 %v3819_v36, %v896_v35  ;;  %v3754_v40 = vadd.f32 %v3753_v38, %v3752_v33  ;;  %v3820_v41 = vpop.f32.mrf.mxu1  ;;  %1817 = vmatpush1.msra.mxu1 %v1785_v27  ;;  %v1783_v35 = vld [vmem:[%s7054_s3 + $0x68] sm:$0xff] }
 0x111   : > { %1818 = vmatprep.subr.mxu1 %v7063_v30 }
 0x112   : > { %v901_v42 = vadd.f32 %v3754_v40, %v5498_v37  ;;  %v3821_v43 = vpop.f32.mrf.mxu1  ;;  %v3755_v44 = vpop.f32.mrf.mxu0 }
 0x113   : > { %v3822_v45 = vadd.f32 %v3821_v43, %v3820_v41 }
 0x114   : > { %v3756_v48 = vpop.f32.mrf.mxu0 }
 0x115   : > { %v5525_v46 = vadd.f32 %v3822_v45, %v901_v42  ;;  %v3757_v49 = vadd.f32 %v3756_v48, %v3755_v44  ;;  %v1782_v42 = vld [vmem:[%s7054_s3 + $0x60] sm:$0xff] }
 0x116   : > { %v3823_v50 = vpop.f32.mrf.mxu1 }
 0x117   : > { %v906_v51 = vadd.f32 %v3757_v49, %v5498_v37 }
 0x118   : > { %v3824_v52 = vpop.f32.mrf.mxu1  ;;  %v3758_v53 = vpop.f32.mrf.mxu0 }
 0x119   : > { %v3825_v54 = vadd.f32 %v3824_v52, %v3823_v50 }
 0x11a   : > { %v3759_v57 = vpop.f32.mrf.mxu0 }
 0x11b   : > { %v5528_v56 = vadd.f32 %v3825_v54, %v906_v51  ;;  %v3760_v58 = vadd.f32 %v3759_v57, %v3758_v53  ;;  %v1780_v53 = vld [vmem:[%s7054_s3 + $0x50] sm:$0xff] }
 0x11c   : > { %v3826_v59 = vpop.f32.mrf.mxu1 }
 0x11d   : > { %v911_v60 = vadd.f32 %v3760_v58, %v5498_v37 }
 0x11e   : > { %v3827_v61 = vpop.f32.mrf.mxu1  ;;  %v3761_v62 = vpop.f32.mrf.mxu0 }
 0x11f   : > { %v3828_v0 = vadd.f32 %v3827_v61, %v3826_v59 }
 0x120   : > { %v3762_v2 = vpop.f32.mrf.mxu0 }
 0x121   : > { %v5531_v1 = vadd.f32 %v3828_v0, %v911_v60  ;;  %v3763_v3 = vadd.f32 %v3762_v2, %v3761_v62  ;;  %v1778_v2 = vld [vmem:[%s7054_s3 + $0x40] sm:$0xff] }
 0x122   : > { %v3829_v4 = vpop.f32.mrf.mxu1 }
 0x123   : > { %v916_v5 = vadd.f32 %v3763_v3, %v5498_v37 }
 0x124   : > { %v3830_v6 = vpop.f32.mrf.mxu1  ;;  %v3864_v9 = vpop.f32.mrf.mxu0 }
 0x125   : > { %v3831_v8 = vadd.f32 %v3830_v6, %v3829_v4 }
 0x126   : > { %v3865_v11 = vpop.f32.mrf.mxu0 }
 0x127   : > { %v5534_v10 = vadd.f32 %v3831_v8, %v916_v5  ;;  %v3932_v12 = vpop.f32.mrf.mxu1  ;;  %v3866_v13 = vadd.f32 %v3865_v11, %v3864_v9 }
 0x128   : > { %v3867_v14 = vpop.f32.mrf.mxu0 }
 0x129   : > { %v3933_v16 = vpop.f32.mrf.mxu1  ;;  %v1111_v17 = vadd.f32 %v3866_v13, %v5501_v47  ;;  %v1784_v47 = vld [vmem:[%s7054_s3 + $0x70] sm:$0xff] }
 0x12a   : > { %v3934_v18 = vadd.f32 %v3933_v16, %v3932_v12  ;;  %v3868_v19 = vpop.f32.mrf.mxu0  ;;  %1819 = vmatpush1.msra.mxu1 %v1784_v47  ;;  %v1776_v13 = vld [vmem:[%s7054_s3 + $0x30] sm:$0xff] }
 0x12b   : > { %v3935_v20 = vpop.f32.mrf.mxu1  ;;  %v3869_v22 = vadd.f32 %v3868_v19, %v3867_v14  ;;  %1820 = vmatprep.subr.mxu1 %v7063_v30 }
 0x12c   : > { %v5537_v21 = vadd.f32 %v3934_v18, %v1111_v17  ;;  %1821 = vmatpush1.msra.mxu1 %v1783_v35 }
 0x12d   : > { %v3870_v24 = vpop.f32.mrf.mxu0  ;;  %v3936_v37 = vpop.f32.mrf.mxu1  ;;  %v1116_v25 = vadd.f32 %v3869_v22, %v5504_v55  ;;  %1822 = vmatprep.subr.mxu1 %v7063_v30 }
 0x12e   : > { %v3937_v26 = vadd.f32 %v3936_v37, %v3935_v20  ;;  %1823 = vmatpush1.msra.mxu1 %v1782_v42  ;;  %v1792_v42 = vld [vmem:[%s7054_s3 + $0xb0] sm:$0xff] }
 0x12f   : > { %v3871_v28 = vpop.f32.mrf.mxu0  ;;  %v3938_v29 = vpop.f32.mrf.mxu1  ;;  %1824 = vmatprep.subr.mxu1 %v7063_v30 }
 0x130   : > { %v5548_v32 = vadd.f32 %v3937_v26, %v1116_v25  ;;  %v3872_v33 = vadd.f32 %v3871_v28, %v3870_v24  ;;  %v1774_v24 = vld [vmem:[%s7054_s3 + $0x20] sm:$0xff] }
 0x131   : > { %v3873_v55 = vpop.f32.mrf.mxu0  ;;  %v3939_v34 = vpop.f32.mrf.mxu1 }
 0x132   : > { %v1121_v36 = vadd.f32 %v3872_v33, %v5507_v63  ;;  %v3940_v38 = vadd.f32 %v3939_v34, %v3938_v29  ;;  %v1781_v63 = vld [vmem:[%s7054_s3 + $0x58] sm:$0xff]  ;;  %v1772_v29 = vld [vmem:[%s7054_s3 + $0x10] sm:$0xff] }
 0x133   : > { %v3874_v40 = vpop.f32.mrf.mxu0  ;;  %v3941_v41 = vpop.f32.mrf.mxu1  ;;  %1825 = vmatpush1.msra.mxu1 %v1781_v63  ;;  %v1791_v63 = vld [vmem:[%s7054_s3 + $0xa8] sm:$0xff] }
 0x134   : > { %v5559_v43 = vadd.f32 %v3940_v38, %v1121_v36  ;;  %v3875_v44 = vadd.f32 %v3874_v40, %v3873_v55  ;;  %1826 = vmatprep.subr.mxu1 %v7063_v30  ;;  %v1771_v55 = vld [vmem:[%s7054_s3 + $0x8] sm:$0xff]  ;;  %v1770_v36 = vld [vmem:[%s7054_s3] sm:$0xff]  ;;  %v1793_v40 = vld [vmem:[%s7054_s3 + $0xb8] sm:$0xff] }
 0x135   : > { %v3876_v45 = vpop.f32.mrf.mxu0  ;;  %v3942_v48 = vpop.f32.mrf.mxu1  ;;  %1827 = vmatpush1.msra.mxu1 %v1780_v53 }
 0x136   : > { %v1126_v49 = vadd.f32 %v3875_v44, %v5510_v7  ;;  %v3943_v50 = vadd.f32 %v3942_v48, %v3941_v41  ;;  %v1779_v7 = vld [vmem:[%s7054_s3 + $0x48] sm:$0xff]  ;;  %1828 = vmatprep.subr.mxu1 %v7063_v30 }
 0x137   : > { %v3877_v51 = vpop.f32.mrf.mxu0  ;;  %v3944_v52 = vpop.f32.mrf.mxu1  ;;  %1829 = vmatpush1.msra.mxu1 %v1779_v7 }
 0x138   : > { %v5570_v54 = vadd.f32 %v3943_v50, %v1126_v49  ;;  %v3878_v57 = vadd.f32 %v3877_v51, %v3876_v45  ;;  %1830 = vmatprep.subr.mxu1 %v7063_v30  ;;  %v1790_v50 = vld [vmem:[%s7054_s3 + $0xa0] sm:$0xff] }
 0x139   : > { %v3879_v58 = vpop.f32.mrf.mxu0  ;;  %v3945_v59 = vpop.f32.mrf.mxu1  ;;  %1831 = vmatpush1.msra.mxu1 %v1778_v2 }
 0x13a   : > { %7122 = vst [vmem:[#allocation2_spill] sm:$0xff] %v5570_v54  ;;  %v1131_v60 = vadd.f32 %v3878_v57, %v5513_v15  ;;  %v3946_v61 = vadd.f32 %v3945_v59, %v3944_v52  ;;  %v1777_v15 = vld [vmem:[%s7054_s3 + $0x38] sm:$0xff]  ;;  %1832 = vmatprep.subr.mxu1 %v7063_v30  ;;  %v1788_v59 = vld [vmem:[%s7054_s3 + $0x90] sm:$0xff] }
 0x13b   : > { %v3880_v62 = vpop.f32.mrf.mxu0  ;;  %v3947_v0 = vpop.f32.mrf.mxu1  ;;  %1833 = vmatpush1.msra.mxu1 %v1777_v15  ;;  %v1789_v52 = vld [vmem:[%s7054_s3 + $0x98] sm:$0xff] }
 0x13c   : > { %v5581_v3 = vadd.f32 %v3946_v61, %v1131_v60  ;;  %v3881_v4 = vadd.f32 %v3880_v62, %v3879_v58  ;;  %1834 = vmatprep.subr.mxu1 %v7063_v30  ;;  %v1787_v60 = vld [vmem:[%s7054_s3 + $0x88] sm:$0xff] }
 0x13d   : > { %v3882_v5 = vpop.f32.mrf.mxu0  ;;  %v3948_v6 = vpop.f32.mrf.mxu1  ;;  %1835 = vmatpush1.msra.mxu1 %v1776_v13 }
 0x13e   : > { %7123 = vst [vmem:[#allocation3_spill] sm:$0xff] %v5581_v3  ;;  %v1136_v8 = vadd.f32 %v3881_v4, %v5516_v23  ;;  %v3949_v9 = vadd.f32 %v3948_v6, %v3947_v0  ;;  %v1775_v23 = vld [vmem:[%s7054_s3 + $0x28] sm:$0xff]  ;;  %1836 = vmatprep.subr.mxu1 %v7063_v30 }
 0x13f   : > { %v3883_v11 = vpop.f32.mrf.mxu0  ;;  %v5588_v12 = vpop.f32.mrf.mxu1  ;;  %1837 = vmatpush1.msra.mxu1 %v1775_v23 }
 0x140   : > { %v5594_v14 = vadd.f32 %v3949_v9, %v1136_v8  ;;  %v3884_v16 = vadd.f32 %v3883_v11, %v3882_v5  ;;  %1838 = vmatprep.subr.mxu1 %v7063_v30 }
 0x141   : > { %v3885_v17 = vpop.f32.mrf.mxu0  ;;  %v5596_v18 = vpop.f32.mrf.mxu1  ;;  %1839 = vmatpush1.msra.mxu1 %v1774_v24 }
 0x142   : > { %7124 = vst [vmem:[#allocation4_spill] sm:$0xff] %v5594_v14  ;;  %v5603_v19 = vadd.f32 %v3884_v16, %v5519_v31  ;;  %v1773_v31 = vld [vmem:[%s7054_s3 + $0x18] sm:$0xff]  ;;  %1840 = vmatprep.subr.mxu1 %v7063_v30 }
 0x143   : > { %v3886_v20 = vpop.f32.mrf.mxu0  ;;  %v5605_v22 = vpop.f32.mrf.mxu1  ;;  %1841 = vmatpush1.msra.mxu1 %v1773_v31 }
 0x144   : > { %v3887_v37 = vadd.f32 %v3886_v20, %v3885_v17  ;;  %1842 = vmatprep.subr.mxu1 %v7063_v30 }
 0x145   : > { %v3888_v25 = vpop.f32.mrf.mxu0  ;;  %v5611_v26 = vpop.f32.mrf.mxu1  ;;  %1843 = vmatpush1.msra.mxu1 %v1772_v29 }
 0x146   : > { %v5618_v27 = vadd.f32 %v3887_v37, %v5522_v39  ;;  %1844 = vmatprep.subr.mxu1 %v7063_v30  ;;  %v3955_v14 = vadd.f32 %v5611_v26, %v5605_v22 }
 0x147   : > { %v3889_v28 = vpop.f32.mrf.mxu0  ;;  %1845 = vmatpush1.msra.mxu1 %v1771_v55 }
 0x148   : > { %v3890_v47 = vadd.f32 %v3889_v28, %v3888_v25  ;;  %v5624_v33 = vpop.f32.mrf.mxu1  ;;  %1846 = vmatprep.subr.mxu1 %v7063_v30 }
 0x149   : > { %1847 = vmatpush1.msra.mxu1 %v1770_v36 }
 0x14a   : > { %v5631_v39 = vadd.f32 %v3890_v47, %v5525_v46  ;;  %v5633_v34 = vpop.f32.mrf.mxu1  ;;  %v3891_v35 = vpop.f32.mrf.mxu0  ;;  %1864 = vmatprep.subr.mxu1 %v7063_v30 }
 0x14b   : > { %1865 = vmatpush2.msra.mxu1 %v1793_v40 }
 0x14c   : > { %v3892_v38 = vpop.f32.mrf.mxu0  ;;  %1866 = vmatprep.subr.mxu1 %v7063_v30 }
 0x14d   : > { %v3893_v46 = vadd.f32 %v3892_v38, %v3891_v35  ;;  %1867 = vmatpush2.msra.mxu1 %v1792_v42 }
 0x14e   : > { %v5643_v41 = vpop.f32.mrf.mxu1  ;;  %1868 = vmatprep.subr.mxu1 %v7063_v30 }
 0x14f   : > { %v5650_v44 = vadd.f32 %v3893_v46, %v5528_v56  ;;  %1869 = vmatpush2.msra.mxu1 %v1791_v63 }
 0x150   : > { %v5652_v45 = vpop.f32.mrf.mxu1  ;;  %v3894_v48 = vpop.f32.mrf.mxu0  ;;  %1870 = vmatprep.subr.mxu1 %v7063_v30 }
 0x151   : > { %1871 = vmatpush2.msra.mxu1 %v1790_v50 }
 0x152   : > { %v3895_v49 = vpop.f32.mrf.mxu0  ;;  %1872 = vmatprep.subr.mxu1 %v7063_v30 }
 0x153   : > { %v3896_v56 = vadd.f32 %v3895_v49, %v3894_v48  ;;  %1873 = vmatpush2.msra.mxu1 %v1789_v52 }
 0x154   : > { %v5662_v51 = vpop.f32.mrf.mxu1  ;;  %1874 = vmatprep.subr.mxu1 %v7063_v30 }
 0x155   : > { %v5669_v53 = vadd.f32 %v3896_v56, %v5531_v1  ;;  %1875 = vmatpush2.msra.mxu1 %v1788_v59 }
 0x156   : > { %v5671_v57 = vpop.f32.mrf.mxu1  ;;  %v3897_v58 = vpop.f32.mrf.mxu0  ;;  %1876 = vmatprep.subr.mxu1 %v7063_v30 }
 0x157   : > { %7125 = vst [vmem:[#allocation5_spill] sm:$0xff] %v5669_v53  ;;  %1877 = vmatpush2.msra.mxu1 %v1787_v60  ;;  %v3961_v53 = vadd.f32 %v5652_v45, %v5643_v41  ;;  %v3964_v26 = vadd.f32 %v5671_v57, %v5662_v51 }
 0x158   : > { %v3898_v7 = vpop.f32.mrf.mxu0  ;;  %1878 = vmatprep.subr.mxu1 %v7063_v30 }
 0x159   : > { %v3899_v1 = vadd.f32 %v3898_v7, %v3897_v58 }
 0x15a   : > { %v5681_v61 = vpop.f32.mrf.mxu1 }
 0x15b   : > { %v5685_v62 = vadd.f32 %v3899_v1, %v5534_v10 }
 0x15c   : > { %v5687_v0 = vpop.f32.mrf.mxu1  ;;  %v4000_v2 = vpop.f32.mrf.mxu0 }
 0x15d   : > { %7126 = vst [vmem:[#allocation6_spill] sm:$0xff] %v5685_v62 }
 0x15e   : > { %v4001_v4 = vpop.f32.mrf.mxu0 }
 0x15f   : > { %v4068_v5 = vpop.f32.mrf.mxu1 }
 0x160   : > { %v4003_v6 = vpop.f32.mrf.mxu0 }
 0x161   : > { %v4069_v15 = vpop.f32.mrf.mxu1 }
 0x162   : > { %v4004_v8 = vpop.f32.mrf.mxu0 }
 0x163   : > { %v4071_v9 = vpop.f32.mrf.mxu1 }
 0x164   : > { %v4006_v11 = vpop.f32.mrf.mxu0 }
 0x165   : > { %v4072_v13 = vpop.f32.mrf.mxu1 }
 0x166   : > { %v4007_v16 = vpop.f32.mrf.mxu0  ;;  %v4073_v45 = vadd.f32 %v4072_v13, %v4071_v9 }
 0x167   : > { %v4074_v17 = vpop.f32.mrf.mxu1 }
 0x169   : > { %v4009_v23 = vpop.f32.mrf.mxu0  ;;  %v4075_v20 = vpop.f32.mrf.mxu1 }
 0x16b   : > { %v4010_v10 = vpop.f32.mrf.mxu0  ;;  %v4077_v24 = vpop.f32.mrf.mxu1 }
 0x16c   : > { %v4011_v54 = vadd.f32 %v4010_v10, %v4009_v23  ;;  %v7138_v10 = vld [vmem:[#allocation5_spill] sm:$0xff] }
 0x16d   : > { %v5690_v37 = vpop.f32.mrf.mxu0  ;;  %v4078_v25 = vpop.f32.mrf.mxu1 }
 0x16e   : > { %7127 = vst [vmem:[#allocation7_spill] sm:$0xff] %v5690_v37  ;;  %v4005_v37 = vadd.f32 %v4004_v8, %v4003_v6  ;;  %v4079_v57 = vadd.f32 %v4078_v25, %v4077_v24 }
 0x16f   : > { %v5692_v31 = vpop.f32.mrf.mxu0  ;;  %v5694_v28 = vpop.f32.mrf.mxu1 }
 0x170   : > { %7128 = vst [vmem:[#allocation8_spill] sm:$0xff] %v5692_v31  ;;  %7129 = vst [vmem:[#allocation9_spill] sm:$0xff] %v5694_v28  ;;  %v1366_v6 = vadd.f32 %v4005_v37, %v5548_v32  ;;  %v1786_v32 = vld [vmem:[%s7054_s3 + $0x80] sm:$0xff] }
 0x171   : > { %v4015_v29 = vpop.f32.mrf.mxu0  ;;  %v5696_v47 = vpop.f32.mrf.mxu1  ;;  %1879 = vmatpush2.msra.mxu1 %v1786_v32 }
 0x172   : > { %7130 = vst [vmem:[#allocation10_spill] sm:$0xff] %v5696_v47  ;;  %v1491_v37 = vadd.f32 %v4073_v45, %v1366_v6 }
 0x173   : > { %v4016_v55 = vpop.f32.mrf.mxu0  ;;  %v5698_v35 = vpop.f32.mrf.mxu1 }
 0x174   : > { %7131 = vst [vmem:[#allocation11_spill] sm:$0xff] %v5698_v35 }
 0x175   : > { %v4018_v36 = vpop.f32.mrf.mxu0  ;;  %v5700_v38 = vpop.f32.mrf.mxu1  ;;  %v7140_v9 = vld [vmem:[#allocation7_spill] sm:$0xff] }
 0x176   : > { %7132 = vst [vmem:[#allocation12_spill] sm:$0xff] %v5700_v38  ;;  %v3952_v38 = vadd.f32 %v5596_v18, %v5588_v12  ;;  %v1271_v18 = vadd.f32 %v3955_v14, %v5618_v27  ;;  %v4076_v14 = vadd.f32 %v4075_v20, %v4074_v17 }
 0x177   : > { %v4019_v40 = vpop.f32.mrf.mxu0  ;;  %v4086_v46 = vpop.f32.mrf.mxu1  ;;  %v7141_v13 = vld [vmem:[#allocation8_spill] sm:$0xff] }
 0x178   : > { %v4020_v27 = vadd.f32 %v4019_v40, %v4018_v36 }
 0x179   : > { %v4021_v42 = vpop.f32.mrf.mxu0  ;;  %v4087_v48 = vpop.f32.mrf.mxu1  ;;  %v7151_v6 = vld [vmem:[#allocation10_spill] sm:$0xff] }
 0x17a   : > { %v4088_v24 = vadd.f32 %v4087_v48, %v4086_v46 }
 0x17b   : > { %v4022_v63 = vpop.f32.mrf.mxu0  ;;  %v4089_v49 = vpop.f32.mrf.mxu1  ;;  %v7143_v36 = vld [vmem:[#allocation11_spill] sm:$0xff] }
 0x17d   : > { %v4024_v50 = vpop.f32.mrf.mxu0  ;;  %v4090_v56 = vpop.f32.mrf.mxu1 }
 0x17f   : > { %v4025_v52 = vpop.f32.mrf.mxu0  ;;  %v5702_v58 = vpop.f32.mrf.mxu1 }
 0x180   : > { %7133 = vst [vmem:[#allocation13_spill] sm:$0xff] %v5702_v58  ;;  %v3958_v58 = vadd.f32 %v5633_v34, %v5624_v33  ;;  %v4023_v33 = vadd.f32 %v4022_v63, %v4021_v42 }
 0x181   : > { %v4027_v59 = vpop.f32.mrf.mxu0  ;;  %v5704_v7 = vpop.f32.mrf.mxu1 }
 0x182   : > { %7134 = vst [vmem:[#allocation14_spill] sm:$0xff] %v5704_v7  ;;  %v4002_v7 = vadd.f32 %v4001_v4, %v4000_v2  ;;  %v1276_v22 = vadd.f32 %v3958_v58, %v5631_v39  ;;  %v3967_v2 = vadd.f32 %v5687_v0, %v5681_v61  ;;  %v1281_v39 = vadd.f32 %v3961_v53, %v5650_v44 }
 0x183   : > { %v4028_v60 = vpop.f32.mrf.mxu0  ;;  %v4095_v1 = vpop.f32.mrf.mxu1  ;;  %v1286_v61 = vadd.f32 %v3964_v26, %v7138_v10  ;;  %v1396_v0 = vadd.f32 %v4023_v33, %v1271_v18  ;;  %v4014_v44 = vadd.f32 %v7141_v13, %v7140_v9  ;;  %v4026_v53 = vadd.f32 %v4025_v52, %v4024_v50  ;;  %v7145_v52 = vld [vmem:[#allocation3_spill] sm:$0xff] }
 0x184   : > { %v1361_v4 = vadd.f32 %v4002_v7, %v5537_v21  ;;  %v4091_v21 = vadd.f32 %v4090_v56, %v4089_v49 }
 0x185   : > { %v5706_v30 = vpop.f32.mrf.mxu0  ;;  %v4096_v28 = vpop.f32.mrf.mxu1  ;;  %v1401_v18 = vadd.f32 %v4026_v53, %v1276_v22 }
 0x186   : > { %7135 = vst [vmem:[#allocation15_spill] sm:$0xff] %v5706_v30  ;;  %v4008_v30 = vadd.f32 %v4007_v16, %v4006_v11  ;;  %v7137_v11 = vld [vmem:[#allocation2_spill] sm:$0xff]  ;;  %v4017_v16 = vadd.f32 %v4016_v55, %v4015_v29  ;;  %v7142_v29 = vld [vmem:[#allocation4_spill] sm:$0xff]  ;;  %v4097_v58 = vadd.f32 %v4096_v28, %v4095_v1  ;;  %v1521_v50 = vadd.f32 %v4091_v21, %v1396_v0 }
 0x187   : > { %v5708_v47 = vpop.f32.mrf.mxu0  ;;  %v5716_v31 = vpop.f32.mrf.mxu1  ;;  %v1376_v51 = vadd.f32 %v4011_v54, %v7137_v11 }
 0x188   : > { %7136 = vst [vmem:[#allocation16_spill] sm:$0xff] %v5708_v47  ;;  %v1266_v47 = vadd.f32 %v3952_v38, %v5603_v19  ;;  %v4070_v19 = vadd.f32 %v4069_v15, %v4068_v5  ;;  %v1371_v8 = vadd.f32 %v4008_v30, %v5559_v43  ;;  %v4029_v5 = vadd.f32 %v4028_v60, %v4027_v59  ;;  %v7139_v30 = vld [vmem:[#allocation6_spill] sm:$0xff]  ;;  %v7144_v38 = vld [vmem:[#allocation12_spill] sm:$0xff] }
 0x189   : > { %v4033_v3 = vpop.f32.mrf.mxu0  ;;  %v4099_v34 = vpop.f32.mrf.mxu1  ;;  %v1291_v43 = vadd.f32 %v3967_v2, %v7139_v30  ;;  %v1386_v55 = vadd.f32 %v4017_v16, %v7142_v29  ;;  %v4085_v40 = vadd.f32 %v7144_v38, %v7143_v36  ;;  %v1501_v63 = vadd.f32 %v4079_v57, %v1376_v51  ;;  %v7147_v46 = vld [vmem:[#allocation14_spill] sm:$0xff] }
 0x18a   : > { %v1486_v54 = vadd.f32 %v4070_v19, %v1361_v4  ;;  %v1391_v20 = vadd.f32 %v4020_v27, %v1266_v47  ;;  %v1496_v25 = vadd.f32 %v4076_v14, %v1371_v8  ;;  %v1406_v56 = vadd.f32 %v4029_v5, %v1281_v39  ;;  %v7146_v47 = vld [vmem:[#allocation13_spill] sm:$0xff] }
 0x18b   : > { %v4034_v35 = vpop.f32.mrf.mxu0  ;;  %v4101_v15 = vpop.f32.mrf.mxu1  ;;  %v1381_v60 = vadd.f32 %v4014_v44, %v7145_v52  ;;  %v4094_v48 = vadd.f32 %v7147_v46, %v7146_v47  ;;  %v7150_v19 = vld [vmem:[#allocation9_spill] sm:$0xff]  ;;  %v1511_v14 = vadd.f32 %v4085_v40, %v1386_v55  ;;  %v4100_v16 = vadd.f32 %v4099_v34, %v5716_v31  ;;  %v1930_v52 = vld [vmem:[%s7056_s5 + $0x50] sm:$0xff] }
 0x18c   : > { %v4035_v42 = vadd.f32 %v4034_v35, %v4033_v3  ;;  %v4082_v3 = vadd.f32 %v7151_v6, %v7150_v19  ;;  %v1516_v8 = vadd.f32 %v4088_v24, %v1391_v20  ;;  %v1531_v51 = vadd.f32 %v4097_v58, %v1406_v56  ;;  %v1934_v56 = vld [vmem:[%s7056_s5 + $0x70] sm:$0xff] }
 0x18d   : > { %v4250_v62 = vpop.f32.mrf.mxu0  ;;  %v4102_v59 = vpop.f32.mrf.mxu1  ;;  %v7148_v26 = vld [vmem:[#allocation15_spill] sm:$0xff]  ;;  %v1526_v21 = vadd.f32 %v4094_v48, %v1401_v18  ;;  %v7152_v58 = vmov 0.0  }
 0x18e   : > { %v1616_v7 = vadd.f32 %v4250_v62, %v1491_v37  ;;  %v1416_v28 = vadd.f32 %v4035_v42, %v1291_v43  ;;  %v4103_v1 = vadd.f32 %v4102_v59, %v4101_v15  ;;  %v1506_v15 = vadd.f32 %v4082_v3, %v1381_v60  ;;  %v1933_v59 = vld [vmem:[%s7056_s5 + $0x68] sm:$0xff]  ;;  %4298 = vmatprep.mubr.msk.f32.mxu0 %vm4627_vm10, %v7152_v58 }
 0x18f   : > { %v1610_v12 = vpop.f32.mrf.mxu0  ;;  %v7149_v33 = vld [vmem:[#allocation16_spill] sm:$0xff]  ;;  %v1687_v60 = vlaneseq }
 0x190   : > { %v4032_v2 = vadd.f32 %v7149_v33, %v7148_v26  ;;  %v1611_v35 = vadd.f32 %v1610_v12, %v1486_v54  ;;  %v1670_v39 = vmax.f32 %v1616_v7, 0.0  ;;  %v1541_v9 = vadd.f32 %v4103_v1, %v1416_v28  ;;  %v1932_v7 = vld [vmem:[%s7056_s5 + $0x60] sm:$0xff] }
 0x191   : > { %v4253_v41 = vpop.f32.mrf.mxu0  ;;  %v5795_v18 = vshrl.u32 %v1687_v60, 7 }
 0x192   : > { %v1626_v62 = vadd.f32 %v4253_v41, %v1501_v63  ;;  %v1411_v57 = vadd.f32 %v4032_v2, %v1286_v61  ;;  %v1669_v5 = vmax.f32 %v1611_v35, 0.0 }
 0x193   : > { %v1620_v23 = vpop.f32.mrf.mxu0  ;;  %7153 = vst [vmem:[#allocation2_spill] sm:$0xff] %v5795_v18  ;;  %v1691_v47 = vcvt.s32.f32 %v5795_v18  ;;  %v5799_v46 = vadd.s32 8, %v5795_v18  ;;  %v5805_v33 = vadd.s32 16, %v5795_v18 }
 0x194   : > { %v1621_v10 = vadd.f32 %v1620_v23, %v1496_v25  ;;  %v1672_v43 = vmax.f32 %v1626_v62, 0.0  ;;  %v1536_v31 = vadd.f32 %v4100_v16, %v1411_v57 }
 0x195   : > { %v4256_v17 = vpop.f32.mrf.mxu0  ;;  %v1694_v48 = vmul.f32 0.16666667, %v1691_v47  ;;  %v1692_v26 = vcvt.s32.f32 %v5799_v46  ;;  %v1693_v19 = vcvt.s32.f32 %v5805_v33 }
 0x196   : > { %v1636_v13 = vadd.f32 %v4256_v17, %v1511_v14  ;;  %v1671_v61 = vmax.f32 %v1621_v10, 0.0 }
 0x197   : > { %v1630_v49 = vpop.f32.mrf.mxu0  ;;  %v4398_v2 = vtrunc.f32 %v1694_v48  ;;  %v1696_v35 = vmul.f32 0.16666667, %v1693_v19  ;;  %v1920_v48 = vld [vmem:[%s7056_s5] sm:$0xff] }
 0x198   : > { %v1631_v34 = vadd.f32 %v1630_v49, %v1506_v15  ;;  %v1674_v29 = vmax.f32 %v1636_v13, 0.0  ;;  %v1935_v49 = vld [vmem:[%s7056_s5 + $0x78] sm:$0xff] }
 0x199   : > { %v4259_v4 = vpop.f32.mrf.mxu0  ;;  %4267 = vmatpush3.msra.mxu0 %v1935_v49  ;;  %v5810_v6 = vcvt.f32.s32 %v4398_v2  ;;  %v4402_v28 = vtrunc.f32 %v1696_v35  ;;  %v1927_v49 = vld [vmem:[%s7056_s5 + $0x38] sm:$0xff] }
 0x19a   : > { %v1646_v45 = vadd.f32 %v4259_v4, %v1521_v50  ;;  %v1673_v38 = vmax.f32 %v1631_v34, 0.0  ;;  %4268 = vmatprep.subr.mxu0 %v7152_v58  ;;  %v1931_v50 = vld [vmem:[%s7056_s5 + $0x58] sm:$0xff]  ;;  %v1695_v4 = vmul.f32 0.16666667, %v1692_v26 }
 0x19b   : > { %v1640_v27 = vpop.f32.mrf.mxu0  ;;  %4269 = vmatpush3.msra.mxu0 %v1934_v56  ;;  %v1925_v56 = vld [vmem:[%s7056_s5 + $0x28] sm:$0xff] }
 0x19c   : > { %v1676_v22 = vmax.f32 %v1646_v45, 0.0  ;;  %v1641_v11 = vadd.f32 %v1640_v27, %v1516_v8  ;;  %4270 = vmatprep.subr.mxu0 %v7152_v58  ;;  %v4400_v3 = vtrunc.f32 %v1695_v4  ;;  %v1700_v45 = vmul.u32 6, %v5810_v6 }
 0x19d   : > { %v4262_v0 = vpop.f32.mrf.mxu0  ;;  %4271 = vmatpush3.msra.mxu0 %v1933_v59  ;;  %v1924_v59 = vld [vmem:[%s7056_s5 + $0x20] sm:$0xff] }
 0x19e   : > { %v5750_v32 = vmax.f32 %v1670_v39, %v1676_v22  ;;  %v1675_v12 = vmax.f32 %v1641_v11, 0.0  ;;  %v1656_v30 = vadd.f32 %v4262_v0, %v1531_v51  ;;  %4272 = vmatprep.subr.mxu0 %v7152_v58  ;;  %v5815_v8 = vcvt.f32.s32 %v4400_v3 }
 0x19f   : > { %v1650_v41 = vpop.f32.mrf.mxu0  ;;  %4273 = vmatpush3.msra.mxu0 %v1932_v7  ;;  %v5819_v62 = vsub.s32 %v5795_v18, %v1700_v45  ;;  %v5823_v39 = vcvt.f32.s32 %v4402_v28  ;;  %v1923_v7 = vld [vmem:[%s7056_s5 + $0x18] sm:$0xff]  ;;  %v3625_v45 = vld [vmem:[%s7055_s4] ss:$0 sm:$0xff] }
 0x1a0   : > { %v5752_v44 = vmax.f32 %v1669_v5, %v1675_v12  ;;  %v1678_v53 = vmax.f32 %v1656_v30, 0.0  ;;  %v1651_v54 = vadd.f32 %v1650_v41, %v1526_v21  ;;  %4274 = vmatprep.subr.mxu0 %v7152_v58  ;;  %v1701_v27 = vmul.u32 6, %v5815_v8 }
 0x1a1   : > { %v4265_v20 = vpop.f32.mrf.mxu0  ;;  %4275 = vmatpush3.msra.mxu0 %v1931_v50  ;;  %7154 = vst [vmem:[#allocation5_spill] sm:$0xff] %v5819_v62  ;;  %vm1706_vm3 = vcmp.eq.s32.totalorder %v5819_v62, 0  ;;  %v1702_v57 = vmul.u32 6, %v5823_v39  ;;  %vm1726_vm7 = vcmp.eq.s32.totalorder %v5819_v62, 5  ;;  %v1922_v50 = vld [vmem:[%s7056_s5 + $0x10] sm:$0xff] }
 0x1a2   : > { %v5754_v23 = vmax.f32 %v1672_v43, %v1678_v53  ;;  %v1677_v24 = vmax.f32 %v1651_v54, 0.0  ;;  %v1666_v37 = vadd.f32 %v4265_v20, %v1541_v9  ;;  %1745 = vrot.lane.b32.xlu0 %v5752_v44, %s4626_s22  ;;  %4276 = vmatprep.subr.mxu0 %v7152_v58  ;;  %v5829_v51 = vsub.s32 %v5799_v46, %v1701_v27 }
 0x1a3   : > { %v1660_v25 = vpop.f32.mrf.mxu0  ;;  %4277 = vmatpush3.msra.mxu0 %v1930_v52  ;;  %v1732_v5 = vrot.slane %v5752_v44, 1  ;;  %v5840_v30 = vsub.s32 %v5805_v33, %v1702_v57  ;;  %v1733_v9 = vrot.slane %v5750_v32, 1  ;;  %v1921_v52 = vld [vmem:[%s7056_s5 + $0x8] sm:$0xff] }
 0x1a4   : > { %v5757_v55 = vmax.f32 %v1671_v61, %v1677_v24  ;;  %v1680_v17 = vmax.f32 %v1666_v37, 0.0  ;;  %v1661_v36 = vadd.f32 %v1660_v25, %v1536_v31  ;;  %3626 = vmatprep.mubr.msk.f32.mxu1 %vm1763_vm2, %v5754_v23  ;;  %4278 = vmatprep.subr.mxu0 %v7152_v58  ;;  %v1714_v14 = vrot.slane %v5754_v23, 7  ;;  %7155 = vst [vmem:[#allocation6_spill] sm:$0xff] %v5829_v51 }
 0x1a5   : > { %vm1707_vm4 = vcmp.eq.s32.totalorder %v5829_v51, 0  ;;  %7156 = vst [vmem:[#allocation7_spill] sm:$0xff] %v5840_v30  ;;  %vm1708_vm6 = vcmp.eq.s32.totalorder %v5840_v30, 0  ;;  %v1734_v54 = vsel %vm1731_vm5, %v1732_v5, %v1733_v9  ;;  %vm1727_vm8 = vcmp.eq.s32.totalorder %v5829_v51, 5 }
 0x1a6   : > { %v5761_v40 = vmax.f32 %v1674_v29, %v1680_v17  ;;  %v1679_v42 = vmax.f32 %v1661_v36, 0.0  ;;  %1749 = vrot.lane.b32.xlu1 %v5757_v55, %s4626_s22  ;;  %1747 = vrot.lane.b32.xlu0 %v5750_v32, %s4626_s22  ;;  %v1713_v1 = vrot.slane %v5757_v55, 7  ;;  %v1735_v61 = vrot.slane %v5757_v55, 1 }
 0x1a7   : > { %v1742_v24 = vsel %vm1726_vm7, 0.0, %v1734_v54  ;;  %v1737_v29 = vrot.slane %v5754_v23, 1  ;;  %vm1728_vm9 = vcmp.eq.s32.totalorder %v5840_v30, 5 }
 0x1a8   : > { %v5765_v63 = vmax.f32 %v1673_v38, %v1679_v42  ;;  %v1715_v11 = vsel %vm790_vm0, %v1713_v1, %v1714_v14  ;;  %v1718_v12 = vrot.slane %v5761_v40, 7  ;;  %v1736_v37 = vsel %vm1731_vm5, %v1733_v9, %v1735_v61 }
 0x1a9   : > { %v1723_v16 = vsel %vm1706_vm3, 0.0, %v1715_v11  ;;  %v1743_v36 = vsel %vm1727_vm8, 0.0, %v1736_v37  ;;  %v1738_v38 = vsel %vm1731_vm5, %v1735_v61, %v1737_v29  ;;  %v2065_v37 = vmul.f32 0.041666668, %v1691_v47 }
 0x1aa   : > { %1751 = vrot.lane.b32.xlu1 %v5754_v23, %s4626_s22  ;;  %1753 = vrot.lane.b32.xlu0 %v5765_v63, %s4626_s22  ;;  %v1716_v22 = vrot.slane %v5765_v63, 7  ;;  %v1929_v23 = vld [vmem:[%s7056_s5 + $0x48] sm:$0xff] }
 0x1ab   : > { %4279 = vmatpush3.msra.mxu0 %v1929_v23  ;;  %v4404_v29 = vtrunc.f32 %v2065_v37 }
 0x1ac   : > { %v1717_v21 = vsel %vm790_vm0, %v1714_v14, %v1716_v22  ;;  %v1719_v53 = vsel %vm790_vm0, %v1716_v22, %v1718_v12  ;;  %4280 = vmatprep.subr.mxu0 %v7152_v58 }
 0x1ad   : > { %v1724_v41 = vsel %vm1707_vm4, 0.0, %v1717_v21  ;;  %v1725_v20 = vsel %vm1708_vm6, 0.0, %v1719_v53 }
 0x1ae   : > { %1755 = vrot.lane.b32.xlu1 %v5761_v40, %s4626_s22 }
 0x214   : > { %v1746_v10 = vpop.permute.xlu0 %1745 }
 0x215   : > { %v1764_v0 = vsel %vm1763_vm2, %v1723_v16, %v1746_v10 }
 0x216   : > { %1881 = vmatmul.mubr.f32.vlgmr.msra.gmra.mxu1 %v1764_v0 }
 0x217   : > { %3627 = vmatprep.mubr.msk.f32.mxu1 %vm1763_vm2, %v5765_v63  ;;  %v1744_v63 = vsel %vm1728_vm9, 0.0, %v1738_v38 }
 0x218   : > { %v1750_v43 = vpop.permute.xlu1 %1749  ;;  %v1748_v15 = vpop.permute.xlu0 %1747 }
 0x219   : > { %v1765_v13 = vsel %vm1763_vm2, %v1724_v41, %v1748_v15  ;;  %v1766_v31 = vsel %vm1763_vm2, %v1725_v20, %v1750_v43 }
 0x21a   : > { %1886 = vmatmul.mubr.f32.gmra.mxu1 %v1765_v13 }
 0x21b   : > { %3628 = vmatprep.mubr.msk.f32.mxu1 %vm1763_vm2, %v5761_v40 }
 0x21c   : > { %v1752_v34 = vpop.permute.xlu1 %1751  ;;  %v1754_v17 = vpop.permute.xlu0 %1753 }
 0x21d   : > { %v1767_v25 = vsel %vm1763_vm2, %v5752_v44, %v1752_v34  ;;  %v1768_v40 = vsel %vm1763_vm2, %v5750_v32, %v1754_v17  ;;  %v1928_v32 = vld [vmem:[%s7056_s5 + $0x40] sm:$0xff]  ;;  %v5915_v34 = vand.u32 127, %v1687_v60 }
 0x21e   : > { %1891 = vmatmul.mubr.f32.gmra.mxu1 %v1766_v31  ;;  %4281 = vmatpush3.msra.mxu0 %v1928_v32  ;;  %v3632_v60 = vld [vmem:[%s7057_s6] ss:$0 sm:$0xff] }
 0x21f   : > { %3629 = vmatprep.mubr.msk.f32.mxu1 %vm1763_vm2, %v1742_v24  ;;  %4282 = vmatprep.subr.mxu0 %v7152_v58  ;;  %7157 = vst [vmem:[#allocation8_spill] sm:$0xff] %v5915_v34  ;;  %v5918_v24 = vcvt.s32.f32 %v5915_v34 }
 0x220   : > { %v1756_v42 = vpop.permute.xlu1 %1755  ;;  %4283 = vmatpush3.msra.mxu0 %v1927_v49 }
 0x221   : > { %v1769_v44 = vsel %vm1763_vm2, %v5757_v55, %v1756_v42  ;;  %4284 = vmatprep.subr.mxu0 %v7152_v58  ;;  %v1926_v55 = vld [vmem:[%s7056_s5 + $0x30] sm:$0xff]  ;;  %7158 = vst [vmem:[#allocation4_spill] sm:$0xff] %v5918_v24 }
 0x222   : > { %1896 = vmatmul.mubr.f32.gmra.mxu1 %v1767_v25  ;;  %4285 = vmatpush3.msra.mxu0 %v1926_v55  ;;  %v2116_v25 = vmul.f32 0.33333334, %v5918_v24 }
 0x223   : > { %3630 = vmatprep.mubr.msk.f32.mxu1 %vm1763_vm2, %v1743_v36  ;;  %4286 = vmatprep.subr.mxu0 %v7152_v58  ;;  %v5923_v36 = vcvt.f32.s32 %v4404_v29 }
 0x224   : > { %4287 = vmatpush3.msra.mxu0 %v1925_v56  ;;  %v4452_v17 = vtrunc.f32 %v2116_v25 }
 0x225   : > { %4288 = vmatprep.subr.mxu0 %v7152_v58  ;;  %7159 = vst [vmem:[#allocation11_spill] sm:$0xff] %v5923_v36 }
 0x226   : > { %1901 = vmatmul.mubr.f32.gmra.mxu1 %v1768_v40  ;;  %4289 = vmatpush3.msra.mxu0 %v1924_v59  ;;  %v5925_v38 = vcvt.f32.s32 %v4452_v17  ;;  %v2067_v40 = vmul.f32 0.041666668, %v1693_v19 }
 0x227   : > { %3631 = vmatprep.mubr.msk.f32.mxu1 %vm1763_vm2, %v1744_v63  ;;  %4290 = vmatprep.subr.mxu0 %v7152_v58 }
 0x228   : > { %4291 = vmatpush3.msra.mxu0 %v1923_v7  ;;  %7160 = vst [vmem:[#allocation12_spill] sm:$0xff] %v5925_v38  ;;  %vm2118_vm11 = vcmp.eq.s32.totalorder %v5923_v36, %v5925_v38  ;;  %v4408_v47 = vtrunc.f32 %v2067_v40 }
 0x229   : > { %4292 = vmatprep.subr.mxu0 %v7152_v58 }
 0x22a   : > { %1906 = vmatmul.mubr.f32.gmra.mxu1 %v1769_v44  ;;  %4293 = vmatpush3.msra.mxu0 %v1922_v50  ;;  %v5941_v19 = vcvt.f32.s32 %v4408_v47  ;;  %v5960_v50 = vadd.s32 24, %v5795_v18 }
 0x22b   : > { %4294 = vmatprep.subr.mxu0 %v7152_v58 }
 0x22c   : > { %4295 = vmatpush3.msra.mxu0 %v1921_v52  ;;  %7162 = vst [vmem:[#allocation13_spill] sm:$0xff] %v5941_v19  ;;  %vm2120_vm13 = vcmp.eq.s32.totalorder %v5941_v19, %v5925_v38  ;;  %v5963_v52 = vadd.s32 32, %v5795_v18 }
 0x22d   : > { %4296 = vmatprep.subr.mxu0 %v7152_v58 }
 0x22e   : > { %4297 = vmatpush3.msra.mxu0 %v1920_v48  ;;  %v5966_v48 = vadd.s32 48, %v5795_v18 }
 0x2d6   : > { %v1882_v2 = vpop.f32.mrf.mxu1 }
 0x2d7   : > { %v1883_v14 = vadd.f32 %v3625_v45, %v1882_v2  ;;  %v7083_v2 = vcvt.s32.f32 %v5960_v50 }
 0x2d8   : > { %v1884_v4 = vpop.f32.mrf.mxu1 }
 0x2d9   : > { %v1911_v57 = vmax.f32 %v1883_v14, 0.0  ;;  %v5970_v4 = vadd.s32 40, %v5795_v18  ;;  %v5980_v14 = vadd.s32 56, %v5795_v18 }
 0x2da   : > { %v1887_v3 = vpop.f32.mrf.mxu1 }
 0x2db   : > { %v1888_v16 = vadd.f32 %v3625_v45, %v1887_v3  ;;  %v7078_v3 = vcvt.s32.f32 %v5963_v52  ;;  %v7171_v30 = vcvt.s32.f32 %v5980_v14 }
 0x2dc   : > { %v1889_v35 = vpop.f32.mrf.mxu1 }
 0x2dd   : > { %v1912_v43 = vmax.f32 %v1888_v16, 0.0  ;;  %v7075_v35 = vcvt.s32.f32 %v5966_v48  ;;  %v2170_v34 = vmul.f32 0.16666667, %v7171_v30 }
 0x2de   : > { %v1892_v28 = vpop.f32.mrf.mxu1 }
 0x2df   : > { %v1893_v15 = vadd.f32 %v3625_v45, %v1892_v28  ;;  %v2066_v28 = vmul.f32 0.041666668, %v1692_v26 }
 0x2e0   : > { %v1894_v1 = vpop.f32.mrf.mxu1 }
 0x2e1   : > { %v1913_v61 = vmax.f32 %v1893_v15, 0.0  ;;  %v7079_v1 = vcvt.s32.f32 %v5970_v4  ;;  %v4406_v26 = vtrunc.f32 %v2066_v28 }
 0x2e2   : > { %v1897_v27 = vpop.f32.mrf.mxu1 }
 0x2e3   : > { %v1898_v22 = vadd.f32 %v3625_v45, %v1897_v27  ;;  %v2069_v27 = vmul.f32 0.041666668, %v7078_v3 }
 0x2e4   : > { %v1899_v11 = vpop.f32.mrf.mxu1 }
 0x2e5   : > { %v1914_v10 = vmax.f32 %v1898_v22, 0.0  ;;  %v5985_v22 = vadd.s32 64, %v5795_v18  ;;  %v2071_v11 = vmul.f32 0.041666668, %v7075_v35 }
 0x2e6   : > { %v1902_v0 = vpop.f32.mrf.mxu1 }
 0x2e7   : > { %v1917_v21 = vmax.f32 %v1911_v57, %v1914_v10  ;;  %v1903_v5 = vadd.f32 %v3625_v45, %v1902_v0  ;;  %v5990_v57 = vadd.s32 72, %v5795_v18  ;;  %v2070_v10 = vmul.f32 0.041666668, %v7079_v1 }
 0x2e8   : > { %v1904_v12 = vpop.f32.mrf.mxu1  ;;  %v7076_v0 = vcvt.s32.f32 %v5980_v14  ;;  %v4416_v15 = vtrunc.f32 %v2071_v11  ;;  %v6193_v1 = vadd.s32 184, %v5795_v18 }
 0x2e9   : > { %v1915_v41 = vmax.f32 %v1903_v5, 0.0  ;;  %4299 = vmatmul.mubr.f32.vlgmr.msra.gmra.mxu0 %v1917_v21  ;;  %v4412_v5 = vtrunc.f32 %v2069_v27  ;;  %v7072_v12 = vcvt.s32.f32 %v5985_v22 }
 0x2ea   : > { %v1907_v9 = vpop.f32.mrf.mxu1  ;;  %4301 = vmatprep.mubr.msk.f32.mxu0 %vm4627_vm10, %v7152_v58  ;;  %v6027_v17 = vcvt.f32.s32 %v4416_v15 }
 0x2eb   : > { %v1918_v13 = vmax.f32 %v1912_v43, %v1915_v41  ;;  %v1908_v53 = vadd.f32 %v3625_v45, %v1907_v9  ;;  %v2068_v45 = vmul.f32 0.041666668, %v7083_v2  ;;  %v6001_v43 = vadd.s32 80, %v5795_v18 }
 0x2ec   : > { %v1909_v54 = vpop.f32.mrf.mxu1  ;;  %v7074_v41 = vcvt.s32.f32 %v5990_v57  ;;  %v6020_v37 = vcvt.f32.s32 %v4412_v5  ;;  %v2073_v25 = vmul.f32 0.041666668, %v7072_v12  ;;  %vm2124_vm1 = vcmp.eq.s32.totalorder %v6027_v17, %v5925_v38 }
 0x2ed   : > { %v1916_v20 = vmax.f32 %v1908_v53, 0.0  ;;  %4302 = vmatmul.mubr.f32.gmra.mxu0 %v1918_v13  ;;  %v4410_v46 = vtrunc.f32 %v2068_v45  ;;  %v6009_v53 = vadd.s32 96, %v5795_v18  ;;  %v6011_v54 = vcvt.f32.s32 %v4406_v26 }
 0x2ee   : > { %4304 = vmatprep.mubr.msk.f32.mxu0 %vm4627_vm10, %v7152_v58  ;;  %7165 = vst [vmem:[#allocation16_spill] sm:$0xff] %v6020_v37  ;;  %v7069_v29 = vcvt.s32.f32 %v6001_v43  ;;  %v2074_v40 = vmul.f32 0.041666668, %v7074_v41  ;;  %vm2122_vm0 = vcmp.eq.s32.totalorder %v6020_v37, %v5925_v38  ;;  %v6054_v45 = vadd.s32 120, %v5795_v18 }
 0x2ef   : > { %v1919_v31 = vmax.f32 %v1913_v61, %v1916_v20  ;;  %v6006_v13 = vcvt.f32.s32 %v4410_v46  ;;  %7164 = vst [vmem:[#allocation15_spill] sm:$0xff] %v6011_v54  ;;  %v4414_v61 = vtrunc.f32 %v2070_v10  ;;  %v2072_v20 = vmul.f32 0.041666668, %v7076_v0 }
 0x2f0   : > { %vm7118_vm15 = vcmp.eq.s32.totalorder %v6011_v54, %v5925_v38  ;;  %v6174_v41 = vadd.s32 176, %v5795_v18  ;;  %v7097_v2 = vcvt.s32.f32 %v6193_v1 }
 0x2f1   : > { %4305 = vmatmul.mubr.f32.gmra.mxu0 %v1919_v31  ;;  %v6016_v31 = vadd.s32 88, %v5795_v18  ;;  %vm2121_vm14 = vcmp.eq.s32.totalorder %v6006_v13, %v5925_v38  ;;  %v6039_v47 = vcvt.f32.s32 %v4414_v61  ;;  %v7066_v61 = vcvt.s32.f32 %v6054_v45 }
 0x2f3   : > { %7166 = vst [vmem:[#allocation9_spill] sm:$0xff] %v6039_v47  ;;  %vm2123_vm2 = vcmp.eq.s32.totalorder %v6039_v47, %v5925_v38  ;;  %v2213_v30 = vmul.u32 4, %v6039_v47 }
 0x3a9   : > { %v2009_v42 = vpop.f32.mrf.mxu0 }
 0x3aa   : > { %v5934_v63 = vadd.f32 %v3632_v60, %v2009_v42  ;;  %v6035_v42 = vadd.s32 104, %v5795_v18 }
 0x3ab   : > { %v4300_v44 = vpop.f32.mrf.mxu0 }
 0x3ac   : > { %7161 = vst [vmem:[#allocation3_spill] sm:$0xff] %v5934_v63  ;;  %v2142_v23 = vsel %vm2118_vm11, %v5934_v63, 0.0  ;;  %v4418_v44 = vtrunc.f32 %v2072_v20  ;;  %v2145_v27 = vsel %vm2121_vm14, %v5934_v63, 0.0  ;;  %v6088_v20 = vadd.s32 144, %v5795_v18 }
 0x3ad   : > { %v2014_v33 = vpop.f32.mrf.mxu0  ;;  %4313 = vmatprep.mubr.msk.f32.mxu0 %vm2315_vm12, %v2142_v23  ;;  %v7070_v23 = vcvt.s32.f32 %v6016_v31 }
 0x3ae   : > { %v5943_v32 = vadd.f32 %v3632_v60, %v2014_v33  ;;  %v6075_v26 = vcvt.f32.s32 %v4418_v44 }
 0x3af   : > { %v4303_v49 = vpop.f32.mrf.mxu0  ;;  %v2076_v10 = vmul.f32 0.041666668, %v7070_v23 }
 0x3b0   : > { %7163 = vst [vmem:[#allocation14_spill] sm:$0xff] %v5943_v32  ;;  %2311 = vrot.lane.b32.xlu1 %v5943_v32, %s4628_s20  ;;  %v4420_v49 = vtrunc.f32 %v2073_v25  ;;  %v2143_v28 = vsel %vm7118_vm15, %v5943_v32, 0.0  ;;  %v2146_v46 = vsel %vm2122_vm0, %v5943_v32, 0.0  ;;  %vm7090_vm3 = vcmp.eq.s32.totalorder %v6075_v26, %v5925_v38 }
 0x3b1   : > { %v2019_v55 = vpop.f32.mrf.mxu0 }
 0x3b2   : > { %v5948_v56 = vadd.f32 %v3632_v60, %v2019_v55  ;;  %v7067_v60 = vcvt.s32.f32 %v6009_v53  ;;  %v2075_v55 = vmul.f32 0.041666668, %v7069_v29 }
 0x3b3   : > { %v4306_v59 = vpop.f32.mrf.mxu0 }
 0x3b4   : > { %2313 = vrot.lane.b32.xlu0 %v5948_v56, %s4628_s20  ;;  %v2144_v7 = vsel %vm2120_vm13, %v5948_v56, 0.0  ;;  %v6049_v59 = vadd.s32 112, %v5795_v18  ;;  %v2077_v11 = vmul.f32 0.041666668, %v7067_v60  ;;  %v4424_v5 = vtrunc.f32 %v2075_v55 }
 0x3b5   : > { %4316 = vmatprep.mubr.msk.f32.mxu1 %vm2315_vm12, %v2144_v7  ;;  %v4422_v7 = vtrunc.f32 %v2074_v40  ;;  %v2147_v25 = vsel %vm2123_vm2, %v5948_v56, 0.0  ;;  %v4426_v55 = vtrunc.f32 %v2076_v10  ;;  %v7073_v10 = vcvt.s32.f32 %v6088_v20 }
 0x3b6   : > { %v7065_v15 = vcvt.s32.f32 %v6049_v59  ;;  %v4428_v44 = vtrunc.f32 %v2077_v11 }
 0x3b7   : > { %v6094_v40 = vcvt.f32.s32 %v4422_v7  ;;  %v6111_v7 = vcvt.f32.s32 %v4424_v5 }
 0x3b8   : > { %2309 = vrot.lane.b32.xlu0 %v5934_v63, %s4628_s20  ;;  %v6125_v5 = vcvt.f32.s32 %v4428_v44 }
 0x3b9   : > { %vm2127_vm5 = vcmp.eq.s32.totalorder %v6094_v40, %v5925_v38  ;;  %vm7080_vm6 = vcmp.eq.s32.totalorder %v6111_v7, %v5925_v38 }
 0x3ba   : > { %v2151_v23 = vsel %vm2127_vm5, %v5934_v63, 0.0  ;;  %vm7119_vm7 = vcmp.eq.s32.totalorder %v6125_v5, %v5925_v38 }
 0x3bc   : > { %2847 = vrot.lane.b32.xlu0 %v5948_v56, %s4629_s24 }
 0x422   : > { %v2312_v21 = vpop.permute.xlu1 %2311 }
 0x426   : > { %v2314_v16 = vpop.permute.xlu0 %2313 }
 0x427   : > { %4307 = vmatprep.subr.msk.mxu0 %vm2315_vm12, %v2314_v16  ;;  %4391 = vmatprep.subr.msk.mxu1 %vm2315_vm12, %v2314_v16 }
 0x428   : > { %4308 = vmatpush3.xpose.msk.msra.mxu0 %vm2315_vm12, %v2314_v16  ;;  %4394 = vmatpush3.xpose.msk.msra.mxu1 %vm2315_vm12, %v2314_v16  ;;  %v7068_v16 = vcvt.s32.f32 %v6035_v42 }
 0x429   : > { %4309 = vmatprep.subr.msk.mxu0 %vm2315_vm12, %v2312_v21  ;;  %4392 = vmatprep.subr.msk.mxu1 %vm2315_vm12, %v2312_v21 }
 0x42a   : > { %v2310_v9 = vpop.permute.xlu0 %2309 }
 0x42c   : > { %4310 = vmatpush3.xpose.msk.msra.mxu0 %vm2315_vm12, %v2312_v21  ;;  %4395 = vmatpush3.xpose.msk.msra.mxu1 %vm2315_vm12, %v2312_v21  ;;  %v6080_v21 = vcvt.f32.s32 %v4420_v49  ;;  %v2148_v49 = vsel %vm2124_vm1, %v5934_v63, 0.0 }
 0x42d   : > { %4311 = vmatprep.subr.msk.mxu0 %vm2315_vm12, %v2310_v9  ;;  %4393 = vmatprep.subr.msk.mxu1 %vm2315_vm12, %v2310_v9 }
 0x42e   : > { %v2848_v33 = vpop.permute.xlu0 %2847  ;;  %vm2126_vm4 = vcmp.eq.s32.totalorder %v6080_v21, %v5925_v38 }
 0x430   : > { %4312 = vmatpush3.xpose.msk.msra.mxu0 %vm2315_vm12, %v2310_v9  ;;  %4396 = vmatpush3.xpose.msk.msra.mxu1 %vm2315_vm12, %v2310_v9  ;;  %v6084_v9 = vadd.s32 128, %v5795_v18 }
 0x431   : > { %4349 = vmatprep.subr.mxu0 %v2848_v33 }
 0x432   : > { %v7071_v11 = vcvt.s32.f32 %v6084_v9 }
 0x433   : > { %4314 = vmatmul.mubr.msk.f32.vlgmr.msra.gmra.mxu0 %vm2315_vm12, %v2143_v28  ;;  %4317 = vmatmul.mubr.msk.f32.vlgmr.msra.gmra.mxu1 %vm2315_vm12, %v2145_v27  ;;  %v6106_v28 = vadd.s32 136, %v5795_v18  ;;  %v2079_v27 = vmul.f32 0.041666668, %v7065_v15  ;;  %v2150_v15 = vsel %vm2126_vm4, %v5948_v56, 0.0 }
 0x434   : > { %4319 = vmatprep.mubr.msk.f32.mxu1 %vm2315_vm12, %v2146_v46  ;;  %4350 = vmatpush3.msra.mxu0 %v2848_v33  ;;  %v2078_v33 = vmul.f32 0.041666668, %v7068_v16  ;;  %v2080_v46 = vmul.f32 0.041666668, %v7066_v61  ;;  %v6132_v61 = vcvt.f32.s32 %v4426_v55  ;;  %v6136_v16 = vadd.s32 152, %v5795_v18 }
 0x435   : > { %v7077_v60 = vcvt.s32.f32 %v6106_v28  ;;  %v4432_v44 = vtrunc.f32 %v2079_v27  ;;  %v6147_v55 = vadd.s32 168, %v5795_v18  ;;  %v2083_v27 = vmul.f32 0.041666668, %v7073_v10 }
 0x436   : > { %v4434_v29 = vtrunc.f32 %v2080_v46  ;;  %v2152_v46 = vsel %vm7080_vm6, %v5943_v32, 0.0  ;;  %vm7120_vm8 = vcmp.eq.s32.totalorder %v6132_v61, %v5925_v38  ;;  %v7082_v12 = vcvt.s32.f32 %v6136_v16 }
 0x437   : > { %4320 = vmatmul.mubr.msk.f32.gmra.mxu1 %vm2315_vm12, %v2147_v25  ;;  %v2149_v25 = vsel %vm7090_vm3, %v5943_v32, 0.0  ;;  %v7085_v35 = vcvt.s32.f32 %v6147_v55  ;;  %v2153_v0 = vsel %vm7120_vm8, %v5948_v56, 0.0 }
 0x438   : > { %4322 = vmatprep.mubr.msk.f32.mxu1 %vm2315_vm12, %v2148_v49  ;;  %v4430_v49 = vtrunc.f32 %v2078_v33  ;;  %v2081_v33 = vmul.f32 0.041666668, %v7071_v11  ;;  %v2082_v11 = vmul.f32 0.041666668, %v7077_v60  ;;  %v6183_v60 = vcvt.f32.s32 %v4434_v29 }
 0x439   : > { %v2084_v3 = vmul.f32 0.041666668, %v7082_v12 }
 0x43a   : > { %v4436_v10 = vtrunc.f32 %v2081_v33  ;;  %v2154_v33 = vsel %vm7119_vm7, %v5934_v63, 0.0  ;;  %vm7093_vm6 = vcmp.eq.s32.totalorder %v6183_v60, %v5925_v38 }
 0x43b   : > { %4323 = vmatmul.mubr.msk.f32.gmra.mxu1 %vm2315_vm12, %v2149_v25  ;;  %v6144_v25 = vadd.s32 160, %v5795_v18  ;;  %v4442_v12 = vtrunc.f32 %v2084_v3 }
 0x43c   : > { %4325 = vmatprep.mubr.msk.f32.mxu1 %vm2315_vm12, %v2150_v15  ;;  %v6155_v15 = vcvt.f32.s32 %v4430_v49  ;;  %v6170_v49 = vcvt.f32.s32 %v4432_v44  ;;  %v4440_v44 = vtrunc.f32 %v2083_v27  ;;  %v6198_v29 = vcvt.f32.s32 %v4436_v10 }
 0x43e   : > { %vm7084_vm9 = vcmp.eq.s32.totalorder %v6155_v15, %v5925_v38  ;;  %vm7091_vm10 = vcmp.eq.s32.totalorder %v6170_v49, %v5925_v38  ;;  %v6222_v27 = vcvt.f32.s32 %v4440_v44  ;;  %v6237_v44 = vcvt.f32.s32 %v4442_v12 }
 0x43f   : > { %4326 = vmatmul.mubr.msk.f32.gmra.mxu1 %vm2315_vm12, %v2151_v23  ;;  %v7081_v23 = vcvt.s32.f32 %v6144_v25  ;;  %v2156_v10 = vsel %vm7091_vm10, %v5948_v56, 0.0 }
 0x440   : > { %4328 = vmatprep.mubr.msk.f32.mxu1 %vm2315_vm12, %v2152_v46  ;;  %v4438_v46 = vtrunc.f32 %v2082_v11  ;;  %v2155_v11 = vsel %vm7084_vm9, %v5943_v32, 0.0  ;;  %vm7092_vm9 = vcmp.eq.s32.totalorder %v6198_v29, %v5925_v38  ;;  %vm7094_vm10 = vcmp.eq.s32.totalorder %v6222_v27, %v5925_v38 }
 0x441   : > { %v2158_v3 = vsel %vm7092_vm9, %v5943_v32, 0.0  ;;  %v2160_v12 = vsel %vm7094_vm10, %v5934_v63, 0.0  ;;  %vm7096_vm9 = vcmp.eq.s32.totalorder %v6237_v44, %v5925_v38 }
 0x443   : > { %4329 = vmatmul.mubr.msk.f32.gmra.mxu1 %vm2315_vm12, %v2153_v0  ;;  %v2085_v0 = vmul.f32 0.041666668, %v7081_v23  ;;  %v6216_v23 = vcvt.f32.s32 %v4438_v46  ;;  %v2157_v46 = vsel %vm7093_vm6, %v5934_v63, 0.0 }
 0x444   : > { %4331 = vmatprep.mubr.msk.f32.mxu1 %vm2315_vm12, %v2154_v33  ;;  %v2086_v33 = vmul.f32 0.041666668, %v7085_v35 }
 0x445   : > { %v4444_v35 = vtrunc.f32 %v2085_v0  ;;  %vm7095_vm3 = vcmp.eq.s32.totalorder %v6216_v23, %v5925_v38  ;;  %v2088_v0 = vmul.f32 0.041666668, %v7097_v2  ;;  %v7170_v2 = vcvt.s32.f32 %v5963_v52 }
 0x446   : > { %v4446_v62 = vtrunc.f32 %v2086_v33  ;;  %v2208_v52 = vmul.u32 4, %v5923_v36  ;;  %v2214_v36 = vmul.u32 4, %v6027_v17 }
 0x447   : > { %4332 = vmatmul.mubr.msk.f32.gmra.mxu1 %vm2315_vm12, %v2155_v11  ;;  %v7167_v11 = vcvt.s32.f32 %v6174_v41  ;;  %v6244_v33 = vcvt.f32.s32 %v4444_v35  ;;  %v4450_v35 = vtrunc.f32 %v2088_v0  ;;  %v2167_v51 = vmul.f32 0.16666667, %v7170_v2 }
 0x448   : > { %4334 = vmatprep.mubr.msk.f32.mxu1 %vm2315_vm12, %v2156_v10  ;;  %v2210_v2 = vmul.u32 4, %v5941_v19 }
 0x449   : > { %v2087_v18 = vmul.f32 0.041666668, %v7167_v11  ;;  %v2159_v11 = vsel %vm7095_vm3, %v5948_v56, 0.0  ;;  %vm7116_vm6 = vcmp.eq.s32.totalorder %v6244_v33, %v5925_v38  ;;  %v6275_v0 = vcvt.f32.s32 %v4450_v35 }
 0x44a   : > { %v7168_v35 = vcvt.s32.f32 %v5960_v50  ;;  %v2209_v50 = vmul.u32 4, %v6011_v54  ;;  %v2234_v54 = vsub.s32 %v5823_v39, %v2210_v2 }
 0x44b   : > { %4335 = vmatmul.mubr.msk.f32.gmra.mxu1 %vm2315_vm12, %v2157_v46  ;;  %v4448_v10 = vtrunc.f32 %v2087_v18  ;;  %v6257_v46 = vcvt.f32.s32 %v4446_v62  ;;  %v2162_v62 = vsel %vm7116_vm6, %v5948_v56, 0.0 }
 0x44c   : > { %4337 = vmatprep.mubr.msk.f32.mxu1 %vm2315_vm12, %v2158_v3  ;;  %v2161_v3 = vsel %vm7096_vm9, %v5943_v32, 0.0  ;;  %vm7115_vm9 = vcmp.eq.s32.totalorder %v6275_v0, %v5925_v38 }
 0x44d   : > { %v6262_v18 = vcvt.f32.s32 %v4448_v10  ;;  %vm7117_vm10 = vcmp.eq.s32.totalorder %v6257_v46, %v5925_v38 }
 0x44e   : > { %v2163_v10 = vsel %vm7117_vm10, %v5934_v63, 0.0  ;;  %v4456_v63 = vtrunc.f32 %v2167_v51  ;;  %v2212_v51 = vmul.u32 4, %v6020_v37 }
 0x44f   : > { %4338 = vmatmul.mubr.msk.f32.gmra.mxu1 %vm2315_vm12, %v2159_v11  ;;  %vm7114_vm3 = vcmp.eq.s32.totalorder %v6262_v18, %v5925_v38 }
 0x450   : > { %4340 = vmatprep.mubr.msk.f32.mxu1 %vm2315_vm12, %v2160_v12  ;;  %v2164_v11 = vsel %vm7114_vm3, %v5943_v32, 0.0  ;;  %v2165_v12 = vsel %vm7115_vm9, %v5948_v56, 0.0  ;;  %v4457_v14 = vcvt.f32.s32 %v4456_v63  ;;  %v7174_v63 = vcvt.s32.f32 %v5985_v22 }
 0x452   : > { %v2171_v47 = vmul.f32 0.16666667, %v7174_v63 }
 0x453   : > { %4341 = vmatmul.mubr.msk.f32.gmra.mxu1 %vm2315_vm12, %v2161_v3  ;;  %v2166_v3 = vmul.f32 0.16666667, %v7168_v35  ;;  %v4462_v35 = vtrunc.f32 %v2170_v34  ;;  %v2215_v34 = vmul.u32 4, %v6075_v26 }
 0x454   : > { %4343 = vmatprep.mubr.msk.f32.mxu1 %vm2315_vm12, %v2162_v62  ;;  %v7169_v62 = vcvt.s32.f32 %v5970_v4  ;;  %v4464_v39 = vtrunc.f32 %v2171_v47 }
 0x455   : > { %v4454_v38 = vtrunc.f32 %v2166_v3 }
 0x457   : > { %4344 = vmatmul.mubr.msk.f32.gmra.mxu1 %vm2315_vm12, %v2163_v10  ;;  %v2168_v10 = vmul.f32 0.16666667, %v7169_v62  ;;  %v4455_v4 = vcvt.f32.s32 %v4454_v38  ;;  %v2211_v62 = vmul.u32 4, %v6006_v13 }
 0x458   : > { %4346 = vmatprep.mubr.msk.f32.mxu1 %vm2315_vm12, %v2164_v11  ;;  %v2256_v11 = vmul.f32 0.16666667, %v5918_v24 }
 0x459   : > { %v4458_v56 = vtrunc.f32 %v2168_v10  ;;  %v2233_v10 = vsub.s32 %v5815_v8, %v2209_v50  ;;  %v2235_v38 = vsub.s32 %v4455_v4, %v2211_v62  ;;  %v7175_v50 = vcvt.s32.f32 %v6016_v31 }
 0x45a   : > { %v4496_v32 = vtrunc.f32 %v2256_v11  ;;  %v4463_v11 = vcvt.f32.s32 %v4462_v35 }
 0x45b   : > { %4347 = vmatmul.mubr.msk.f32.gmra.mxu1 %vm2315_vm12, %v2165_v12  ;;  %v7172_v12 = vcvt.s32.f32 %v5966_v48  ;;  %v4459_v24 = vcvt.f32.s32 %v4458_v56  ;;  %v7173_v56 = vcvt.s32.f32 %v5990_v57  ;;  %v2174_v35 = vmul.f32 0.16666667, %v7175_v50 }
 0x45c   : > { %3309 = vmatprep.mubr.f32.mxu1 %v7152_v58  ;;  %v6315_v48 = vcvt.f32.s32 %v4496_v32  ;;  %v2239_v8 = vsub.s32 %v4463_v11, %v2215_v34  ;;  %v4630_v57 = vmov -1e+30  }
 0x45d   : > { %v2169_v58 = vmul.f32 0.16666667, %v7172_v12  ;;  %v2232_v12 = vsub.s32 %v5810_v6, %v2208_v52  ;;  %v2172_v19 = vmul.f32 0.16666667, %v7173_v56  ;;  %v2237_v37 = vsub.s32 %v4459_v24, %v2213_v30 }
 0x45e   : > { %vm2259_vm3 = vcmp.eq.s32.totalorder %v2233_v10, %v6315_v48  ;;  %vm2261_vm9 = vcmp.eq.s32.totalorder %v2235_v38, %v6315_v48  ;;  %vm2260_vm10 = vcmp.eq.s32.totalorder %v2234_v54, %v6315_v48  ;;  %v7176_v24 = vcvt.s32.f32 %v6001_v43 }
 0x45f   : > { %v4460_v3 = vtrunc.f32 %v2169_v58  ;;  %v2236_v58 = vsub.s32 %v4457_v14, %v2212_v51  ;;  %vm2258_vm6 = vcmp.eq.s32.totalorder %v2232_v12, %v6315_v48  ;;  %v4466_v6 = vtrunc.f32 %v2172_v19 }
 0x460   : > { %v2173_v22 = vmul.f32 0.16666667, %v7176_v24  ;;  %v2283_v4 = vsel %vm2259_vm3, 0.0, %v4630_v57  ;;  %vm2263_vm15 = vcmp.eq.s32.totalorder %v2237_v37, %v6315_v48  ;;  %vm2265_vm8 = vcmp.eq.s32.totalorder %v2239_v8, %v6315_v48 }
 0x461   : > { %v4461_v32 = vcvt.f32.s32 %v4460_v3  ;;  %vm2262_vm7 = vcmp.eq.s32.totalorder %v2236_v58, %v6315_v48  ;;  %v4470_v62 = vtrunc.f32 %v2174_v35  ;;  %v7177_v52 = vcvt.s32.f32 %v6035_v42 }
 0x462   : > { %v7178_v19 = vcvt.s32.f32 %v6009_v53  ;;  %v2285_v43 = vsel %vm2261_vm9, 0.0, %v4630_v57  ;;  %v2282_v47 = vsel %vm2258_vm6, 0.0, %v4630_v57  ;;  %v2284_v30 = vsel %vm2260_vm10, 0.0, %v4630_v57 }
 0x463   : > { %v2238_v31 = vsub.s32 %v4461_v32, %v2214_v36  ;;  %v2176_v2 = vmul.f32 0.16666667, %v7177_v52  ;;  %v2217_v37 = vmul.u32 4, %v6094_v40  ;;  %v4467_v14 = vcvt.f32.s32 %v4466_v6 }
 0x464   : > { %v2175_v54 = vmul.f32 0.16666667, %v7178_v19  ;;  %v4465_v51 = vcvt.f32.s32 %v4464_v39  ;;  %v2216_v36 = vmul.u32 4, %v6080_v21  ;;  %v4468_v3 = vtrunc.f32 %v2173_v22 }
 0x465   : > { %v2287_v10 = vsel %vm2263_vm15, 0.0, %v4630_v57  ;;  %v2286_v42 = vsel %vm2262_vm7, 0.0, %v4630_v57  ;;  %v2289_v53 = vsel %vm2265_vm8, 0.0, %v4630_v57  ;;  %vm2264_vm3 = vcmp.eq.s32.totalorder %v2238_v31, %v6315_v48 }
 0x466   : > { %v4471_v38 = vcvt.f32.s32 %v4470_v62  ;;  %v2219_v12 = vmul.u32 4, %v6132_v61  ;;  %v4474_v56 = vtrunc.f32 %v2176_v2  ;;  %v4472_v63 = vtrunc.f32 %v2175_v54 }
 0x467   : > { %v7179_v8 = vcvt.s32.f32 %v6054_v45  ;;  %v7180_v35 = vcvt.s32.f32 %v6049_v59  ;;  %v2288_v22 = vsel %vm2264_vm3, 0.0, %v4630_v57  ;;  %v2241_v31 = vsub.s32 %v4467_v14, %v2217_v37 }
 0x468   : > { %v2240_v62 = vsub.s32 %v4465_v51, %v2216_v36  ;;  %v4469_v52 = vcvt.f32.s32 %v4468_v3  ;;  %v2243_v54 = vsub.s32 %v4471_v38, %v2219_v12  ;;  %v2221_v37 = vmul.u32 4, %v6155_v15 }
 0x469   : > { %v2178_v50 = vmul.f32 0.16666667, %v7179_v8  ;;  %v2177_v6 = vmul.f32 0.16666667, %v7180_v35  ;;  %v4473_v14 = vcvt.f32.s32 %v4472_v63  ;;  %vm2267_vm15 = vcmp.eq.s32.totalorder %v2241_v31, %v6315_v48 }
 0x46a   : > { %vm2266_vm6 = vcmp.eq.s32.totalorder %v2240_v62, %v6315_v48  ;;  %v7181_v3 = vcvt.s32.f32 %v6106_v28  ;;  %v7182_v38 = vcvt.s32.f32 %v6084_v9  ;;  %vm2269_vm7 = vcmp.eq.s32.totalorder %v2243_v54, %v6315_v48 }
 0x46b   : > { %v4476_v51 = vtrunc.f32 %v2177_v6  ;;  %v2223_v9 = vmul.u32 4, %v6183_v60  ;;  %v2293_v31 = vsel %vm2269_vm7, 0.0, %v4630_v57 }
 0x46c   : > { %v2179_v12 = vmul.f32 0.16666667, %v7182_v38 }
 0x4f3   : > { %v4315_v11 = vpop.f32.mrf.mxu0  ;;  %v4318_v34 = vpop.f32.mrf.mxu1 }
 0x4f4   : > { %v6352_v58 = vadd.f32 %v4315_v11, %v2283_v4  ;;  %v6354_v32 = vadd.f32 %v4318_v34, %v2285_v43  ;;  %v2218_v43 = vmul.u32 4, %v6111_v7  ;;  %v4475_v11 = vcvt.f32.s32 %v4474_v56 }
 0x4f5   : > { %v2460_v39 = vpop.f32.mrf.mxu0  ;;  %v2470_v24 = vpop.f32.mrf.mxu1  ;;  %v2180_v34 = vmul.f32 0.16666667, %v7181_v3  ;;  %v4480_v3 = vtrunc.f32 %v2179_v12  ;;  %v2225_v12 = vmul.u32 4, %v6216_v23 }
 0x4f6   : > { %v6361_v19 = vadd.f32 %v2460_v39, %v2282_v47  ;;  %v6363_v2 = vadd.f32 %v2470_v24, %v2284_v30  ;;  %v2588_v4 = vsel %vm2315_vm12, %v6354_v32, -inf  ;;  %v2582_v45 = vsel %vm2315_vm12, %v6352_v58, -inf }
 0x4f7   : > { %2589 = vmax.xlane.f32.xlu1 %v2588_v4  ;;  %v4321_v59 = vpop.f32.mrf.mxu1  ;;  %2583 = vmax.xlane.f32.xlu0 %v2582_v45  ;;  %v2220_v47 = vmul.u32 4, %v6125_v5  ;;  %v4478_v30 = vtrunc.f32 %v2178_v50  ;;  %v2242_v28 = vsub.s32 %v4469_v52, %v2218_v43  ;;  %v2245_v6 = vsub.s32 %v4475_v11, %v2221_v37 }
 0x4f8   : > { %v6378_v8 = vadd.f32 %v4321_v59, %v2287_v10  ;;  %v2585_v63 = vsel %vm2315_vm12, %v6363_v2, -inf  ;;  %v2579_v50 = vsel %vm2315_vm12, %v6361_v19, -inf  ;;  %v4477_v24 = vcvt.f32.s32 %v4476_v51 }
 0x4f9   : > { %v2480_v36 = vpop.f32.mrf.mxu1  ;;  %v2244_v39 = vsub.s32 %v4473_v14, %v2220_v47  ;;  %v4479_v10 = vcvt.f32.s32 %v4478_v30  ;;  %v2291_v45 = vsel %vm2267_vm15, 0.0, %v4630_v57  ;;  %v2290_v59 = vsel %vm2266_vm6, 0.0, %v4630_v57 }
 0x4fa   : > { %v6380_v56 = vadd.f32 %v2480_v36, %v2286_v42  ;;  %v2222_v42 = vmul.u32 4, %v6170_v49  ;;  %v4482_v36 = vtrunc.f32 %v2180_v34  ;;  %v2594_v37 = vsel %vm2315_vm12, %v6378_v8, -inf }
 0x4fb   : > { %v4324_v35 = vpop.f32.mrf.mxu1  ;;  %2586 = vmax.xlane.f32.xlu0 %v2585_v63  ;;  %2580 = vmax.xlane.f32.xlu1 %v2579_v50  ;;  %vm2268_vm8 = vcmp.eq.s32.totalorder %v2242_v28, %v6315_v48  ;;  %vm2271_vm9 = vcmp.eq.s32.totalorder %v2245_v6, %v6315_v48  ;;  %vm2270_vm10 = vcmp.eq.s32.totalorder %v2244_v39, %v6315_v48  ;;  %v4481_v54 = vcvt.f32.s32 %v4480_v3 }
 0x4fc   : > { %v6395_v52 = vadd.f32 %v4324_v35, %v2289_v53  ;;  %v2591_v11 = vsel %vm2315_vm12, %v6380_v56, -inf  ;;  %v7183_v53 = vcvt.s32.f32 %v6136_v16  ;;  %v2247_v30 = vsub.s32 %v4479_v10, %v2223_v9 }
 0x4fd   : > { %v2490_v4 = vpop.f32.mrf.mxu1  ;;  %v2246_v51 = vsub.s32 %v4477_v24, %v2222_v42  ;;  %v4483_v38 = vcvt.f32.s32 %v4482_v36  ;;  %v2224_v63 = vmul.u32 4, %v6198_v29  ;;  %v2292_v9 = vsel %vm2268_vm8, 0.0, %v4630_v57 }
 0x4fe   : > { %v6397_v43 = vadd.f32 %v2490_v4, %v2288_v22  ;;  %v2182_v62 = vmul.f32 0.16666667, %v7183_v53  ;;  %v7184_v22 = vcvt.s32.f32 %v6088_v20  ;;  %v2600_v35 = vsel %vm2315_vm12, %v6395_v52, -inf }
 0x4ff   : > { %v4327_v14 = vpop.f32.mrf.mxu1  ;;  %2592 = vmax.xlane.f32.xlu0 %v2591_v11  ;;  %2595 = vmax.xlane.f32.xlu1 %v2594_v37  ;;  %v7185_v42 = vcvt.s32.f32 %v6147_v55  ;;  %v2294_v36 = vsel %vm2270_vm10, 0.0, %v4630_v57  ;;  %vm2273_vm3 = vcmp.eq.s32.totalorder %v2247_v30, %v6315_v48  ;;  %v7186_v3 = vcvt.s32.f32 %v6144_v25 }
 0x500   : > { %v2181_v47 = vmul.f32 0.16666667, %v7184_v22  ;;  %v6415_v50 = vadd.f32 %v4327_v14, %v2291_v45  ;;  %v2597_v20 = vsel %vm2315_vm12, %v6397_v43, -inf  ;;  %v4486_v10 = vtrunc.f32 %v2182_v62 }
 0x501   : > { %v2500_v34 = vpop.f32.mrf.mxu1  ;;  %v2184_v45 = vmul.f32 0.16666667, %v7185_v42  ;;  %v2183_v11 = vmul.f32 0.16666667, %v7186_v3  ;;  %vm2272_vm15 = vcmp.eq.s32.totalorder %v2246_v51, %v6315_v48  ;;  %v2249_v37 = vsub.s32 %v4483_v38, %v2225_v12 }
 0x502   : > { %v6417_v16 = vadd.f32 %v2500_v34, %v2290_v59  ;;  %v4484_v24 = vtrunc.f32 %v2181_v47  ;;  %v2295_v59 = vsel %vm2271_vm9, 0.0, %v4630_v57  ;;  %v2248_v14 = vsub.s32 %v4481_v54, %v2224_v63 }
 0x503   : > { %v4330_v4 = vpop.f32.mrf.mxu1  ;;  %2598 = vmax.xlane.f32.xlu0 %v2597_v20  ;;  %2601 = vmax.xlane.f32.xlu1 %v2600_v35  ;;  %v2227_v55 = vmul.u32 4, %v6237_v44  ;;  %v2606_v62 = vsel %vm2315_vm12, %v6415_v50, -inf  ;;  %v4487_v25 = vcvt.f32.s32 %v4486_v10  ;;  %v2226_v34 = vmul.u32 4, %v6222_v27 }
 0x504   : > { %v6439_v53 = vadd.f32 %v4330_v4, %v2293_v31  ;;  %v2603_v39 = vsel %vm2315_vm12, %v6417_v16, -inf  ;;  %v4485_v47 = vcvt.f32.s32 %v4484_v24  ;;  %v4490_v38 = vtrunc.f32 %v2184_v45 }
 0x505   : > { %v2510_v28 = vpop.f32.mrf.mxu1  ;;  %v4488_v12 = vtrunc.f32 %v2183_v11  ;;  %v7187_v31 = vcvt.s32.f32 %v6193_v1  ;;  %v7188_v63 = vcvt.s32.f32 %v6174_v41  ;;  %v2297_v4 = vsel %vm2273_vm3, 0.0, %v4630_v57 }
 0x506   : > { %v6441_v6 = vadd.f32 %v2510_v28, %v2292_v9  ;;  %v2296_v9 = vsel %vm2272_vm15, 0.0, %v4630_v57  ;;  %vm2275_vm6 = vcmp.eq.s32.totalorder %v2249_v37, %v6315_v48  ;;  %vm2274_vm7 = vcmp.eq.s32.totalorder %v2248_v14, %v6315_v48 }
 0x507   : > { %v4333_v22 = vpop.f32.mrf.mxu1  ;;  %2604 = vmax.xlane.f32.xlu0 %v2603_v39  ;;  %2607 = vmax.xlane.f32.xlu1 %v2606_v62  ;;  %v2186_v54 = vmul.f32 0.16666667, %v7187_v31  ;;  %v2185_v20 = vmul.f32 0.16666667, %v7188_v63  ;;  %v2612_v24 = vsel %vm2315_vm12, %v6439_v53, -inf  ;;  %v2251_v42 = vsub.s32 %v4487_v25, %v2227_v55 }
 0x508   : > { %v6460_v10 = vadd.f32 %v4333_v22, %v2295_v59  ;;  %v2609_v41 = vsel %vm2315_vm12, %v6441_v6, -inf  ;;  %v2250_v51 = vsub.s32 %v4485_v47, %v2226_v34  ;;  %v4491_v45 = vcvt.f32.s32 %v4490_v38 }
 0x509   : > { %v2520_v35 = vpop.f32.mrf.mxu1  ;;  %v2229_v3 = vmul.u32 4, %v6257_v46  ;;  %v4489_v11 = vcvt.f32.s32 %v4488_v12  ;;  %v2228_v59 = vmul.u32 4, %v6244_v33  ;;  %v4494_v28 = vtrunc.f32 %v2186_v54 }
 0x50a   : > { %v6462_v1 = vadd.f32 %v2520_v35, %v2294_v36  ;;  %v4492_v36 = vtrunc.f32 %v2185_v20  ;;  %v2299_v62 = vsel %vm2275_vm6, 0.0, %v4630_v57  ;;  %v2298_v22 = vsel %vm2274_vm7, 0.0, %v4630_v57 }
 0x50b   : > { %v4336_v30 = vpop.f32.mrf.mxu1  ;;  %2610 = vmax.xlane.f32.xlu0 %v2609_v41  ;;  %2613 = vmax.xlane.f32.xlu1 %v2612_v24  ;;  %v2618_v47 = vsel %vm2315_vm12, %v6460_v10, -inf  ;;  %vm2277_vm8 = vcmp.eq.s32.totalorder %v2251_v42, %v6315_v48  ;;  %vm2276_vm9 = vcmp.eq.s32.totalorder %v2250_v51, %v6315_v48  ;;  %v2253_v37 = vsub.s32 %v4491_v45, %v2229_v3 }
 0x50c   : > { %v6476_v31 = vadd.f32 %v4336_v30, %v2297_v4  ;;  %v2615_v25 = vsel %vm2315_vm12, %v6462_v1, -inf  ;;  %v2231_v14 = vmul.u32 4, %v6275_v0  ;;  %v2252_v38 = vsub.s32 %v4489_v11, %v2228_v59 }
 0x50d   : > { %v2530_v39 = vpop.f32.mrf.mxu1  ;;  %v4495_v12 = vcvt.f32.s32 %v4494_v28  ;;  %v4493_v54 = vcvt.f32.s32 %v4492_v36  ;;  %v2230_v63 = vmul.u32 4, %v6262_v18  ;;  %v2301_v24 = vsel %vm2277_vm8, 0.0, %v4630_v57 }
 0x50e   : > { %v6478_v55 = vadd.f32 %v2530_v39, %v2296_v9  ;;  %v2624_v41 = vsel %vm2315_vm12, %v6476_v31, -inf  ;;  %v2300_v42 = vsel %vm2276_vm9, 0.0, %v4630_v57  ;;  %vm2279_vm10 = vcmp.eq.s32.totalorder %v2253_v37, %v6315_v48 }
 0x50f   : > { %v4339_v34 = vpop.f32.mrf.mxu1  ;;  %2616 = vmax.xlane.f32.xlu0 %v2615_v25  ;;  %2619 = vmax.xlane.f32.xlu1 %v2618_v47  ;;  %vm2278_vm3 = vcmp.eq.s32.totalorder %v2252_v38, %v6315_v48  ;;  %v2255_v45 = vsub.s32 %v4495_v12, %v2231_v14  ;;  %v2254_v3 = vsub.s32 %v4493_v54, %v2230_v63  ;;  %v2303_v51 = vsel %vm2279_vm10, 0.0, %v4630_v57 }
 0x510   : > { %v6488_v35 = vadd.f32 %v4339_v34, %v2299_v62  ;;  %v2621_v9 = vsel %vm2315_vm12, %v6478_v55, -inf }
 0x511   : > { %v2540_v20 = vpop.f32.mrf.mxu1  ;;  %vm2281_vm15 = vcmp.eq.s32.totalorder %v2255_v45, %v6315_v48  ;;  %vm2280_vm6 = vcmp.eq.s32.totalorder %v2254_v3, %v6315_v48 }
 0x512   : > { %v6490_v4 = vadd.f32 %v2540_v20, %v2298_v22  ;;  %v2630_v39 = vsel %vm2315_vm12, %v6488_v35, -inf  ;;  %v2302_v22 = vsel %vm2278_vm3, 0.0, %v4630_v57  ;;  %v2305_v38 = vsel %vm2281_vm15, 0.0, %v4630_v57 }
 0x513   : > { %v4342_v30 = vpop.f32.mrf.mxu1  ;;  %2622 = vmax.xlane.f32.xlu0 %v2621_v9  ;;  %2625 = vmax.xlane.f32.xlu1 %v2624_v41  ;;  %v2304_v54 = vsel %vm2280_vm6, 0.0, %v4630_v57 }
 0x514   : > { %v6502_v59 = vadd.f32 %v4342_v30, %v2301_v24  ;;  %v2627_v36 = vsel %vm2315_vm12, %v6490_v4, -inf }
 0x515   : > { %v2550_v11 = vpop.f32.mrf.mxu1 }
 0x516   : > { %v6504_v28 = vadd.f32 %v2550_v11, %v2300_v42  ;;  %v2636_v14 = vsel %vm2315_vm12, %v6502_v59, -inf }
 0x517   : > { %v4345_v62 = vpop.f32.mrf.mxu1  ;;  %2628 = vmax.xlane.f32.xlu0 %v2627_v36  ;;  %2631 = vmax.xlane.f32.xlu1 %v2630_v39 }
 0x518   : > { %v6514_v47 = vadd.f32 %v4345_v62, %v2303_v51  ;;  %v2633_v37 = vsel %vm2315_vm12, %v6504_v28, -inf }
 0x519   : > { %v2560_v25 = vpop.f32.mrf.mxu1 }
 0x51a   : > { %v6516_v34 = vadd.f32 %v2560_v25, %v2302_v22  ;;  %v2642_v24 = vsel %vm2315_vm12, %v6514_v47, -inf }
 0x51b   : > { %v4348_v12 = vpop.f32.mrf.mxu1  ;;  %2634 = vmax.xlane.f32.xlu0 %v2633_v37  ;;  %2637 = vmax.xlane.f32.xlu1 %v2636_v14 }
 0x51c   : > { %v6524_v20 = vadd.f32 %v4348_v12, %v2305_v38  ;;  %v2639_v41 = vsel %vm2315_vm12, %v6516_v34, -inf }
 0x51d   : > { %v2570_v63 = vpop.f32.mrf.mxu1 }
 0x51e   : > { %v6526_v9 = vadd.f32 %v2570_v63, %v2304_v54  ;;  %v2648_v42 = vsel %vm2315_vm12, %v6524_v20, -inf }
 0x51f   : > { %2640 = vmax.xlane.f32.xlu0 %v2639_v41  ;;  %2643 = vmax.xlane.f32.xlu1 %v2642_v24 }
 0x520   : > { %v2645_v30 = vsel %vm2315_vm12, %v6526_v9, -inf }
 0x523   : > { %2646 = vmax.xlane.f32.xlu0 %v2645_v30  ;;  %2649 = vmax.xlane.f32.xlu1 %v2648_v42 }
 0x580   : > { %v2590_v57 = vpop.xlane.xlu1 %2589  ;;  %v2584_v45 = vpop.xlane.xlu0 %2583 }
 0x581   : > { %v2654_v3 = vsub.f32 %v6354_v32, %v2590_v57  ;;  %v2652_v11 = vsub.f32 %v6352_v58, %v2584_v45 }
 0x583   : > { %v2677_v36 = vmul.f32 1.442695, %v2652_v11  ;;  %v2681_v39 = vmul.f32 1.442695, %v2654_v3 }
 0x584   : > { %v2587_v51 = vpop.xlane.xlu0 %2586  ;;  %v2581_v62 = vpop.xlane.xlu1 %2580 }
 0x585   : > { %v2653_v22 = vsub.f32 %v6363_v2, %v2587_v51  ;;  %v2651_v25 = vsub.f32 %v6361_v19, %v2581_v62  ;;  %4521 = vpow2.f32 %v2677_v36 }
 0x586   : > { %4523 = vpow2.f32 %v2681_v39 }
 0x587   : > { %v2675_v37 = vmul.f32 1.442695, %v2651_v25  ;;  %v2679_v14 = vmul.f32 1.442695, %v2653_v22 }
 0x588   : > { %v2593_v38 = vpop.xlane.xlu0 %2592  ;;  %v2596_v12 = vpop.xlane.xlu1 %2595 }
 0x589   : > { %v2655_v54 = vsub.f32 %v6380_v56, %v2593_v38  ;;  %v2656_v32 = vsub.f32 %v6378_v8, %v2596_v12  ;;  %4525 = vpow2.f32 %v2675_v37 }
 0x58a   : > { %4527 = vpow2.f32 %v2679_v14 }
 0x58b   : > { %v2685_v58 = vmul.f32 1.442695, %v2656_v32  ;;  %v2683_v63 = vmul.f32 1.442695, %v2655_v54 }
 0x58c   : > { %v2599_v41 = vpop.xlane.xlu0 %2598  ;;  %v2602_v24 = vpop.xlane.xlu1 %2601 }
 0x58d   : > { %v2657_v2 = vsub.f32 %v6397_v43, %v2599_v41  ;;  %v2658_v19 = vsub.f32 %v6395_v52, %v2602_v24  ;;  %4529 = vpow2.f32 %v2685_v58 }
 0x58e   : > { %4531 = vpow2.f32 %v2683_v63 }
 0x58f   : > { %v2689_v30 = vmul.f32 1.442695, %v2658_v19  ;;  %v2687_v42 = vmul.f32 1.442695, %v2657_v2 }
 0x590   : > { %v2605_v57 = vpop.xlane.xlu0 %2604  ;;  %v2608_v45 = vpop.xlane.xlu1 %2607 }
 0x591   : > { %v2659_v56 = vsub.f32 %v6417_v16, %v2605_v57  ;;  %v2660_v8 = vsub.f32 %v6415_v50, %v2608_v45  ;;  %4533 = vpow2.f32 %v2689_v30 }
 0x592   : > { %v6546_v3 = vpop.eup %4521  ;;  %4535 = vpow2.f32 %v2687_v42 }
 0x593   : > { %v2693_v11 = vmul.f32 1.442695, %v2660_v8  ;;  %v2691_v36 = vmul.f32 1.442695, %v2659_v56  ;;  %v2726_v52 = vsel %vm2315_vm12, %v6546_v3, 0.0  ;;  %v6550_v51 = vpop.eup %4523 }
 0x594   : > { %v2611_v39 = vpop.xlane.xlu0 %2610  ;;  %v2614_v43 = vpop.xlane.xlu1 %2613  ;;  %2727 = vadd.xlane.f32.xlu1 %v2726_v52  ;;  %v2732_v14 = vsel %vm2315_vm12, %v6550_v51, 0.0 }
 0x595   : > { %v2661_v62 = vsub.f32 %v6441_v6, %v2611_v39  ;;  %v2662_v16 = vsub.f32 %v6439_v53, %v2614_v43  ;;  %4537 = vpow2.f32 %v2693_v11 }
 0x596   : > { %v6554_v50 = vpop.eup %4525  ;;  %4539 = vpow2.f32 %v2691_v36 }
 0x597   : > { %v2697_v22 = vmul.f32 1.442695, %v2662_v16  ;;  %v2695_v25 = vmul.f32 1.442695, %v2661_v62  ;;  %v2723_v38 = vsel %vm2315_vm12, %v6554_v50, 0.0  ;;  %v6560_v54 = vpop.eup %4527 }
 0x598   : > { %v2617_v37 = vpop.xlane.xlu0 %2616  ;;  %v2620_v12 = vpop.xlane.xlu1 %2619  ;;  %2733 = vadd.xlane.f32.xlu1 %v2732_v14  ;;  %2724 = vadd.xlane.f32.xlu0 %v2723_v38  ;;  %v2729_v41 = vsel %vm2315_vm12, %v6560_v54, 0.0  ;;  %v7189_v14 = vld [vmem:[#allocation14_spill] sm:$0xff]  ;;  %v7190_v38 = vld [vmem:[#allocation3_spill] sm:$0xff] }
 0x599   : > { %v2663_v6 = vsub.f32 %v6462_v1, %v2617_v37  ;;  %v2664_v53 = vsub.f32 %v6460_v10, %v2620_v12  ;;  %4541 = vpow2.f32 %v2697_v22 }
 0x59a   : > { %v6564_v32 = vpop.eup %4529  ;;  %4543 = vpow2.f32 %v2695_v25 }
 0x59b   : > { %v2701_v58 = vmul.f32 1.442695, %v2664_v53  ;;  %v2699_v63 = vmul.f32 1.442695, %v2663_v6  ;;  %v2738_v24 = vsel %vm2315_vm12, %v6564_v32, 0.0  ;;  %v6570_v2 = vpop.eup %4531 }
 0x59c   : > { %2730 = vadd.xlane.f32.xlu0 %v2729_v41  ;;  %2739 = vadd.xlane.f32.xlu1 %v2738_v24  ;;  %v2735_v10 = vsel %vm2315_vm12, %v6570_v2, 0.0  ;;  %v2623_v25 = vpop.xlane.xlu0 %2622  ;;  %v2626_v37 = vpop.xlane.xlu1 %2625 }
 0x59d   : > { %4545 = vpow2.f32 %v2701_v58  ;;  %v2665_v53 = vsub.f32 %v6478_v55, %v2623_v25 }
 0x59e   : > { %v6572_v1 = vpop.eup %4533  ;;  %4547 = vpow2.f32 %v2699_v63  ;;  %v2666_v63 = vsub.f32 %v6476_v31, %v2626_v37 }
 0x59f   : > { %v2744_v19 = vsel %vm2315_vm12, %v6572_v1, 0.0  ;;  %v6578_v30 = vpop.eup %4535  ;;  %v2703_v41 = vmul.f32 1.442695, %v2665_v53 }
 0x5a0   : > { %2736 = vadd.xlane.f32.xlu0 %v2735_v10  ;;  %2745 = vadd.xlane.f32.xlu1 %v2744_v19  ;;  %v2741_v57 = vsel %vm2315_vm12, %v6578_v30, 0.0  ;;  %v2629_v12 = vpop.xlane.xlu0 %2628  ;;  %v2632_v6 = vpop.xlane.xlu1 %2631  ;;  %v2705_v19 = vmul.f32 1.442695, %v2666_v63 }
 0x5a1   : > { %v2667_v24 = vsub.f32 %v6490_v4, %v2629_v12  ;;  %4549 = vpow2.f32 %v2703_v41 }
 0x5a2   : > { %v6580_v42 = vpop.eup %4537  ;;  %4551 = vpow2.f32 %v2705_v19 }
 0x5a3   : > { %v2750_v45 = vsel %vm2315_vm12, %v6580_v42, 0.0  ;;  %v6586_v56 = vpop.eup %4539 }
 0x5a4   : > { %2742 = vadd.xlane.f32.xlu0 %v2741_v57  ;;  %2751 = vadd.xlane.f32.xlu1 %v2750_v45  ;;  %v2747_v11 = vsel %vm2315_vm12, %v6586_v56, 0.0  ;;  %v2635_v58 = vpop.xlane.xlu0 %2634  ;;  %v2638_v10 = vpop.xlane.xlu1 %2637  ;;  %v2668_v57 = vsub.f32 %v6488_v35, %v2632_v6 }
 0x5a6   : > { %v6588_v8 = vpop.eup %4541 }
 0x5a7   : > { %v2756_v36 = vsel %vm2315_vm12, %v6588_v8, 0.0  ;;  %v6594_v39 = vpop.eup %4543 }
 0x5a8   : > { %2748 = vadd.xlane.f32.xlu0 %v2747_v11  ;;  %2757 = vadd.xlane.f32.xlu1 %v2756_v36  ;;  %v2753_v43 = vsel %vm2315_vm12, %v6594_v39, 0.0  ;;  %v2641_v45 = vpop.xlane.xlu0 %2640  ;;  %v2707_v11 = vmul.f32 1.442695, %v2667_v24  ;;  %v2669_v36 = vsub.f32 %v6504_v28, %v2635_v58  ;;  %v2644_v55 = vpop.xlane.xlu1 %2643 }
 0x5a9   : > { %v2671_v31 = vsub.f32 %v6516_v34, %v2641_v45  ;;  %v2672_v37 = vsub.f32 %v6514_v47, %v2644_v55 }
 0x5aa   : > { %v6596_v52 = vpop.eup %4545  ;;  %4553 = vpow2.f32 %v2707_v11 }
 0x5ab   : > { %v2762_v62 = vsel %vm2315_vm12, %v6596_v52, 0.0  ;;  %v6602_v16 = vpop.eup %4547  ;;  %v2715_v35 = vmul.f32 1.442695, %v2671_v31  ;;  %v2717_v28 = vmul.f32 1.442695, %v2672_v37 }
 0x5ac   : > { %2754 = vadd.xlane.f32.xlu0 %v2753_v43  ;;  %2763 = vadd.xlane.f32.xlu1 %v2762_v62  ;;  %v2759_v22 = vsel %vm2315_vm12, %v6602_v16, 0.0  ;;  %v2709_v43 = vmul.f32 1.442695, %v2668_v57  ;;  %v2670_v62 = vsub.f32 %v6502_v59, %v2638_v10  ;;  %v2647_v25 = vpop.xlane.xlu0 %2646 }
 0x5ae   : > { %4555 = vpow2.f32 %v2709_v43  ;;  %v2713_v4 = vmul.f32 1.442695, %v2670_v62  ;;  %v6620_v6 = vpop.eup %4549 }
 0x5af   : > { %v6622_v34 = vpop.eup %4551  ;;  %v2765_v47 = vsel %vm2315_vm12, %v6620_v6, 0.0 }
 0x5b0   : > { %2760 = vadd.xlane.f32.xlu1 %v2759_v22  ;;  %v2711_v22 = vmul.f32 1.442695, %v2669_v36 }
 0x5b2   : > { %4557 = vpow2.f32 %v2711_v22 }
 0x5b3   : > { %4559 = vpow2.f32 %v2713_v4 }
 0x5b4   : > { %4561 = vpow2.f32 %v2715_v35 }
 0x5b5   : > { %4563 = vpow2.f32 %v2717_v28 }
 0x5b7   : > { %v6626_v58 = vpop.eup %4553 }
 0x5b8   : > { %v2771_v63 = vsel %vm2315_vm12, %v6626_v58, 0.0 }
 0x5c1   : > { %2845 = vrot.lane.b32.xlu1 %v7189_v14, %s4629_s24  ;;  %v2673_v14 = vsub.f32 %v6526_v9, %v2647_v25  ;;  %v6628_v9 = vpop.eup %4555 }
 0x5c2   : > { %2843 = vrot.lane.b32.xlu0 %v7190_v38, %s4629_s24  ;;  %v2650_v38 = vpop.xlane.xlu1 %2649  ;;  %v6634_v41 = vpop.eup %4557  ;;  %v2774_v19 = vsel %vm2315_vm12, %v6628_v9, 0.0 }
 0x5c3   : > { %v2719_v12 = vmul.f32 1.442695, %v2673_v14  ;;  %v2674_v59 = vsub.f32 %v6524_v20, %v2650_v38  ;;  %v2768_v20 = vsel %vm2315_vm12, %v6622_v34, 0.0  ;;  %v6636_v24 = vpop.eup %4559  ;;  %v2777_v10 = vsel %vm2315_vm12, %v6634_v41, 0.0 }
 0x5c4   : > { %v6642_v57 = vpop.eup %4561  ;;  %v2780_v36 = vsel %vm2315_vm12, %v6636_v24, 0.0 }
 0x5c5   : > { %4565 = vpow2.f32 %v2719_v12  ;;  %v2721_v53 = vmul.f32 1.442695, %v2674_v59  ;;  %v6644_v45 = vpop.eup %4563  ;;  %v2783_v11 = vsel %vm2315_vm12, %v6642_v57, 0.0 }
 0x5c6   : > { %v2786_v55 = vsel %vm2315_vm12, %v6644_v45, 0.0 }
 0x5c7   : > { %4567 = vpow2.f32 %v2721_v53 }
 0x5d2   : > { %v6650_v43 = vpop.eup %4565 }
 0x5d3   : > { %v2789_v62 = vsel %vm2315_vm12, %v6650_v43, 0.0 }
 0x5d4   : > { %v6656_v22 = vpop.eup %4567 }
 0x5d5   : > { %v2792_v31 = vsel %vm2315_vm12, %v6656_v22, 0.0 }
 0x5e1   : > { %2766 = vadd.xlane.f32.xlu0 %v2765_v47 }
 0x5e5   : > { %2772 = vadd.xlane.f32.xlu0 %v2771_v63  ;;  %2769 = vadd.xlane.f32.xlu1 %v2768_v20 }
 0x5e9   : > { %2778 = vadd.xlane.f32.xlu1 %v2777_v10  ;;  %2775 = vadd.xlane.f32.xlu0 %v2774_v19 }
 0x5ed   : > { %2784 = vadd.xlane.f32.xlu1 %v2783_v11  ;;  %2781 = vadd.xlane.f32.xlu0 %v2780_v36 }
 0x5f1   : > { %2790 = vadd.xlane.f32.xlu1 %v2789_v62  ;;  %2787 = vadd.xlane.f32.xlu0 %v2786_v55 }
 0x5f5   : > { %2793 = vadd.xlane.f32.xlu0 %v2792_v31 }
 0x61d   : > { %v2728_v25 = vpop.xlane.xlu1 %2727 }
 0x621   : > { %v2725_v4 = vpop.xlane.xlu0 %2724  ;;  %v2734_v37 = vpop.xlane.xlu1 %2733 }
 0x622   : > { %4569 = vrcp.f32 %v2725_v4 }
 0x623   : > { %4571 = vrcp.f32 %v2728_v25 }
 0x625   : > { %v2731_v35 = vpop.xlane.xlu0 %2730  ;;  %v2740_v14 = vpop.xlane.xlu1 %2739 }
 0x626   : > { %4573 = vrcp.f32 %v2731_v35 }
 0x627   : > { %4575 = vrcp.f32 %v2734_v37 }
 0x629   : > { %v2737_v38 = vpop.xlane.xlu0 %2736  ;;  %v2746_v28 = vpop.xlane.xlu1 %2745 }
 0x62a   : > { %4577 = vrcp.f32 %v2737_v38 }
 0x62b   : > { %4579 = vrcp.f32 %v2740_v14 }
 0x62d   : > { %v2743_v12 = vpop.xlane.xlu0 %2742  ;;  %v2752_v59 = vpop.xlane.xlu1 %2751 }
 0x62e   : > { %4581 = vrcp.f32 %v2743_v12 }
 0x62f   : > { %v4570_v53 = vpop.eup %4569  ;;  %4583 = vrcp.f32 %v2746_v28 }
 0x630   : > { %v2819_v47 = vmul.f32 %v4570_v53, %v6554_v50  ;;  %v4572_v36 = vpop.eup %4571 }
 0x631   : > { %v2758_v63 = vpop.xlane.xlu1 %2757  ;;  %v2749_v20 = vpop.xlane.xlu0 %2748  ;;  %v2820_v50 = vmul.f32 %v4572_v36, %v6546_v3 }
 0x632   : > { %4355 = vmatprep.mubr.msk.f32.mxu0 %vm2315_vm12, %v2819_v47  ;;  %4585 = vrcp.f32 %v2749_v20 }
 0x633   : > { %v4574_v55 = vpop.eup %4573  ;;  %4587 = vrcp.f32 %v2752_v59 }
 0x634   : > { %v4576_v25 = vpop.eup %4575  ;;  %v2821_v4 = vmul.f32 %v4574_v55, %v6560_v54 }
 0x635   : > { %v2764_v10 = vpop.xlane.xlu1 %2763  ;;  %v2755_v19 = vpop.xlane.xlu0 %2754  ;;  %v2822_v35 = vmul.f32 %v4576_v25, %v6550_v51 }
 0x636   : > { %4589 = vrcp.f32 %v2755_v19 }
 0x637   : > { %v4578_v37 = vpop.eup %4577  ;;  %4591 = vrcp.f32 %v2758_v63 }
 0x638   : > { %v4580_v14 = vpop.eup %4579  ;;  %v2823_v38 = vmul.f32 %v4578_v37, %v6570_v2 }
 0x639   : > { %v2761_v11 = vpop.xlane.xlu1 %2760  ;;  %v2844_v31 = vpop.permute.xlu0 %2843  ;;  %v2824_v3 = vmul.f32 %v4580_v14, %v6564_v32 }
 0x63a   : > { %4593 = vrcp.f32 %v2761_v11 }
 0x63b   : > { %v4582_v28 = vpop.eup %4581  ;;  %4595 = vrcp.f32 %v2764_v10 }
 0x63c   : > { %v4584_v54 = vpop.eup %4583  ;;  %v2825_v12 = vmul.f32 %v4582_v28, %v6578_v30 }
 0x63d   : > { %v2846_v62 = vpop.permute.xlu1 %2845  ;;  %v2826_v51 = vmul.f32 %v4584_v54, %v6572_v1 }
 0x63e   : > { %4351 = vmatprep.subr.mxu0 %v2846_v62 }
 0x63f   : > { %4352 = vmatpush3.msra.mxu0 %v2846_v62  ;;  %v4586_v59 = vpop.eup %4585 }
 0x640   : > { %4353 = vmatprep.subr.mxu0 %v2844_v31  ;;  %v4588_v53 = vpop.eup %4587  ;;  %v2827_v2 = vmul.f32 %v4586_v59, %v6586_v56 }
 0x641   : > { %4354 = vmatpush3.msra.mxu0 %v2844_v31  ;;  %v2828_v32 = vmul.f32 %v4588_v53, %v6580_v42 }
 0x642   : > { %4356 = vmatmul.mubr.msk.f32.vlgmr.msra.gmra.mxu0 %vm2315_vm12, %v2820_v50 }
 0x643   : > { %4358 = vmatprep.mubr.msk.f32.mxu0 %vm2315_vm12, %v2821_v4  ;;  %v4590_v47 = vpop.eup %4589 }
 0x644   : > { %v4592_v63 = vpop.eup %4591  ;;  %v2829_v30 = vmul.f32 %v4590_v47, %v6594_v39 }
 0x645   : > { %v2830_v1 = vmul.f32 %v4592_v63, %v6588_v8 }
 0x646   : > { %4359 = vmatmul.mubr.msk.f32.gmra.mxu0 %vm2315_vm12, %v2822_v35 }
 0x647   : > { %4361 = vmatprep.mubr.msk.f32.mxu0 %vm2315_vm12, %v2823_v38  ;;  %v4594_v20 = vpop.eup %4593 }
 0x648   : > { %v4596_v10 = vpop.eup %4595  ;;  %v2831_v56 = vmul.f32 %v4594_v20, %v6602_v16 }
 0x649   : > { %v2832_v19 = vmul.f32 %v4596_v10, %v6596_v52 }
 0x64a   : > { %4362 = vmatmul.mubr.msk.f32.gmra.mxu0 %vm2315_vm12, %v2824_v3 }
 0x64b   : > { %4364 = vmatprep.mubr.msk.f32.mxu0 %vm2315_vm12, %v2825_v12 }
 0x64e   : > { %4365 = vmatmul.mubr.msk.f32.gmra.mxu0 %vm2315_vm12, %v2826_v51 }
 0x64f   : > { %4367 = vmatprep.mubr.msk.f32.mxu0 %vm2315_vm12, %v2827_v2 }
 0x652   : > { %4368 = vmatmul.mubr.msk.f32.gmra.mxu0 %vm2315_vm12, %v2828_v32 }
 0x653   : > { %4370 = vmatprep.mubr.msk.f32.mxu0 %vm2315_vm12, %v2829_v30 }
 0x656   : > { %4371 = vmatmul.mubr.msk.f32.gmra.mxu0 %vm2315_vm12, %v2830_v1 }
 0x657   : > { %4373 = vmatprep.mubr.msk.f32.mxu0 %vm2315_vm12, %v2831_v56 }
 0x65a   : > { %4374 = vmatmul.mubr.msk.f32.gmra.mxu0 %vm2315_vm12, %v2832_v19 }
 0x66a   : > { %v2767_v42 = vpop.xlane.xlu0 %2766 }
 0x66b   : > { %4597 = vrcp.f32 %v2767_v42  ;;  %v7191_v42 = vld [vmem:[#allocation12_spill] sm:$0xff] }
 0x66c   : > { %vm7205_vm7 = vcmp.eq.s32.totalorder %v6222_v27, %v7191_v42  ;;  %vm7206_vm8 = vcmp.eq.s32.totalorder %v6257_v46, %v7191_v42  ;;  %vm7207_vm9 = vcmp.eq.s32.totalorder %v6155_v15, %v7191_v42  ;;  %vm7208_vm10 = vcmp.eq.s32.totalorder %v6244_v33, %v7191_v42 }
 0x66d   : > { %vm7209_vm3 = vcmp.eq.s32.totalorder %v6198_v29, %v7191_v42  ;;  %vm7210_vm15 = vcmp.eq.s32.totalorder %v6275_v0, %v7191_v42  ;;  %vm7211_vm6 = vcmp.eq.s32.totalorder %v6237_v44, %v7191_v42  ;;  %v3347_v44 = vld [vmem:[%s7058_s7 + $0xf8] sm:$0xff] }
 0x66e   : > { %v2773_v39 = vpop.xlane.xlu0 %2772  ;;  %v2770_v11 = vpop.xlane.xlu1 %2769  ;;  %3368 = vmatprep.subr.mxu0 %v3347_v44 }
 0x66f   : > { %4599 = vrcp.f32 %v2773_v39 }
 0x670   : > { %4601 = vrcp.f32 %v2770_v11  ;;  %v3343_v11 = vld [vmem:[%s7058_s7 + $0xd8] sm:$0xff] }
 0x672   : > { %v2776_v36 = vpop.xlane.xlu0 %2775  ;;  %v2779_v62 = vpop.xlane.xlu1 %2778 }
 0x673   : > { %4603 = vrcp.f32 %v2776_v36 }
 0x674   : > { %4605 = vrcp.f32 %v2779_v62  ;;  %v3341_v62 = vld [vmem:[%s7058_s7 + $0xc8] sm:$0xff] }
 0x676   : > { %v2782_v8 = vpop.xlane.xlu0 %2781  ;;  %v2785_v16 = vpop.xlane.xlu1 %2784 }
 0x677   : > { %4607 = vrcp.f32 %v2782_v8 }
 0x678   : > { %v4598_v55 = vpop.eup %4597  ;;  %4609 = vrcp.f32 %v2785_v16 }
 0x679   : > { %v2833_v31 = vmul.f32 %v4598_v55, %v6620_v6 }
 0x67a   : > { %v2788_v52 = vpop.xlane.xlu0 %2787  ;;  %v2791_v50 = vpop.xlane.xlu1 %2790 }
 0x67b   : > { %4611 = vrcp.f32 %v2788_v52  ;;  %4376 = vmatprep.mubr.msk.f32.mxu0 %vm2315_vm12, %v2833_v31  ;;  %v3336_v52 = vld [vmem:[%s7058_s7 + $0xa0] sm:$0xff] }
 0x67c   : > { %v4600_v25 = vpop.eup %4599  ;;  %4613 = vrcp.f32 %v2791_v50 }
 0x67d   : > { %v4602_v4 = vpop.eup %4601  ;;  %v2835_v37 = vmul.f32 %v4600_v25, %v6626_v58 }
 0x67e   : > { %v2794_v35 = vpop.xlane.xlu0 %2793  ;;  %v2834_v14 = vmul.f32 %v4602_v4, %v6622_v34 }
 0x67f   : > { %4615 = vrcp.f32 %v2794_v35 }
 0x680   : > { %v4604_v38 = vpop.eup %4603  ;;  %4377 = vmatmul.mubr.msk.f32.gmra.mxu0 %vm2315_vm12, %v2834_v14 }
 0x681   : > { %v4606_v28 = vpop.eup %4605  ;;  %4379 = vmatprep.mubr.msk.f32.mxu0 %vm2315_vm12, %v2835_v37  ;;  %v2836_v6 = vmul.f32 %v4604_v38, %v6628_v9  ;;  %v3327_v38 = vld [vmem:[%s7058_s7 + $0x58] sm:$0xff] }
 0x682   : > { %v2837_v3 = vmul.f32 %v4606_v28, %v6634_v41 }
 0x684   : > { %v4608_v54 = vpop.eup %4607  ;;  %4380 = vmatmul.mubr.msk.f32.gmra.mxu0 %vm2315_vm12, %v2836_v6 }
 0x685   : > { %v4610_v12 = vpop.eup %4609  ;;  %4382 = vmatprep.mubr.msk.f32.mxu0 %vm2315_vm12, %v2837_v3  ;;  %v2838_v58 = vmul.f32 %v4608_v54, %v6636_v24 }
 0x686   : > { %v2839_v34 = vmul.f32 %v4610_v12, %v6642_v57  ;;  %v7198_v12 = vld [vmem:[#allocation15_spill] sm:$0xff] }
 0x688   : > { %v4612_v59 = vpop.eup %4611  ;;  %4383 = vmatmul.mubr.msk.f32.gmra.mxu0 %vm2315_vm12, %v2838_v58 }
 0x689   : > { %v4614_v51 = vpop.eup %4613  ;;  %4385 = vmatprep.mubr.msk.f32.mxu0 %vm2315_vm12, %v2839_v34  ;;  %v2840_v9 = vmul.f32 %v4612_v59, %v6644_v45 }
 0x68a   : > { %v2841_v41 = vmul.f32 %v4614_v51, %v6650_v43 }
 0x68c   : > { %v4616_v53 = vpop.eup %4615  ;;  %4386 = vmatmul.mubr.msk.f32.gmra.mxu0 %vm2315_vm12, %v2840_v9 }
 0x68d   : > { %4388 = vmatprep.mubr.msk.f32.mxu0 %vm2315_vm12, %v2841_v41  ;;  %v2842_v2 = vmul.f32 %v4616_v53, %v6656_v22 }
 0x690   : > { %4389 = vmatmul.mubr.msk.f32.gmra.mxu0 %vm2315_vm12, %v2842_v2 }
 0x702   : > { %v4357_v24 = vpop.f32.mrf.mxu0 }
 0x704   : > { %v2990_v57 = vpop.f32.mrf.mxu0 }
 0x705   : > { %v3109_v36 = vsel %vm2118_vm11, %v2990_v57, 0.0  ;;  %vm7196_vm11 = vcmp.eq.s32.totalorder %v6132_v61, %v7191_v42 }
 0x706   : > { %v4360_v47 = vpop.f32.mrf.mxu0 }
 0x707   : > { %v3112_v39 = vsel %vm2121_vm14, %v4360_v47, 0.0  ;;  %vm7199_vm14 = vcmp.eq.s32.totalorder %v7198_v12, %v7191_v42  ;;  %v3321_v12 = vld [vmem:[%s7058_s7 + $0x28] sm:$0xff] }
 0x708   : > { %v3000_v32 = vpop.f32.mrf.mxu0  ;;  %v3133_v55 = vadd.f32 %v3112_v39, %v3109_v36  ;;  %v3110_v40 = vsel %vm7199_vm14, %v4357_v24, 0.0  ;;  %v3342_v36 = vld [vmem:[%s7058_s7 + $0xd0] sm:$0xff]  ;;  %vm3217_vm14 = vcmask 392192  }
 0x709   : > { %v3111_v13 = vsel %vm2120_vm13, %v3000_v32, 0.0  ;;  %vm7197_vm13 = vcmp.eq.s32.totalorder %v6125_v5, %v7191_v42 }
 0x70a   : > { %v4363_v63 = vpop.f32.mrf.mxu0 }
 0x70b   : > { %v3114_v8 = vsel %vm2123_vm2, %v4363_v63, 0.0  ;;  %vm7202_vm2 = vcmp.eq.s32.totalorder %v6075_v26, %v7191_v42 }
 0x70c   : > { %v3010_v30 = vpop.f32.mrf.mxu0  ;;  %v3135_v25 = vadd.f32 %v3114_v8, %v3111_v13  ;;  %v3340_v8 = vld [vmem:[%s7058_s7 + $0xc0] sm:$0xff]  ;;  %v3335_v13 = vld [vmem:[%s7058_s7 + $0x98] sm:$0xff] }
 0x70d   : > { %v3113_v28 = vsel %vm2122_vm0, %v3010_v30, 0.0  ;;  %vm7201_vm0 = vcmp.eq.s32.totalorder %v6170_v49, %v7191_v42 }
 0x70e   : > { %v4366_v20 = vpop.f32.mrf.mxu0  ;;  %v3134_v61 = vadd.f32 %v3113_v28, %v3110_v40  ;;  %v3326_v28 = vld [vmem:[%s7058_s7 + $0x50] sm:$0xff]  ;;  %v3320_v40 = vld [vmem:[%s7058_s7 + $0x20] sm:$0xff] }
 0x70f   : > { %v3116_v5 = vsel %vm7202_vm2, %v4366_v20, 0.0  ;;  %vm3229_vm2 = vcmask 982016  }
 0x710   : > { %v3020_v1 = vpop.f32.mrf.mxu0  ;;  %v3137_v57 = vadd.f32 %v3134_v61, %v3116_v5  ;;  %v3317_v61 = vld [vmem:[%s7058_s7 + $0x8] sm:$0xff] }
 0x711   : > { %v3115_v16 = vsel %vm2124_vm1, %v3020_v1, 0.0  ;;  %vm7200_vm1 = vcmp.eq.s32.totalorder %v6183_v60, %v7191_v42 }
 0x712   : > { %v4369_v45 = vpop.f32.mrf.mxu0  ;;  %v3136_v4 = vadd.f32 %v3133_v55, %v3115_v16  ;;  %v3339_v16 = vld [vmem:[%s7058_s7 + $0xb8] sm:$0xff]  ;;  %v3338_v55 = vld [vmem:[%s7058_s7 + $0xb0] sm:$0xff] }
 0x713   : > { %v3118_v35 = vsel %vm2127_vm5, %v4369_v45, 0.0  ;;  %vm7204_vm5 = vcmp.eq.s32.totalorder %v6216_v23, %v7191_v42 }
 0x714   : > { %v3030_v10 = vpop.f32.mrf.mxu0  ;;  %v3139_v3 = vadd.f32 %v3136_v4, %v3118_v35  ;;  %v3332_v4 = vld [vmem:[%s7058_s7 + $0x80] sm:$0xff]  ;;  %v3330_v35 = vld [vmem:[%s7058_s7 + $0x70] sm:$0xff] }
 0x715   : > { %v3117_v50 = vsel %vm2126_vm4, %v3030_v10, 0.0  ;;  %vm7203_vm4 = vcmp.eq.s32.totalorder %v6111_v7, %v7191_v42 }
 0x716   : > { %v4372_v43 = vpop.f32.mrf.mxu0  ;;  %v3138_v14 = vadd.f32 %v3135_v25, %v3117_v50  ;;  %v3334_v50 = vld [vmem:[%s7058_s7 + $0x90] sm:$0xff]  ;;  %v3333_v25 = vld [vmem:[%s7058_s7 + $0x88] sm:$0xff] }
 0x717   : > { %v3120_v6 = vsel %vm7196_vm11, %v4372_v43, 0.0  ;;  %vm7212_vm11 = vcmp.eq.s32.totalorder %v6262_v18, %v7191_v42  ;;  %v3346_v18 = vld [vmem:[%s7058_s7 + $0xf0] sm:$0xff]  ;;  %v3345_v42 = vld [vmem:[%s7058_s7 + $0xe8] sm:$0xff] }
 0x718   : > { %v3040_v56 = vpop.f32.mrf.mxu0  ;;  %v3141_v59 = vadd.f32 %v3138_v14, %v3120_v6  ;;  %3369 = vmatpush1.msra.mxu0 %v3346_v18  ;;  %v3329_v14 = vld [vmem:[%s7058_s7 + $0x68] sm:$0xff] }
 0x719   : > { %v3119_v60 = vsel %vm7203_vm4, %v3040_v56, 0.0  ;;  %3370 = vmatprep.subr.mxu0 %v3345_v42  ;;  %v3325_v6 = vld [vmem:[%s7058_s7 + $0x48] sm:$0xff] }
 0x71a   : > { %v4375_v19 = vpop.f32.mrf.mxu0  ;;  %v3140_v63 = vadd.f32 %v3137_v57, %v3119_v60 }
 0x71b   : > { %v3122_v23 = vsel %vm7207_vm9, %v4375_v19, 0.0 }
 0x71c   : > { %v3050_v22 = vpop.f32.mrf.mxu0  ;;  %v3143_v10 = vadd.f32 %v3140_v63, %v3122_v23 }
 0x71d   : > { %v3121_v21 = vsel %vm7197_vm13, %v3050_v22, 0.0  ;;  %v3344_v22 = vld [vmem:[%s7058_s7 + $0xe0] sm:$0xff] }
 0x71e   : > { %v3142_v51 = vadd.f32 %v3139_v3, %v3121_v21  ;;  %3371 = vmatpush1.msra.mxu0 %v3344_v22  ;;  %v3324_v21 = vld [vmem:[%s7058_s7 + $0x40] sm:$0xff]  ;;  %v3323_v3 = vld [vmem:[%s7058_s7 + $0x38] sm:$0xff] }
 0x71f   : > { %3372 = vmatprep.subr.mxu0 %v3343_v11 }
 0x720   : > { %3373 = vmatpush1.msra.mxu0 %v3342_v36 }
 0x721   : > { %3374 = vmatprep.subr.mxu0 %v3341_v62  ;;  %v7217_v62 = vld [vmem:[#allocation5_spill] sm:$0xff] }
 0x722   : > { %3375 = vmatpush1.msra.mxu0 %v3340_v8  ;;  %v7218_v8 = vld [vmem:[#allocation2_spill] sm:$0xff] }
 0x723   : > { %3376 = vmatprep.subr.mxu0 %v3339_v16  ;;  %vm3239_vm9 = vcmp.eq.s32.totalorder %v6315_v48, %v7218_v8  ;;  %v3351_v48 = vld [vmem:[%s7058_s7 + $0x118] sm:$0xff] }
 0x724   : > { %3377 = vmatpush1.msra.mxu0 %v3338_v55 }
 0x740   : > { %v4378_v31 = vpop.f32.mrf.mxu0 }
 0x741   : > { %v3124_v58 = vsel %vm7200_vm1, %v4378_v31, 0.0  ;;  %v3337_v31 = vld [vmem:[%s7058_s7 + $0xa8] sm:$0xff]  ;;  %vm3225_vm1 = vcmask 785408  }
 0x742   : > { %v3060_v37 = vpop.f32.mrf.mxu0  ;;  %v3145_v41 = vadd.f32 %v3142_v51, %v3124_v58  ;;  %3378 = vmatprep.subr.mxu0 %v3337_v31  ;;  %v3319_v58 = vld [vmem:[%s7058_s7 + $0x18] sm:$0xff]  ;;  %v7213_v51 = vld [vmem:[#allocation8_spill] sm:$0xff] }
 0x743   : > { %v3123_v34 = vsel %vm7201_vm0, %v3060_v37, 0.0  ;;  %3379 = vmatpush1.msra.mxu0 %v3336_v52  ;;  %v3331_v37 = vld [vmem:[%s7058_s7 + $0x78] sm:$0xff]  ;;  %vm3221_vm0 = vcmask 588800  }
 0x744   : > { %v4381_v17 = vpop.f32.mrf.mxu0  ;;  %v3144_v53 = vadd.f32 %v3141_v59, %v3123_v34  ;;  %3380 = vmatprep.subr.mxu0 %v3335_v13  ;;  %v3318_v34 = vld [vmem:[%s7058_s7 + $0x10] sm:$0xff]  ;;  %v3316_v59 = vld [vmem:[%s7058_s7] sm:$0xff]  ;;  %v7219_v13 = vmov 0.0  }
 0x745   : > { %v3126_v49 = vsel %vm7204_vm5, %v4381_v17, 0.0  ;;  %3381 = vmatpush1.msra.mxu0 %v3334_v50  ;;  %v3328_v17 = vld [vmem:[%s7058_s7 + $0x60] sm:$0xff]  ;;  %v3684_v50 = vsel %vm3239_vm9, 1.0, %v7219_v13 }
 0x746   : > { %v3070_v54 = vpop.f32.mrf.mxu0  ;;  %v3147_v30 = vadd.f32 %v3144_v53, %v3126_v49  ;;  %3382 = vmatprep.subr.mxu0 %v3333_v25 }
 0x747   : > { %v3125_v45 = vsel %vm7209_vm3, %v3070_v54, 0.0  ;;  %3383 = vmatpush1.msra.mxu0 %v3332_v4  ;;  %v3322_v54 = vld [vmem:[%s7058_s7 + $0x30] sm:$0xff] }
 0x748   : > { %v4384_v9 = vpop.f32.mrf.mxu0  ;;  %v3146_v33 = vadd.f32 %v3143_v10, %v3125_v45  ;;  %3384 = vmatprep.subr.mxu0 %v3331_v37  ;;  %v3350_v4 = vld [vmem:[%s7058_s7 + $0x110] sm:$0xff]  ;;  %v3349_v37 = vld [vmem:[%s7058_s7 + $0x108] sm:$0xff] }
 0x749   : > { %v3128_v19 = vsel %vm7211_vm6, %v4384_v9, 0.0  ;;  %3385 = vmatpush1.msra.mxu0 %v3330_v35  ;;  %v3154_v9 = vadd.s32 128, %v7213_v51  ;;  %v3348_v35 = vld [vmem:[%s7058_s7 + $0x100] sm:$0xff] }
 0x74a   : > { %v3080_v2 = vpop.f32.mrf.mxu0  ;;  %v3149_v0 = vadd.f32 %v3146_v33, %v3128_v19  ;;  %3386 = vmatprep.subr.mxu0 %v3329_v14  ;;  %v3472_v14 = vld [vmem:[%s7060_s9 + $0xf8] sm:$0xff]  ;;  %v3465_v51 = vld [vmem:[%s7060_s9 + $0xc0] sm:$0xff] }
 0x74b   : > { %v3127_v24 = vsel %vm7205_vm7, %v3080_v2, 0.0  ;;  %3387 = vmatpush1.msra.mxu0 %v3328_v17  ;;  %v3155_v5 = vcvt.s32.f32 %v3154_v9  ;;  %v3456_v17 = vld [vmem:[%s7060_s9 + $0x78] sm:$0xff]  ;;  %v3449_v9 = vld [vmem:[%s7060_s9 + $0x40] sm:$0xff] }
 0x74c   : > { %v3148_v47 = vadd.f32 %v3145_v41, %v3127_v24  ;;  %v4387_v32 = vpop.f32.mrf.mxu0  ;;  %3388 = vmatprep.subr.mxu0 %v3327_v38  ;;  %v3471_v38 = vld [vmem:[%s7060_s9 + $0xf0] sm:$0xff] }
 0x74d   : > { %v3130_v26 = vsel %vm7206_vm8, %v4387_v32, 0.0  ;;  %3389 = vmatpush1.msra.mxu0 %v3326_v28  ;;  %v3157_v41 = vmul.f32 0.041666668, %v3155_v5  ;;  %v3455_v28 = vld [vmem:[%s7060_s9 + $0x70] sm:$0xff]  ;;  %v3464_v5 = vld [vmem:[%s7060_s9 + $0xb8] sm:$0xff] }
 0x74e   : > { %v6762_v20 = vadd.f32 %v3148_v47, %v3130_v26  ;;  %v3090_v7 = vpop.f32.mrf.mxu0  ;;  %3390 = vmatprep.subr.mxu0 %v3325_v6  ;;  %v7214_v47 = vld [vmem:[#allocation4_spill] sm:$0xff]  ;;  %v7215_v26 = vld [vmem:[#allocation7_spill] sm:$0xff] }
 0x74f   : > { %v3129_v27 = vsel %vm7208_vm10, %v3090_v7, 0.0  ;;  %3391 = vmatpush1.msra.mxu0 %v3324_v21  ;;  %v4500_v53 = vtrunc.f32 %v3157_v41  ;;  %v3156_v32 = vmul.f32 0.041666668, %v7214_v47  ;;  %v3470_v6 = vld [vmem:[%s7060_s9 + $0xe8] sm:$0xff]  ;;  %v3448_v41 = vld [vmem:[%s7060_s9 + $0x38] sm:$0xff] }
 0x750   : > { %v3150_v1 = vadd.f32 %v3147_v30, %v3129_v27  ;;  %3178 = vrot.lane.b32.xlu1 %v6762_v20, %s4631_s12  ;;  %3169 = vrot.lane.b32.xlu0 %v6762_v20, %s4632_s15  ;;  %v4390_v46 = vpop.f32.mrf.mxu0  ;;  %v3454_v21 = vld [vmem:[%s7060_s9 + $0x68] sm:$0xff] }
 0x751   : > { %v3132_v15 = vsel %vm7210_vm15, %v4390_v46, 0.0  ;;  %3392 = vmatprep.subr.mxu0 %v3323_v3  ;;  %v4501_v49 = vcvt.f32.s32 %v4500_v53  ;;  %v4498_v7 = vtrunc.f32 %v3156_v32  ;;  %v3469_v3 = vld [vmem:[%s7060_s9 + $0xe0] sm:$0xff]  ;;  %v3463_v53 = vld [vmem:[%s7060_s9 + $0xb0] sm:$0xff] }
 0x752   : > { %v6778_v43 = vadd.f32 %v3150_v1, %v3132_v15  ;;  %v3100_v56 = vpop.f32.mrf.mxu0  ;;  %3393 = vmatpush1.msra.mxu0 %v3322_v54  ;;  %v3453_v54 = vld [vmem:[%s7060_s9 + $0x60] sm:$0xff] }
 0x753   : > { %v3131_v29 = vsel %vm7212_vm11, %v3100_v56, 0.0  ;;  %3394 = vmatprep.subr.mxu0 %v3321_v12  ;;  %vm3165_vm13 = vcmp.eq.s32.totalorder %v4501_v49, %v7215_v26  ;;  %v4499_v46 = vcvt.f32.s32 %v4498_v7  ;;  %vm3161_vm8 = vcmp.eq.s32.totalorder %v4501_v49, %v7217_v62  ;;  %v3468_v12 = vld [vmem:[%s7060_s9 + $0xd8] sm:$0xff]  ;;  %v3443_v7 = vld [vmem:[%s7060_s9 + $0x10] sm:$0xff] }
 0x754   : > { %3187 = vrot.lane.b32.xlu1 %v6762_v20, %s4633_s25  ;;  %3182 = vrot.lane.b32.xlu0 %v6778_v43, %s4631_s12  ;;  %v6790_v39 = vadd.f32 %v3149_v0, %v3131_v29 }
 0x755   : > { %3395 = vmatpush1.msra.mxu0 %v3320_v40  ;;  %vm3164_vm4 = vcmp.eq.s32.totalorder %v4499_v46, %v7215_v26  ;;  %vm3160_vm10 = vcmp.eq.s32.totalorder %v4499_v46, %v7217_v62  ;;  %v3452_v40 = vld [vmem:[%s7060_s9 + $0x58] sm:$0xff] }
 0x756   : > { %3396 = vmatprep.subr.mxu0 %v3319_v58  ;;  %v3467_v58 = vld [vmem:[%s7060_s9 + $0xd0] sm:$0xff]  ;;  %v3460_v26 = vld [vmem:[%s7060_s9 + $0x98] sm:$0xff] }
 0x757   : > { %3397 = vmatpush1.msra.mxu0 %v3318_v34  ;;  %v3451_v34 = vld [vmem:[%s7060_s9 + $0x50] sm:$0xff] }
 0x758   : > { %3209 = vrot.lane.b32.xlu0 %v6778_v43, %s4634_s26  ;;  %3173 = vrot.lane.b32.xlu1 %v6778_v43, %s4632_s15 }
 0x759   : > { %3398 = vmatprep.subr.mxu0 %v3317_v61  ;;  %v3466_v61 = vld [vmem:[%s7060_s9 + $0xc8] sm:$0xff] }
 0x75a   : > { %3399 = vmatpush1.msra.mxu0 %v3316_v59  ;;  %v3450_v59 = vld [vmem:[%s7060_s9 + $0x48] sm:$0xff] }
 0x75b   : > { %3428 = vmatprep.subr.mxu0 %v3351_v48 }
 0x75c   : > { %3191 = vrot.lane.b32.xlu1 %v6778_v43, %s4633_s25  ;;  %3180 = vrot.lane.b32.xlu0 %v6790_v39, %s4631_s12 }
 0x75d   : > { %3429 = vmatpush2.msra.mxu0 %v3350_v4 }
 0x75e   : > { %3430 = vmatprep.subr.mxu0 %v3349_v37 }
 0x75f   : > { %3431 = vmatpush2.msra.mxu0 %v3348_v35 }
 0x760   : > { %3200 = vrot.lane.b32.xlu1 %v6778_v43, %s4635_s27  ;;  %3198 = vrot.lane.b32.xlu0 %v6790_v39, %s4635_s27 }
 0x764   : > { %3207 = vrot.lane.b32.xlu0 %v6790_v39, %s4634_s26  ;;  %3171 = vrot.lane.b32.xlu1 %v6790_v39, %s4632_s15 }
 0x768   : > { %3205 = vrot.lane.b32.xlu0 %v6762_v20, %s4634_s26  ;;  %3189 = vrot.lane.b32.xlu1 %v6790_v39, %s4633_s25 }
 0x76c   : > { %3196 = vrot.lane.b32.xlu1 %v6762_v20, %s4635_s27 }
 0x7c2   : > { %v3170_v2 = vpop.permute.xlu0 %3169  ;;  %v3179_v60 = vpop.permute.xlu1 %3178 }
 0x7c3   : > { %v3214_v18 = vsel %vm2315_vm12, %v6762_v20, %v3170_v2  ;;  %v3447_v2 = vld [vmem:[%s7060_s9 + $0x30] sm:$0xff] }
 0x7c6   : > { %v3183_v24 = vpop.permute.xlu0 %3182  ;;  %v3188_v57 = vpop.permute.xlu1 %3187 }
 0x7ca   : > { %v3210_v63 = vpop.permute.xlu0 %3209  ;;  %v3174_v30 = vpop.permute.xlu1 %3173 }
 0x7cb   : > { %3685 = vmatprep.subr.msk.mxu1 %vm3165_vm13, %v3210_v63  ;;  %v3216_v23 = vsel %vm2315_vm12, %v6778_v43, %v3174_v30  ;;  %v7216_v43 = vld [vmem:[#allocation6_spill] sm:$0xff]  ;;  %v3459_v30 = vld [vmem:[%s7060_s9 + $0x90] sm:$0xff] }
 0x7cc   : > { %v3220_v45 = vsel %vm3217_vm14, %v3216_v23, %v3183_v24  ;;  %vm3163_vm5 = vcmp.eq.s32.totalorder %v4501_v49, %v7216_v43  ;;  %vm3162_vm7 = vcmp.eq.s32.totalorder %v4499_v46, %v7216_v43  ;;  %v3446_v49 = vld [vmem:[%s7060_s9 + $0x28] sm:$0xff]  ;;  %v3461_v24 = vld [vmem:[%s7060_s9 + $0xa0] sm:$0xff] }
 0x7cd   : > { %v3458_v23 = vld [vmem:[%s7060_s9 + $0x88] sm:$0xff]  ;;  %v3441_v46 = vld [vmem:[%s7060_s9] sm:$0xff] }
 0x7ce   : > { %v3181_v27 = vpop.permute.xlu0 %3180  ;;  %v3192_v1 = vpop.permute.xlu1 %3191 }
 0x7cf   : > { %v3224_v15 = vsel %vm3221_vm0, %v3220_v45, %v3192_v1  ;;  %v3457_v1 = vld [vmem:[%s7060_s9 + $0x80] sm:$0xff]  ;;  %v3356_v45 = vsub.s32 0, %v7218_v8 }
 0x7d2   : > { %v3199_v10 = vpop.permute.xlu0 %3198  ;;  %v3201_v33 = vpop.permute.xlu1 %3200 }
 0x7d3   : > { %v3228_v56 = vsel %vm3225_vm1, %v3224_v15, %v3201_v33  ;;  %v3352_v15 = vld [vmem:[%s7059_s8] sm:$0x3] }
 0x7d4   : > { %v3232_v19 = vsel %vm3229_vm2, %v3228_v56, %v3210_v63  ;;  %v3444_v63 = vld [vmem:[%s7060_s9 + $0x18] sm:$0xff]  ;;  %v3357_v33 = vrot.slane %v3352_v15, %v3356_v45 }
 0x7d5   : > { %3686 = vmatpush1.msk.msra.mxu1 %vm3164_vm4, %v3232_v19 }
 0x7d6   : > { %v3208_v29 = vpop.permute.xlu0 %3207  ;;  %v3172_v0 = vpop.permute.xlu1 %3171 }
 0x7d7   : > { %v3215_v44 = vsel %vm2315_vm12, %v6790_v39, %v3172_v0  ;;  %3687 = vmatprep.subr.msk.mxu1 %vm3163_vm5, %v3208_v29  ;;  %v3218_v39 = vsel %vm3217_vm14, %v3214_v18, %v3179_v60  ;;  %v3462_v60 = vld [vmem:[%s7060_s9 + $0xa8] sm:$0xff] }
 0x7d8   : > { %v3219_v42 = vsel %vm3217_vm14, %v3215_v44, %v3181_v27  ;;  %v3222_v20 = vsel %vm3221_vm0, %v3218_v39, %v3188_v57  ;;  %v3445_v57 = vld [vmem:[%s7060_s9 + $0x20] sm:$0xff]  ;;  %v3442_v27 = vld [vmem:[%s7060_s9 + $0x8] sm:$0xff] }
 0x7da   : > { %v3190_v22 = vpop.permute.xlu1 %3189  ;;  %v3206_v55 = vpop.permute.xlu0 %3205 }
 0x7db   : > { %v3223_v11 = vsel %vm3221_vm0, %v3219_v42, %v3190_v22  ;;  %v3693_v22 = vld [vmem:[%s7061_s10] ss:$0 sm:$0xff] }
 0x7dc   : > { %v3227_v36 = vsel %vm3225_vm1, %v3223_v11, %v3199_v10  ;;  %v3360_v10 = vsub.s32 1, %v7218_v8 }
 0x7dd   : > { %v3231_v16 = vsel %vm3229_vm2, %v3227_v36, %v3208_v29 }
 0x7de   : > { %3688 = vmatpush1.msk.msra.mxu1 %vm3162_vm7, %v3231_v16  ;;  %v3197_v31 = vpop.permute.xlu1 %3196  ;;  %v3361_v56 = vrot.slane %v3352_v15, %v3360_v10 }
 0x7df   : > { %v3226_v52 = vsel %vm3225_vm1, %v3222_v20, %v3197_v31  ;;  %3689 = vmatprep.subr.msk.mxu1 %vm3161_vm8, %v3206_v55 }
 0x7e0   : > { %v3230_v25 = vsel %vm3229_vm2, %v3226_v52, %v3206_v55 }
 0x7e1   : > { %3690 = vmatpush1.msk.msra.mxu1 %vm3160_vm10, %v3230_v25 }
 0x7e2   : > { %3691 = vmatmul.mubr.msk.f32.vlgmr.msra.gmra.mxu1 %vm2315_vm12, %v3684_v50  ;;  %4197 = vmatprep.subr.mxu1 %v3472_v14  ;;  %vm3364_vm12 = vcmask 130048  }
 0x7e3   : > { %4198 = vmatpush3.msra.mxu1 %v3456_v17 }
 0x7e4   : > { %4199 = vmatprep.subr.mxu1 %v3471_v38 }
 0x7e5   : > { %4200 = vmatpush3.msra.mxu1 %v3455_v28 }
 0x7e6   : > { %4201 = vmatprep.subr.mxu1 %v3470_v6 }
 0x7e7   : > { %4202 = vmatpush3.msra.mxu1 %v3454_v21 }
 0x7e8   : > { %4203 = vmatprep.subr.mxu1 %v3469_v3 }
 0x7e9   : > { %4204 = vmatpush3.msra.mxu1 %v3453_v54 }
 0x7ea   : > { %4205 = vmatprep.subr.mxu1 %v3468_v12 }
 0x7eb   : > { %4206 = vmatpush3.msra.mxu1 %v3452_v40 }
 0x7ec   : > { %4207 = vmatprep.subr.mxu1 %v3467_v58 }
 0x7ed   : > { %4208 = vmatpush3.msra.mxu1 %v3451_v34 }
 0x7ee   : > { %4209 = vmatprep.subr.mxu1 %v3466_v61 }
 0x7ef   : > { %4210 = vmatpush3.msra.mxu1 %v3450_v59 }
 0x7f0   : > { %4211 = vmatprep.subr.mxu1 %v3465_v51 }
 0x7f1   : > { %4212 = vmatpush3.msra.mxu1 %v3449_v9 }
 0x7f2   : > { %4213 = vmatprep.subr.mxu1 %v3464_v5 }
 0x7f3   : > { %4214 = vmatpush3.msra.mxu1 %v3448_v41 }
 0x7f4   : > { %4215 = vmatprep.subr.mxu1 %v3463_v53 }
 0x7f5   : > { %4216 = vmatpush3.msra.mxu1 %v3447_v2 }
 0x7f6   : > { %4217 = vmatprep.subr.mxu1 %v3462_v60 }
 0x7f7   : > { %4218 = vmatpush3.msra.mxu1 %v3446_v49 }
 0x7f8   : > { %4219 = vmatprep.subr.mxu1 %v3461_v24 }
 0x7f9   : > { %4220 = vmatpush3.msra.mxu1 %v3445_v57 }
 0x7fa   : > { %4221 = vmatprep.subr.mxu1 %v3460_v26 }
 0x7fb   : > { %4222 = vmatpush3.msra.mxu1 %v3444_v63 }
 0x7fc   : > { %4223 = vmatprep.subr.mxu1 %v3459_v30 }
 0x7fd   : > { %4224 = vmatpush3.msra.mxu1 %v3443_v7 }
 0x7fe   : > { %4225 = vmatprep.subr.mxu1 %v3458_v23 }
 0x7ff   : > { %4226 = vmatpush3.msra.mxu1 %v3442_v27 }
 0x800   : > { %4227 = vmatprep.subr.mxu1 %v3457_v1 }
 0x801   : > { %4228 = vmatpush3.msra.mxu1 %v3441_v46 }
 0x8a2   : > { %v3311_v47 = vpop.f32.mrf.mxu1 }
 0x8a4   : > { %v3313_v32 = vpop.f32.mrf.mxu1 }
 0x8a5   : > { %3692 = vmatprep.mubr.msk.f32.mxu0 %vm3364_vm12, %v3313_v32 }
 0x8a6   : > { %3433 = vmatmul.mubr.f32.vlgmr.msra.gmra.mxu0 %v3311_v47 }
 0x966   : > { %v3434_v19 = vpop.f32.mrf.mxu0 }
 0x967   : > { %v3435_v43 = vadd.f32 %v3434_v19, %v3357_v33 }
 0x968   : > { %v3436_v29 = vpop.f32.mrf.mxu0 }
 0x969   : > { %v3437_v0 = vadd.f32 %v3436_v29, %v3361_v56  ;;  %v3439_v18 = vmax.f32 %v3435_v43, 0.0 }
 0x96b   : > { %v3440_v44 = vmax.f32 %v3437_v0, 0.0 }
 0x96d   : > { %3544 = vmatprep.mubr.f32.mxu1 %v3440_v44 }
 0x96e   : > { %3545 = vmatmul.mubr.f32.vlgmr.msra.gmra.mxu1 %v3439_v18 }
 0xa2e   : > { %v4229_v42 = vpop.f32.mrf.mxu1 }
 0xa30   : > { %v4230_v11 = vpop.f32.mrf.mxu1 }
 0xa31   : > { %v4231_v36 = vadd.f32 %v4230_v11, %v4229_v42 }
 0xa33   : > { %v3547_v62 = vadd.f32 %v4231_v36, %v3693_v22 }
 0xa35   : > { %3550 = vst [vmem:[%s389_s13] sm:$0xf] %v3547_v62 }
 0xa36 PF: > { %s21_s17 = sadd.s32 1, %s4623_s17  }
 0xa37   : > { %p18_p5 = scmp.ge.s32.totalorder %s21_s17, 4  }
 0xa39   :  { %20 = sbr.rel (!%p18_p5) target bundleno = 1 (0x1), region = 94 }

</bundles_post_ra>
